<compile_context>
chip_gen: v7x
topology: tpu7x:2x2x1
jax: 0.10.0
libtpu: 0.0.40
codegen_flags: <defaults>
</compile_context>

<pallas_src>
import functools
import numpy as np
import jax
import jax.numpy as jnp
from jax.experimental import pallas as pl
from jax.experimental.pallas import tpu as pltpu


# ------------------------------ kernel --------------------------------------

def _layernorm(x, gamma, beta, eps=1e-5):
    mean = jnp.mean(x, axis=-1, keepdims=True)
    var = jnp.mean(jnp.square(x - mean), axis=-1, keepdims=True)
    return (x - mean) * jax.lax.rsqrt(var + eps) * gamma + beta


def fused_transformer_kernel(
        # inputs
        x_ref, pe_ref,
        wqkv_ref, bqkv_ref, wo_ref, w1_ref, b1_ref, w2_ref, vecs_ref,
        whead_ref, bhead_ref,
        # outputs (lane-padded to 128)
        feat_ref, logits_ref,
        *, nheads, n_layers):
    """One grid step processes BT batch elements: x_ref view is (BT, S, D)."""
    BT, S, D = x_ref.shape
    hd = D // nheads
    scale = 1.0 / float(np.sqrt(hd))
    f32 = jnp.float32

    # Positional encoding (dropout = identity in eval mode); fold batch into the row dim.
    x = (x_ref[...] + pe_ref[...][None]).reshape(BT * S, D)            # (BT*S, D)

    for l in range(n_layers):                                          # static unroll (n_layers=2)
        vecs = vecs_ref[l]                                             # (6, 1, D): bo, g1, b1, b2, g2, b2

        # ---- fused full-width QKV projection: one (BT*S, D) x (D, 3D) MXU matmul ----
        qkv = jnp.dot(x, wqkv_ref[l], preferred_element_type=f32) + bqkv_ref[l]   # (BT*S, 3D)

        # ---- per-(batch, head) attention; heads live in lane blocks of width hd ----
        outs = []
        for h in range(nheads):
            q = qkv[:, h * hd:(h + 1) * hd].reshape(BT, S, hd)
            k = qkv[:, D + h * hd:D + (h + 1) * hd].reshape(BT, S, hd)
            v = qkv[:, 2 * D + h * hd:2 * D + (h + 1) * hd].reshape(BT, S, hd)
            s = jnp.einsum('bsk,btk->bst', q, k, preferred_element_type=f32) * scale
            s = s - jnp.max(s, axis=-1, keepdims=True)
            p = jnp.exp(s)
            p = p / jnp.sum(p, axis=-1, keepdims=True)                  # exact softmax
            o = jnp.einsum('bst,btk->bsk', p, v, preferred_element_type=f32)
            outs.append(o.reshape(BT * S, hd))
        o_all = jnp.concatenate(outs, axis=-1)                          # (BT*S, D), head-major

        # ---- single out-projection contraction over all heads ----
        attn = jnp.dot(o_all, wo_ref[l], preferred_element_type=f32) + vecs[0]

        # ---- post-norm residual + FFN (full-width slab matmuls) ----
        x = _layernorm(x + attn, vecs[1], vecs[2])
        hid = jnp.maximum(
            jnp.dot(x, w1_ref[l], preferred_element_type=f32) + b1_ref[l], 0.0)
        ff = jnp.dot(hid, w2_ref[l], preferred_element_type=f32) + vecs[3]
        x = _layernorm(x + ff, vecs[4], vecs[5])

    # ---- dense head: flatten(seq, dim) -> one matmul each for dense1 / dense2 ----
    SD = S * D
    LPAD = whead_ref.shape[-1]
    bhead = bhead_ref[...]                                              # (2, 1, LPAD)
    x3 = x.reshape(BT, S, D)
    # s-major lane concat == torch x.reshape(B, -1)
    flat = jnp.concatenate([x3[:, si, :] for si in range(S)], axis=-1)  # (BT, S*D)
    feat = jnp.dot(flat, whead_ref[0:SD, :], preferred_element_type=f32) + bhead[0]
    logits = jnp.dot(feat, whead_ref[SD:SD + LPAD, :],
                     preferred_element_type=f32) + bhead[1]
    feat_ref[...] = feat                                                # (BT, 128) lane-dense
    logits_ref[...] = logits                                            # (BT, 128) lane-dense


# ------------------------------ wrapper --------------------------------------

_PARAM_ORDER = ("w_qkv", "b_qkv", "w_o", "w_ffn1", "b_ffn1", "w_ffn2",
                "vecs", "w_head", "b_head")


def transformer_net_forward(x, pe, params, *, nheads, n_layers,
                            embedding_dim, num_labels):
    B, S, D = x.shape
    LPAD = params["b_head"].shape[-1]
    ordered = tuple(params[k] for k in _PARAM_ORDER)

    # 2 parallel grid steps when B allows (keeps both v7x TensorCores busy); the batch is
    # otherwise folded inside each step so the kernel works on (BT*S, D) slabs.
    steps = 2 if (B % 2 == 0 and B >= 2) else 1
    BT = B // steps

    def const_spec(a):                      # whole array VMEM-resident, constant index_map
        nd = a.ndim
        return pl.BlockSpec(a.shape, lambda b, _nd=nd: (0,) * _nd)

    in_specs = ([pl.BlockSpec((BT, S, D), lambda b: (b, 0, 0))]         # BT batch rows per step
                + [const_spec(pe)]
                + [const_spec(a) for a in ordered])
    out_specs = (pl.BlockSpec((None, BT, LPAD), lambda b: (b, 0, 0)),
                 pl.BlockSpec((None, BT, LPAD), lambda b: (b, 0, 0)))
    out_shape = (jax.ShapeDtypeStruct((steps, BT, LPAD), jnp.float32),
                 jax.ShapeDtypeStruct((steps, BT, LPAD), jnp.float32))

    kernel = functools.partial(fused_transformer_kernel,
                               nheads=nheads, n_layers=n_layers)
    feat_pad, logits_pad = pl.pallas_call(
        kernel,
        grid=(steps,),
        in_specs=in_specs,
        out_specs=out_specs,
        out_shape=out_shape,
        compiler_params=pltpu.CompilerParams(
            dimension_semantics=("parallel",)),
    )(x, pe, *ordered)

    feat = feat_pad.reshape(B, LPAD)[:, :embedding_dim]
    logits = logits_pad.reshape(B, LPAD)[:, :num_labels]
    return feat, logits


# ------------------------------ params / PE -----------------------------------

def make_positional_encoding(max_len, d_model):
    position = np.arange(max_len, dtype=np.float32)[:, None]
    div_term = np.exp(np.arange(0, d_model, 2, dtype=np.float32)
                      * (-np.log(10000.0) / d_model))
    pe = np.zeros((max_len, d_model), dtype=np.float32)
    pe[:, 0::2] = np.sin(position * div_term)
    pe[:, 1::2] = np.cos(position * div_term)
    return jnp.asarray(pe)


def init_params(key, D, H, nheads, n_layers, max_len, num_labels, lane_pad=128):
    """Packed parameter slabs (few, larger input streams)."""
    assert D % nheads == 0 and D <= lane_pad and num_labels <= lane_pad
    S, E = max_len, D
    ks = jax.random.split(key, 16)

    def w(i, shape, scl=0.02):
        return scl * jax.random.normal(ks[i], shape, jnp.float32)

    # per-layer (1, D) vectors packed into a single slab: bo, ln1_g, ln1_b, b2, ln2_g, ln2_b
    bo = w(6, (n_layers, 1, D))
    ln1g = 1.0 + w(7, (n_layers, 1, D))
    ln1b = w(8, (n_layers, 1, D))
    b2 = w(9, (n_layers, 1, D))
    ln2g = 1.0 + w(10, (n_layers, 1, D))
    ln2b = w(11, (n_layers, 1, D))
    vecs = jnp.stack([bo, ln1g, ln1b, b2, ln2g, ln2b], axis=1)          # (n_layers, 6, 1, D)

    # dense head, flattened + zero-padded to lane_pad output width
    wd1 = w(12, (S * D, E))
    bd1 = w(13, (E,))
    wd2 = w(14, (E, num_labels))
    bd2 = w(15, (num_labels,))
    w_head = jnp.zeros((S * D + lane_pad, lane_pad), jnp.float32)
    w_head = w_head.at[:S * D, :E].set(wd1)
    w_head = w_head.at[S * D:S * D + E, :num_labels].set(wd2)
    b_head = jnp.zeros((2, 1, lane_pad), jnp.float32)
    b_head = b_head.at[0, 0, :E].set(bd1)
    b_head = b_head.at[1, 0, :num_labels].set(bd2)

    return dict(
        # fused full-width QKV: columns [0:D]=Q, [D:2D]=K, [2D:3D]=V; head-major hd blocks within.
        w_qkv=w(0, (n_layers, D, 3 * D)),
        b_qkv=w(1, (n_layers, 1, 3 * D)),
        w_o=w(2, (n_layers, D, D)),          # out_proj, rows grouped per head
        w_ffn1=w(3, (n_layers, D, H)),
        b_ffn1=w(4, (n_layers, 1, H)),
        w_ffn2=w(5, (n_layers, H, D)),
        vecs=vecs,
        w_head=w_head,
        b_head=b_head,
    )


# ------------------------------ pure-JAX reference ----------------------------

def reference_forward(x, pe, p, *, nheads, n_layers, embedding_dim, num_labels):
    B, S, D = x.shape
    hd = D // nheads
    scale = 1.0 / float(np.sqrt(hd))

    def ln(v, g, b, eps=1e-5):
        m = v.mean(-1, keepdims=True)
        var = ((v - m) ** 2).mean(-1, keepdims=True)
        return (v - m) / jnp.sqrt(var + eps) * g + b

    y = x + pe[None]
    for l in range(n_layers):
        qkv = jnp.einsum('bsd,df->bsf', y, p['w_qkv'][l]) + p['b_qkv'][l]
        q, k, v = jnp.split(qkv, 3, axis=-1)

        def heads(t):
            return t.reshape(B, S, nheads, hd).transpose(0, 2, 1, 3)

        qh, kh, vh = heads(q), heads(k), heads(v)
        s = jnp.einsum('bhsk,bhtk->bhst', qh, kh) * scale
        a = jax.nn.softmax(s, axis=-1)
        o = jnp.einsum('bhst,bhtk->bhsk', a, vh)
        o = o.transpose(0, 2, 1, 3).reshape(B, S, D)
        attn = jnp.einsum('bsd,de->bse', o, p['w_o'][l]) + p['vecs'][l, 0]
        y = ln(y + attn, p['vecs'][l, 1], p['vecs'][l, 2])
        hid = jax.nn.relu(jnp.einsum('bsd,dh->bsh', y, p['w_ffn1'][l]) + p['b_ffn1'][l])
        ff = jnp.einsum('bsh,hd->bsd', hid, p['w_ffn2'][l]) + p['vecs'][l, 3]
        y = ln(y + ff, p['vecs'][l, 4], p['vecs'][l, 5])

    flat = y.reshape(B, S * D)
    wd1 = p['w_head'][:S * D]
    wd2 = p['w_head'][S * D:]
    feat = flat @ wd1 + p['b_head'][0]
    logits = feat @ wd2 + p['b_head'][1]
    return feat[:, :embedding_dim], logits[:, :num_labels]


# ------------------------------ main ------------------------------------------

if __name__ == "__main__":
    # TransformerNet(embedding_dim=32, hidden_size=64, nheads=4, n_layers=2,
    #                max_len=8, num_labels=4, dropout=0.1) in eval mode (dropout = identity).
    B, S, D = 4, 8, 32                 # seq_len == max_len (dense1 expects D * max_len inputs)
    H, NHEADS, N_LAYERS, NUM_LABELS = 64, 4, 2, 4

    key = jax.random.PRNGKey(0)
    kx, kp = jax.random.split(key)
    x = jax.random.normal(kx, (B, S, D), jnp.float32)
    pe = make_positional_encoding(S, D)
    params = init_params(kp, D, H, NHEADS, N_LAYERS, S, NUM_LABELS)

    features, logits = transformer_net_forward(
        x, pe, params, nheads=NHEADS, n_layers=N_LAYERS,
        embedding_dim=D, num_labels=NUM_LABELS)
    features = jax.block_until_ready(features)
    logits = jax.block_until_ready(logits)

    assert features.shape == (B, D) and logits.shape == (B, NUM_LABELS)
    assert np.all(np.isfinite(np.asarray(features)))
    assert np.all(np.isfinite(np.asarray(logits)))

    # Sanity check vs pure-JAX reference (tolerance accounts for MXU default-precision matmuls
    # on both sides; precision=HIGHEST could tighten this further but is left at default).
    ref_feat, ref_logits = reference_forward(
        x, pe, params, nheads=NHEADS, n_layers=N_LAYERS,
        embedding_dim=D, num_labels=NUM_LABELS)
    assert np.allclose(np.asarray(features), np.asarray(ref_feat),
                       rtol=5e-2, atol=2e-2), "features mismatch vs reference"
    assert np.allclose(np.asarray(logits), np.asarray(ref_logits),
                       rtol=5e-2, atol=5e-3), "logits mismatch vs reference"

    print("KERNEL_OK")
</pallas_src>

<mosaic_0001>
module attributes {stable_mosaic.version = 11 : i64} {
  func.func @fused_transformer_kernel(%arg0: i32, %arg1: memref<2x8x32xf32, #tpu.memory_space<vmem>>, %arg2: memref<8x32xf32, #tpu.memory_space<vmem>>, %arg3: memref<2x32x96xf32, #tpu.memory_space<vmem>>, %arg4: memref<2x1x96xf32, #tpu.memory_space<vmem>>, %arg5: memref<2x32x32xf32, #tpu.memory_space<vmem>>, %arg6: memref<2x32x64xf32, #tpu.memory_space<vmem>>, %arg7: memref<2x1x64xf32, #tpu.memory_space<vmem>>, %arg8: memref<2x64x32xf32, #tpu.memory_space<vmem>>, %arg9: memref<2x6x1x32xf32, #tpu.memory_space<vmem>>, %arg10: memref<384x128xf32, #tpu.memory_space<vmem>>, %arg11: memref<2x1x128xf32, #tpu.memory_space<vmem>>, %arg12: memref<1x2x128xf32, #tpu.memory_space<vmem>>, %arg13: memref<1x2x128xf32, #tpu.memory_space<vmem>>) attributes {dimension_semantics = [#tpu.dimension_semantics<parallel>], iteration_bounds = array<i64: 2>, scalar_prefetch = 0 : i64, scratch_operands = 0 : i64, tpu.core_type = #tpu.core_type<tc>, window_params = [{transform_indices = @transform_0, window_bounds = array<i64: 2, 8, 32>}, {pipeline_mode = #tpu.pipeline_mode<synchronous>, transform_indices = @transform_1, window_bounds = array<i64: 8, 32>}, {pipeline_mode = #tpu.pipeline_mode<synchronous>, transform_indices = @transform_2, window_bounds = array<i64: 2, 32, 96>}, {pipeline_mode = #tpu.pipeline_mode<synchronous>, transform_indices = @transform_3, window_bounds = array<i64: 2, 1, 96>}, {pipeline_mode = #tpu.pipeline_mode<synchronous>, transform_indices = @transform_4, window_bounds = array<i64: 2, 32, 32>}, {pipeline_mode = #tpu.pipeline_mode<synchronous>, transform_indices = @transform_5, window_bounds = array<i64: 2, 32, 64>}, {pipeline_mode = #tpu.pipeline_mode<synchronous>, transform_indices = @transform_6, window_bounds = array<i64: 2, 1, 64>}, {pipeline_mode = #tpu.pipeline_mode<synchronous>, transform_indices = @transform_7, window_bounds = array<i64: 2, 64, 32>}, {pipeline_mode = #tpu.pipeline_mode<synchronous>, transform_indices = @transform_8, window_bounds = array<i64: 2, 6, 1, 32>}, {pipeline_mode = #tpu.pipeline_mode<synchronous>, transform_indices = @transform_9, window_bounds = array<i64: 384, 128>}, {pipeline_mode = #tpu.pipeline_mode<synchronous>, transform_indices = @transform_10, window_bounds = array<i64: 2, 1, 128>}, {transform_indices = @transform_11, window_bounds = array<i64: 1, 2, 128>}, {transform_indices = @transform_12, window_bounds = array<i64: 1, 2, 128>}]} {
    %c0 = arith.constant 0 : index
    %c0_0 = arith.constant 0 : index
    %c0_1 = arith.constant 0 : index
    %0 = vector.load %arg1[%c0, %c0_0, %c0_1] : memref<2x8x32xf32, #tpu.memory_space<vmem>>, vector<2x8x32xf32>
    %c0_2 = arith.constant 0 : index
    %c0_3 = arith.constant 0 : index
    %1 = vector.load %arg2[%c0_2, %c0_3] : memref<8x32xf32, #tpu.memory_space<vmem>>, vector<8x32xf32>
    %2 = vector.shape_cast %1 : vector<8x32xf32> to vector<1x8x32xf32>
    %3 = vector.broadcast %2 : vector<1x8x32xf32> to vector<2x8x32xf32>
    %4 = arith.addf %0, %3 : vector<2x8x32xf32>
    %5 = vector.shape_cast %4 : vector<2x8x32xf32> to vector<16x32xf32>
    %c0_4 = arith.constant 0 : index
    %c0_5 = arith.constant 0 : index
    %c0_6 = arith.constant 0 : index
    %c0_7 = arith.constant 0 : index
    %6 = vector.load %arg9[%c0_4, %c0_5, %c0_6, %c0_7] : memref<2x6x1x32xf32, #tpu.memory_space<vmem>>, vector<1x6x1x32xf32>
    %7 = vector.shape_cast %6 : vector<1x6x1x32xf32> to vector<6x1x32xf32>
    %c0_8 = arith.constant 0 : index
    %c0_9 = arith.constant 0 : index
    %c0_10 = arith.constant 0 : index
    %8 = vector.load %arg3[%c0_8, %c0_9, %c0_10] : memref<2x32x96xf32, #tpu.memory_space<vmem>>, vector<1x32x96xf32>
    %9 = vector.shape_cast %8 : vector<1x32x96xf32> to vector<32x96xf32>
    %cst = arith.constant dense<0.000000e+00> : vector<16x96xf32>
    %10 = tpu.matmul %5, %9, %cst {dimension_numbers = #tpu.dot_dimension_numbers<[1], [0], [0], [1], [0, 0, 1, 1], [], []>} : vector<16x32xf32>, vector<32x96xf32>, vector<16x96xf32> -> vector<16x96xf32>
    %c0_11 = arith.constant 0 : index
    %c0_12 = arith.constant 0 : index
    %c0_13 = arith.constant 0 : index
    %11 = vector.load %arg4[%c0_11, %c0_12, %c0_13] : memref<2x1x96xf32, #tpu.memory_space<vmem>>, vector<1x1x96xf32>
    %12 = vector.shape_cast %11 : vector<1x1x96xf32> to vector<1x96xf32>
    %13 = vector.broadcast %12 : vector<1x96xf32> to vector<16x96xf32>
    %14 = arith.addf %10, %13 : vector<16x96xf32>
    %15 = vector.extract_strided_slice %14 {offsets = [0, 0], sizes = [16, 8], strides = [1, 1]} : vector<16x96xf32> to vector<16x8xf32>
    %16 = vector.shape_cast %15 : vector<16x8xf32> to vector<2x8x8xf32>
    %17 = vector.extract_strided_slice %14 {offsets = [0, 32], sizes = [16, 8], strides = [1, 1]} : vector<16x96xf32> to vector<16x8xf32>
    %18 = vector.shape_cast %17 : vector<16x8xf32> to vector<2x8x8xf32>
    %19 = vector.extract_strided_slice %14 {offsets = [0, 64], sizes = [16, 8], strides = [1, 1]} : vector<16x96xf32> to vector<16x8xf32>
    %20 = vector.shape_cast %19 : vector<16x8xf32> to vector<2x8x8xf32>
    "tpu.trace_start"() <{level = 10 : i32, message = "bsk,btk->bst"}> : () -> ()
    %cst_14 = arith.constant dense<0.000000e+00> : vector<2x8x8xf32>
    %21 = tpu.matmul %16, %18, %cst_14 {dimension_numbers = #tpu.dot_dimension_numbers<[2], [2], [1], [1], [0, 0, 0, 1, 1, 1], [0], [0]>} : vector<2x8x8xf32>, vector<2x8x8xf32>, vector<2x8x8xf32> -> vector<2x8x8xf32>
    "tpu.trace_stop"() : () -> ()
    %cst_15 = arith.constant 0.353553385 : f32
    %22 = vector.broadcast %cst_15 : f32 to vector<2x8x8xf32>
    %23 = arith.mulf %21, %22 : vector<2x8x8xf32>
    %cst_16 = arith.constant dense<0xFF800000> : vector<2x8xf32>
    %24 = vector.multi_reduction <maximumf>, %23, %cst_16 [2] : vector<2x8x8xf32> to vector<2x8xf32>
    %25 = vector.shape_cast %24 : vector<2x8xf32> to vector<2x8x1xf32>
    %26 = vector.broadcast %25 : vector<2x8x1xf32> to vector<2x8x8xf32>
    %27 = arith.subf %23, %26 : vector<2x8x8xf32>
    %28 = math.exp %27 : vector<2x8x8xf32>
    %cst_17 = arith.constant dense<0.000000e+00> : vector<2x8xf32>
    %29 = vector.multi_reduction <add>, %28, %cst_17 [2] : vector<2x8x8xf32> to vector<2x8xf32>
    %30 = vector.shape_cast %29 : vector<2x8xf32> to vector<2x8x1xf32>
    %31 = vector.broadcast %30 : vector<2x8x1xf32> to vector<2x8x8xf32>
    %32 = arith.divf %28, %31 : vector<2x8x8xf32>
    "tpu.trace_start"() <{level = 10 : i32, message = "bst,btk->bsk"}> : () -> ()
    %cst_18 = arith.constant dense<0.000000e+00> : vector<2x8x8xf32>
    %33 = tpu.matmul %32, %20, %cst_18 {dimension_numbers = #tpu.dot_dimension_numbers<[2], [1], [1], [2], [0, 0, 0, 1, 1, 2], [0], [0]>} : vector<2x8x8xf32>, vector<2x8x8xf32>, vector<2x8x8xf32> -> vector<2x8x8xf32>
    "tpu.trace_stop"() : () -> ()
    %34 = vector.shape_cast %33 : vector<2x8x8xf32> to vector<16x8xf32>
    %35 = vector.extract_strided_slice %14 {offsets = [0, 8], sizes = [16, 8], strides = [1, 1]} : vector<16x96xf32> to vector<16x8xf32>
    %36 = vector.shape_cast %35 : vector<16x8xf32> to vector<2x8x8xf32>
    %37 = vector.extract_strided_slice %14 {offsets = [0, 40], sizes = [16, 8], strides = [1, 1]} : vector<16x96xf32> to vector<16x8xf32>
    %38 = vector.shape_cast %37 : vector<16x8xf32> to vector<2x8x8xf32>
    %39 = vector.extract_strided_slice %14 {offsets = [0, 72], sizes = [16, 8], strides = [1, 1]} : vector<16x96xf32> to vector<16x8xf32>
    %40 = vector.shape_cast %39 : vector<16x8xf32> to vector<2x8x8xf32>
    "tpu.trace_start"() <{level = 10 : i32, message = "bsk,btk->bst"}> : () -> ()
    %cst_19 = arith.constant dense<0.000000e+00> : vector<2x8x8xf32>
    %41 = tpu.matmul %36, %38, %cst_19 {dimension_numbers = #tpu.dot_dimension_numbers<[2], [2], [1], [1], [0, 0, 0, 1, 1, 1], [0], [0]>} : vector<2x8x8xf32>, vector<2x8x8xf32>, vector<2x8x8xf32> -> vector<2x8x8xf32>
    "tpu.trace_stop"() : () -> ()
    %cst_20 = arith.constant 0.353553385 : f32
    %42 = vector.broadcast %cst_20 : f32 to vector<2x8x8xf32>
    %43 = arith.mulf %41, %42 : vector<2x8x8xf32>
    %cst_21 = arith.constant dense<0xFF800000> : vector<2x8xf32>
    %44 = vector.multi_reduction <maximumf>, %43, %cst_21 [2] : vector<2x8x8xf32> to vector<2x8xf32>
    %45 = vector.shape_cast %44 : vector<2x8xf32> to vector<2x8x1xf32>
    %46 = vector.broadcast %45 : vector<2x8x1xf32> to vector<2x8x8xf32>
    %47 = arith.subf %43, %46 : vector<2x8x8xf32>
    %48 = math.exp %47 : vector<2x8x8xf32>
    %cst_22 = arith.constant dense<0.000000e+00> : vector<2x8xf32>
    %49 = vector.multi_reduction <add>, %48, %cst_22 [2] : vector<2x8x8xf32> to vector<2x8xf32>
    %50 = vector.shape_cast %49 : vector<2x8xf32> to vector<2x8x1xf32>
    %51 = vector.broadcast %50 : vector<2x8x1xf32> to vector<2x8x8xf32>
    %52 = arith.divf %48, %51 : vector<2x8x8xf32>
    "tpu.trace_start"() <{level = 10 : i32, message = "bst,btk->bsk"}> : () -> ()
    %cst_23 = arith.constant dense<0.000000e+00> : vector<2x8x8xf32>
    %53 = tpu.matmul %52, %40, %cst_23 {dimension_numbers = #tpu.dot_dimension_numbers<[2], [1], [1], [2], [0, 0, 0, 1, 1, 2], [0], [0]>} : vector<2x8x8xf32>, vector<2x8x8xf32>, vector<2x8x8xf32> -> vector<2x8x8xf32>
    "tpu.trace_stop"() : () -> ()
    %54 = vector.shape_cast %53 : vector<2x8x8xf32> to vector<16x8xf32>
    %55 = vector.extract_strided_slice %14 {offsets = [0, 16], sizes = [16, 8], strides = [1, 1]} : vector<16x96xf32> to vector<16x8xf32>
    %56 = vector.shape_cast %55 : vector<16x8xf32> to vector<2x8x8xf32>
    %57 = vector.extract_strided_slice %14 {offsets = [0, 48], sizes = [16, 8], strides = [1, 1]} : vector<16x96xf32> to vector<16x8xf32>
    %58 = vector.shape_cast %57 : vector<16x8xf32> to vector<2x8x8xf32>
    %59 = vector.extract_strided_slice %14 {offsets = [0, 80], sizes = [16, 8], strides = [1, 1]} : vector<16x96xf32> to vector<16x8xf32>
    %60 = vector.shape_cast %59 : vector<16x8xf32> to vector<2x8x8xf32>
    "tpu.trace_start"() <{level = 10 : i32, message = "bsk,btk->bst"}> : () -> ()
    %cst_24 = arith.constant dense<0.000000e+00> : vector<2x8x8xf32>
    %61 = tpu.matmul %56, %58, %cst_24 {dimension_numbers = #tpu.dot_dimension_numbers<[2], [2], [1], [1], [0, 0, 0, 1, 1, 1], [0], [0]>} : vector<2x8x8xf32>, vector<2x8x8xf32>, vector<2x8x8xf32> -> vector<2x8x8xf32>
    "tpu.trace_stop"() : () -> ()
    %cst_25 = arith.constant 0.353553385 : f32
    %62 = vector.broadcast %cst_25 : f32 to vector<2x8x8xf32>
    %63 = arith.mulf %61, %62 : vector<2x8x8xf32>
    %cst_26 = arith.constant dense<0xFF800000> : vector<2x8xf32>
    %64 = vector.multi_reduction <maximumf>, %63, %cst_26 [2] : vector<2x8x8xf32> to vector<2x8xf32>
    %65 = vector.shape_cast %64 : vector<2x8xf32> to vector<2x8x1xf32>
    %66 = vector.broadcast %65 : vector<2x8x1xf32> to vector<2x8x8xf32>
    %67 = arith.subf %63, %66 : vector<2x8x8xf32>
    %68 = math.exp %67 : vector<2x8x8xf32>
    %cst_27 = arith.constant dense<0.000000e+00> : vector<2x8xf32>
    %69 = vector.multi_reduction <add>, %68, %cst_27 [2] : vector<2x8x8xf32> to vector<2x8xf32>
    %70 = vector.shape_cast %69 : vector<2x8xf32> to vector<2x8x1xf32>
    %71 = vector.broadcast %70 : vector<2x8x1xf32> to vector<2x8x8xf32>
    %72 = arith.divf %68, %71 : vector<2x8x8xf32>
    "tpu.trace_start"() <{level = 10 : i32, message = "bst,btk->bsk"}> : () -> ()
    %cst_28 = arith.constant dense<0.000000e+00> : vector<2x8x8xf32>
    %73 = tpu.matmul %72, %60, %cst_28 {dimension_numbers = #tpu.dot_dimension_numbers<[2], [1], [1], [2], [0, 0, 0, 1, 1, 2], [0], [0]>} : vector<2x8x8xf32>, vector<2x8x8xf32>, vector<2x8x8xf32> -> vector<2x8x8xf32>
    "tpu.trace_stop"() : () -> ()
    %74 = vector.shape_cast %73 : vector<2x8x8xf32> to vector<16x8xf32>
    %75 = vector.extract_strided_slice %14 {offsets = [0, 24], sizes = [16, 8], strides = [1, 1]} : vector<16x96xf32> to vector<16x8xf32>
    %76 = vector.shape_cast %75 : vector<16x8xf32> to vector<2x8x8xf32>
    %77 = vector.extract_strided_slice %14 {offsets = [0, 56], sizes = [16, 8], strides = [1, 1]} : vector<16x96xf32> to vector<16x8xf32>
    %78 = vector.shape_cast %77 : vector<16x8xf32> to vector<2x8x8xf32>
    %79 = vector.extract_strided_slice %14 {offsets = [0, 88], sizes = [16, 8], strides = [1, 1]} : vector<16x96xf32> to vector<16x8xf32>
    %80 = vector.shape_cast %79 : vector<16x8xf32> to vector<2x8x8xf32>
    "tpu.trace_start"() <{level = 10 : i32, message = "bsk,btk->bst"}> : () -> ()
    %cst_29 = arith.constant dense<0.000000e+00> : vector<2x8x8xf32>
    %81 = tpu.matmul %76, %78, %cst_29 {dimension_numbers = #tpu.dot_dimension_numbers<[2], [2], [1], [1], [0, 0, 0, 1, 1, 1], [0], [0]>} : vector<2x8x8xf32>, vector<2x8x8xf32>, vector<2x8x8xf32> -> vector<2x8x8xf32>
    "tpu.trace_stop"() : () -> ()
    %cst_30 = arith.constant 0.353553385 : f32
    %82 = vector.broadcast %cst_30 : f32 to vector<2x8x8xf32>
    %83 = arith.mulf %81, %82 : vector<2x8x8xf32>
    %cst_31 = arith.constant dense<0xFF800000> : vector<2x8xf32>
    %84 = vector.multi_reduction <maximumf>, %83, %cst_31 [2] : vector<2x8x8xf32> to vector<2x8xf32>
    %85 = vector.shape_cast %84 : vector<2x8xf32> to vector<2x8x1xf32>
    %86 = vector.broadcast %85 : vector<2x8x1xf32> to vector<2x8x8xf32>
    %87 = arith.subf %83, %86 : vector<2x8x8xf32>
    %88 = math.exp %87 : vector<2x8x8xf32>
    %cst_32 = arith.constant dense<0.000000e+00> : vector<2x8xf32>
    %89 = vector.multi_reduction <add>, %88, %cst_32 [2] : vector<2x8x8xf32> to vector<2x8xf32>
    %90 = vector.shape_cast %89 : vector<2x8xf32> to vector<2x8x1xf32>
    %91 = vector.broadcast %90 : vector<2x8x1xf32> to vector<2x8x8xf32>
    %92 = arith.divf %88, %91 : vector<2x8x8xf32>
    "tpu.trace_start"() <{level = 10 : i32, message = "bst,btk->bsk"}> : () -> ()
    %cst_33 = arith.constant dense<0.000000e+00> : vector<2x8x8xf32>
    %93 = tpu.matmul %92, %80, %cst_33 {dimension_numbers = #tpu.dot_dimension_numbers<[2], [1], [1], [2], [0, 0, 0, 1, 1, 2], [0], [0]>} : vector<2x8x8xf32>, vector<2x8x8xf32>, vector<2x8x8xf32> -> vector<2x8x8xf32>
    "tpu.trace_stop"() : () -> ()
    %94 = vector.shape_cast %93 : vector<2x8x8xf32> to vector<16x8xf32>
    %95 = tpu.concatenate %34, %54, %74, %94 in 1 : vector<16x8xf32>, vector<16x8xf32>, vector<16x8xf32>, vector<16x8xf32> -> vector<16x32xf32>
    %c0_34 = arith.constant 0 : index
    %c0_35 = arith.constant 0 : index
    %c0_36 = arith.constant 0 : index
    %96 = vector.load %arg5[%c0_34, %c0_35, %c0_36] : memref<2x32x32xf32, #tpu.memory_space<vmem>>, vector<1x32x32xf32>
    %97 = vector.shape_cast %96 : vector<1x32x32xf32> to vector<32x32xf32>
    %cst_37 = arith.constant dense<0.000000e+00> : vector<16x32xf32>
    %98 = tpu.matmul %95, %97, %cst_37 {dimension_numbers = #tpu.dot_dimension_numbers<[1], [0], [0], [1], [0, 0, 1, 1], [], []>} : vector<16x32xf32>, vector<32x32xf32>, vector<16x32xf32> -> vector<16x32xf32>
    %99 = vector.extract_strided_slice %7 {offsets = [0, 0, 0], sizes = [1, 1, 32], strides = [1, 1, 1]} : vector<6x1x32xf32> to vector<1x1x32xf32>
    %100 = vector.shape_cast %99 : vector<1x1x32xf32> to vector<1x32xf32>
    %101 = vector.broadcast %100 : vector<1x32xf32> to vector<16x32xf32>
    %102 = arith.addf %98, %101 : vector<16x32xf32>
    %103 = arith.addf %5, %102 : vector<16x32xf32>
    %104 = vector.extract_strided_slice %7 {offsets = [1, 0, 0], sizes = [1, 1, 32], strides = [1, 1, 1]} : vector<6x1x32xf32> to vector<1x1x32xf32>
    %105 = vector.shape_cast %104 : vector<1x1x32xf32> to vector<1x32xf32>
    %106 = vector.extract_strided_slice %7 {offsets = [2, 0, 0], sizes = [1, 1, 32], strides = [1, 1, 1]} : vector<6x1x32xf32> to vector<1x1x32xf32>
    %107 = vector.shape_cast %106 : vector<1x1x32xf32> to vector<1x32xf32>
    %cst_38 = arith.constant dense<0.000000e+00> : vector<16xf32>
    %108 = vector.multi_reduction <add>, %103, %cst_38 [1] : vector<16x32xf32> to vector<16xf32>
    %109 = vector.shape_cast %108 : vector<16xf32> to vector<16x1xf32>
    %cst_39 = arith.constant 3.200000e+01 : f32
    %110 = vector.broadcast %cst_39 : f32 to vector<16x1xf32>
    %111 = arith.divf %109, %110 : vector<16x1xf32>
    %112 = vector.broadcast %111 : vector<16x1xf32> to vector<16x32xf32>
    %113 = arith.subf %103, %112 : vector<16x32xf32>
    %114 = arith.mulf %113, %113 : vector<16x32xf32>
    %cst_40 = arith.constant dense<0.000000e+00> : vector<16xf32>
    %115 = vector.multi_reduction <add>, %114, %cst_40 [1] : vector<16x32xf32> to vector<16xf32>
    %116 = vector.shape_cast %115 : vector<16xf32> to vector<16x1xf32>
    %cst_41 = arith.constant 3.200000e+01 : f32
    %117 = vector.broadcast %cst_41 : f32 to vector<16x1xf32>
    %118 = arith.divf %116, %117 : vector<16x1xf32>
    %119 = vector.broadcast %111 : vector<16x1xf32> to vector<16x32xf32>
    %120 = arith.subf %103, %119 : vector<16x32xf32>
    %cst_42 = arith.constant 9.99999974E-6 : f32
    %121 = vector.broadcast %cst_42 : f32 to vector<16x1xf32>
    %122 = arith.addf %118, %121 : vector<16x1xf32>
    %123 = math.rsqrt %122 : vector<16x1xf32>
    %124 = vector.broadcast %123 : vector<16x1xf32> to vector<16x32xf32>
    %125 = arith.mulf %120, %124 : vector<16x32xf32>
    %126 = vector.broadcast %105 : vector<1x32xf32> to vector<16x32xf32>
    %127 = arith.mulf %125, %126 : vector<16x32xf32>
    %128 = vector.broadcast %107 : vector<1x32xf32> to vector<16x32xf32>
    %129 = arith.addf %127, %128 : vector<16x32xf32>
    %c0_43 = arith.constant 0 : index
    %c0_44 = arith.constant 0 : index
    %c0_45 = arith.constant 0 : index
    %130 = vector.load %arg6[%c0_43, %c0_44, %c0_45] : memref<2x32x64xf32, #tpu.memory_space<vmem>>, vector<1x32x64xf32>
    %131 = vector.shape_cast %130 : vector<1x32x64xf32> to vector<32x64xf32>
    %cst_46 = arith.constant dense<0.000000e+00> : vector<16x64xf32>
    %132 = tpu.matmul %129, %131, %cst_46 {dimension_numbers = #tpu.dot_dimension_numbers<[1], [0], [0], [1], [0, 0, 1, 1], [], []>} : vector<16x32xf32>, vector<32x64xf32>, vector<16x64xf32> -> vector<16x64xf32>
    %c0_47 = arith.constant 0 : index
    %c0_48 = arith.constant 0 : index
    %c0_49 = arith.constant 0 : index
    %133 = vector.load %arg7[%c0_47, %c0_48, %c0_49] : memref<2x1x64xf32, #tpu.memory_space<vmem>>, vector<1x1x64xf32>
    %134 = vector.shape_cast %133 : vector<1x1x64xf32> to vector<1x64xf32>
    %135 = vector.broadcast %134 : vector<1x64xf32> to vector<16x64xf32>
    %136 = arith.addf %132, %135 : vector<16x64xf32>
    %cst_50 = arith.constant 0.000000e+00 : f32
    %137 = vector.broadcast %cst_50 : f32 to vector<16x64xf32>
    %138 = arith.maximumf %136, %137 : vector<16x64xf32>
    %c0_51 = arith.constant 0 : index
    %c0_52 = arith.constant 0 : index
    %c0_53 = arith.constant 0 : index
    %139 = vector.load %arg8[%c0_51, %c0_52, %c0_53] : memref<2x64x32xf32, #tpu.memory_space<vmem>>, vector<1x64x32xf32>
    %140 = vector.shape_cast %139 : vector<1x64x32xf32> to vector<64x32xf32>
    %cst_54 = arith.constant dense<0.000000e+00> : vector<16x32xf32>
    %141 = tpu.matmul %138, %140, %cst_54 {dimension_numbers = #tpu.dot_dimension_numbers<[1], [0], [0], [1], [0, 0, 1, 1], [], []>} : vector<16x64xf32>, vector<64x32xf32>, vector<16x32xf32> -> vector<16x32xf32>
    %142 = vector.extract_strided_slice %7 {offsets = [3, 0, 0], sizes = [1, 1, 32], strides = [1, 1, 1]} : vector<6x1x32xf32> to vector<1x1x32xf32>
    %143 = vector.shape_cast %142 : vector<1x1x32xf32> to vector<1x32xf32>
    %144 = vector.broadcast %143 : vector<1x32xf32> to vector<16x32xf32>
    %145 = arith.addf %141, %144 : vector<16x32xf32>
    %146 = arith.addf %129, %145 : vector<16x32xf32>
    %147 = vector.extract_strided_slice %7 {offsets = [4, 0, 0], sizes = [1, 1, 32], strides = [1, 1, 1]} : vector<6x1x32xf32> to vector<1x1x32xf32>
    %148 = vector.shape_cast %147 : vector<1x1x32xf32> to vector<1x32xf32>
    %149 = vector.extract_strided_slice %7 {offsets = [5, 0, 0], sizes = [1, 1, 32], strides = [1, 1, 1]} : vector<6x1x32xf32> to vector<1x1x32xf32>
    %150 = vector.shape_cast %149 : vector<1x1x32xf32> to vector<1x32xf32>
    %cst_55 = arith.constant dense<0.000000e+00> : vector<16xf32>
    %151 = vector.multi_reduction <add>, %146, %cst_55 [1] : vector<16x32xf32> to vector<16xf32>
    %152 = vector.shape_cast %151 : vector<16xf32> to vector<16x1xf32>
    %cst_56 = arith.constant 3.200000e+01 : f32
    %153 = vector.broadcast %cst_56 : f32 to vector<16x1xf32>
    %154 = arith.divf %152, %153 : vector<16x1xf32>
    %155 = vector.broadcast %154 : vector<16x1xf32> to vector<16x32xf32>
    %156 = arith.subf %146, %155 : vector<16x32xf32>
    %157 = arith.mulf %156, %156 : vector<16x32xf32>
    %cst_57 = arith.constant dense<0.000000e+00> : vector<16xf32>
    %158 = vector.multi_reduction <add>, %157, %cst_57 [1] : vector<16x32xf32> to vector<16xf32>
    %159 = vector.shape_cast %158 : vector<16xf32> to vector<16x1xf32>
    %cst_58 = arith.constant 3.200000e+01 : f32
    %160 = vector.broadcast %cst_58 : f32 to vector<16x1xf32>
    %161 = arith.divf %159, %160 : vector<16x1xf32>
    %162 = vector.broadcast %154 : vector<16x1xf32> to vector<16x32xf32>
    %163 = arith.subf %146, %162 : vector<16x32xf32>
    %cst_59 = arith.constant 9.99999974E-6 : f32
    %164 = vector.broadcast %cst_59 : f32 to vector<16x1xf32>
    %165 = arith.addf %161, %164 : vector<16x1xf32>
    %166 = math.rsqrt %165 : vector<16x1xf32>
    %167 = vector.broadcast %166 : vector<16x1xf32> to vector<16x32xf32>
    %168 = arith.mulf %163, %167 : vector<16x32xf32>
    %169 = vector.broadcast %148 : vector<1x32xf32> to vector<16x32xf32>
    %170 = arith.mulf %168, %169 : vector<16x32xf32>
    %171 = vector.broadcast %150 : vector<1x32xf32> to vector<16x32xf32>
    %172 = arith.addf %170, %171 : vector<16x32xf32>
    %c1 = arith.constant 1 : index
    %c0_60 = arith.constant 0 : index
    %c0_61 = arith.constant 0 : index
    %c0_62 = arith.constant 0 : index
    %173 = vector.load %arg9[%c1, %c0_60, %c0_61, %c0_62] : memref<2x6x1x32xf32, #tpu.memory_space<vmem>>, vector<1x6x1x32xf32>
    %174 = vector.shape_cast %173 : vector<1x6x1x32xf32> to vector<6x1x32xf32>
    %c1_63 = arith.constant 1 : index
    %c0_64 = arith.constant 0 : index
    %c0_65 = arith.constant 0 : index
    %175 = vector.load %arg3[%c1_63, %c0_64, %c0_65] : memref<2x32x96xf32, #tpu.memory_space<vmem>>, vector<1x32x96xf32>
    %176 = vector.shape_cast %175 : vector<1x32x96xf32> to vector<32x96xf32>
    %cst_66 = arith.constant dense<0.000000e+00> : vector<16x96xf32>
    %177 = tpu.matmul %172, %176, %cst_66 {dimension_numbers = #tpu.dot_dimension_numbers<[1], [0], [0], [1], [0, 0, 1, 1], [], []>} : vector<16x32xf32>, vector<32x96xf32>, vector<16x96xf32> -> vector<16x96xf32>
    %c1_67 = arith.constant 1 : index
    %c0_68 = arith.constant 0 : index
    %c0_69 = arith.constant 0 : index
    %178 = vector.load %arg4[%c1_67, %c0_68, %c0_69] : memref<2x1x96xf32, #tpu.memory_space<vmem>>, vector<1x1x96xf32>
    %179 = vector.shape_cast %178 : vector<1x1x96xf32> to vector<1x96xf32>
    %180 = vector.broadcast %179 : vector<1x96xf32> to vector<16x96xf32>
    %181 = arith.addf %177, %180 : vector<16x96xf32>
    %182 = vector.extract_strided_slice %181 {offsets = [0, 0], sizes = [16, 8], strides = [1, 1]} : vector<16x96xf32> to vector<16x8xf32>
    %183 = vector.shape_cast %182 : vector<16x8xf32> to vector<2x8x8xf32>
    %184 = vector.extract_strided_slice %181 {offsets = [0, 32], sizes = [16, 8], strides = [1, 1]} : vector<16x96xf32> to vector<16x8xf32>
    %185 = vector.shape_cast %184 : vector<16x8xf32> to vector<2x8x8xf32>
    %186 = vector.extract_strided_slice %181 {offsets = [0, 64], sizes = [16, 8], strides = [1, 1]} : vector<16x96xf32> to vector<16x8xf32>
    %187 = vector.shape_cast %186 : vector<16x8xf32> to vector<2x8x8xf32>
    "tpu.trace_start"() <{level = 10 : i32, message = "bsk,btk->bst"}> : () -> ()
    %cst_70 = arith.constant dense<0.000000e+00> : vector<2x8x8xf32>
    %188 = tpu.matmul %183, %185, %cst_70 {dimension_numbers = #tpu.dot_dimension_numbers<[2], [2], [1], [1], [0, 0, 0, 1, 1, 1], [0], [0]>} : vector<2x8x8xf32>, vector<2x8x8xf32>, vector<2x8x8xf32> -> vector<2x8x8xf32>
    "tpu.trace_stop"() : () -> ()
    %cst_71 = arith.constant 0.353553385 : f32
    %189 = vector.broadcast %cst_71 : f32 to vector<2x8x8xf32>
    %190 = arith.mulf %188, %189 : vector<2x8x8xf32>
    %cst_72 = arith.constant dense<0xFF800000> : vector<2x8xf32>
    %191 = vector.multi_reduction <maximumf>, %190, %cst_72 [2] : vector<2x8x8xf32> to vector<2x8xf32>
    %192 = vector.shape_cast %191 : vector<2x8xf32> to vector<2x8x1xf32>
    %193 = vector.broadcast %192 : vector<2x8x1xf32> to vector<2x8x8xf32>
    %194 = arith.subf %190, %193 : vector<2x8x8xf32>
    %195 = math.exp %194 : vector<2x8x8xf32>
    %cst_73 = arith.constant dense<0.000000e+00> : vector<2x8xf32>
    %196 = vector.multi_reduction <add>, %195, %cst_73 [2] : vector<2x8x8xf32> to vector<2x8xf32>
    %197 = vector.shape_cast %196 : vector<2x8xf32> to vector<2x8x1xf32>
    %198 = vector.broadcast %197 : vector<2x8x1xf32> to vector<2x8x8xf32>
    %199 = arith.divf %195, %198 : vector<2x8x8xf32>
    "tpu.trace_start"() <{level = 10 : i32, message = "bst,btk->bsk"}> : () -> ()
    %cst_74 = arith.constant dense<0.000000e+00> : vector<2x8x8xf32>
    %200 = tpu.matmul %199, %187, %cst_74 {dimension_numbers = #tpu.dot_dimension_numbers<[2], [1], [1], [2], [0, 0, 0, 1, 1, 2], [0], [0]>} : vector<2x8x8xf32>, vector<2x8x8xf32>, vector<2x8x8xf32> -> vector<2x8x8xf32>
    "tpu.trace_stop"() : () -> ()
    %201 = vector.shape_cast %200 : vector<2x8x8xf32> to vector<16x8xf32>
    %202 = vector.extract_strided_slice %181 {offsets = [0, 8], sizes = [16, 8], strides = [1, 1]} : vector<16x96xf32> to vector<16x8xf32>
    %203 = vector.shape_cast %202 : vector<16x8xf32> to vector<2x8x8xf32>
    %204 = vector.extract_strided_slice %181 {offsets = [0, 40], sizes = [16, 8], strides = [1, 1]} : vector<16x96xf32> to vector<16x8xf32>
    %205 = vector.shape_cast %204 : vector<16x8xf32> to vector<2x8x8xf32>
    %206 = vector.extract_strided_slice %181 {offsets = [0, 72], sizes = [16, 8], strides = [1, 1]} : vector<16x96xf32> to vector<16x8xf32>
    %207 = vector.shape_cast %206 : vector<16x8xf32> to vector<2x8x8xf32>
    "tpu.trace_start"() <{level = 10 : i32, message = "bsk,btk->bst"}> : () -> ()
    %cst_75 = arith.constant dense<0.000000e+00> : vector<2x8x8xf32>
    %208 = tpu.matmul %203, %205, %cst_75 {dimension_numbers = #tpu.dot_dimension_numbers<[2], [2], [1], [1], [0, 0, 0, 1, 1, 1], [0], [0]>} : vector<2x8x8xf32>, vector<2x8x8xf32>, vector<2x8x8xf32> -> vector<2x8x8xf32>
    "tpu.trace_stop"() : () -> ()
    %cst_76 = arith.constant 0.353553385 : f32
    %209 = vector.broadcast %cst_76 : f32 to vector<2x8x8xf32>
    %210 = arith.mulf %208, %209 : vector<2x8x8xf32>
    %cst_77 = arith.constant dense<0xFF800000> : vector<2x8xf32>
    %211 = vector.multi_reduction <maximumf>, %210, %cst_77 [2] : vector<2x8x8xf32> to vector<2x8xf32>
    %212 = vector.shape_cast %211 : vector<2x8xf32> to vector<2x8x1xf32>
    %213 = vector.broadcast %212 : vector<2x8x1xf32> to vector<2x8x8xf32>
    %214 = arith.subf %210, %213 : vector<2x8x8xf32>
    %215 = math.exp %214 : vector<2x8x8xf32>
    %cst_78 = arith.constant dense<0.000000e+00> : vector<2x8xf32>
    %216 = vector.multi_reduction <add>, %215, %cst_78 [2] : vector<2x8x8xf32> to vector<2x8xf32>
    %217 = vector.shape_cast %216 : vector<2x8xf32> to vector<2x8x1xf32>
    %218 = vector.broadcast %217 : vector<2x8x1xf32> to vector<2x8x8xf32>
    %219 = arith.divf %215, %218 : vector<2x8x8xf32>
    "tpu.trace_start"() <{level = 10 : i32, message = "bst,btk->bsk"}> : () -> ()
    %cst_79 = arith.constant dense<0.000000e+00> : vector<2x8x8xf32>
    %220 = tpu.matmul %219, %207, %cst_79 {dimension_numbers = #tpu.dot_dimension_numbers<[2], [1], [1], [2], [0, 0, 0, 1, 1, 2], [0], [0]>} : vector<2x8x8xf32>, vector<2x8x8xf32>, vector<2x8x8xf32> -> vector<2x8x8xf32>
    "tpu.trace_stop"() : () -> ()
    %221 = vector.shape_cast %220 : vector<2x8x8xf32> to vector<16x8xf32>
    %222 = vector.extract_strided_slice %181 {offsets = [0, 16], sizes = [16, 8], strides = [1, 1]} : vector<16x96xf32> to vector<16x8xf32>
    %223 = vector.shape_cast %222 : vector<16x8xf32> to vector<2x8x8xf32>
    %224 = vector.extract_strided_slice %181 {offsets = [0, 48], sizes = [16, 8], strides = [1, 1]} : vector<16x96xf32> to vector<16x8xf32>
    %225 = vector.shape_cast %224 : vector<16x8xf32> to vector<2x8x8xf32>
    %226 = vector.extract_strided_slice %181 {offsets = [0, 80], sizes = [16, 8], strides = [1, 1]} : vector<16x96xf32> to vector<16x8xf32>
    %227 = vector.shape_cast %226 : vector<16x8xf32> to vector<2x8x8xf32>
    "tpu.trace_start"() <{level = 10 : i32, message = "bsk,btk->bst"}> : () -> ()
    %cst_80 = arith.constant dense<0.000000e+00> : vector<2x8x8xf32>
    %228 = tpu.matmul %223, %225, %cst_80 {dimension_numbers = #tpu.dot_dimension_numbers<[2], [2], [1], [1], [0, 0, 0, 1, 1, 1], [0], [0]>} : vector<2x8x8xf32>, vector<2x8x8xf32>, vector<2x8x8xf32> -> vector<2x8x8xf32>
    "tpu.trace_stop"() : () -> ()
    %cst_81 = arith.constant 0.353553385 : f32
    %229 = vector.broadcast %cst_81 : f32 to vector<2x8x8xf32>
    %230 = arith.mulf %228, %229 : vector<2x8x8xf32>
    %cst_82 = arith.constant dense<0xFF800000> : vector<2x8xf32>
    %231 = vector.multi_reduction <maximumf>, %230, %cst_82 [2] : vector<2x8x8xf32> to vector<2x8xf32>
    %232 = vector.shape_cast %231 : vector<2x8xf32> to vector<2x8x1xf32>
    %233 = vector.broadcast %232 : vector<2x8x1xf32> to vector<2x8x8xf32>
    %234 = arith.subf %230, %233 : vector<2x8x8xf32>
    %235 = math.exp %234 : vector<2x8x8xf32>
    %cst_83 = arith.constant dense<0.000000e+00> : vector<2x8xf32>
    %236 = vector.multi_reduction <add>, %235, %cst_83 [2] : vector<2x8x8xf32> to vector<2x8xf32>
    %237 = vector.shape_cast %236 : vector<2x8xf32> to vector<2x8x1xf32>
    %238 = vector.broadcast %237 : vector<2x8x1xf32> to vector<2x8x8xf32>
    %239 = arith.divf %235, %238 : vector<2x8x8xf32>
    "tpu.trace_start"() <{level = 10 : i32, message = "bst,btk->bsk"}> : () -> ()
    %cst_84 = arith.constant dense<0.000000e+00> : vector<2x8x8xf32>
    %240 = tpu.matmul %239, %227, %cst_84 {dimension_numbers = #tpu.dot_dimension_numbers<[2], [1], [1], [2], [0, 0, 0, 1, 1, 2], [0], [0]>} : vector<2x8x8xf32>, vector<2x8x8xf32>, vector<2x8x8xf32> -> vector<2x8x8xf32>
    "tpu.trace_stop"() : () -> ()
    %241 = vector.shape_cast %240 : vector<2x8x8xf32> to vector<16x8xf32>
    %242 = vector.extract_strided_slice %181 {offsets = [0, 24], sizes = [16, 8], strides = [1, 1]} : vector<16x96xf32> to vector<16x8xf32>
    %243 = vector.shape_cast %242 : vector<16x8xf32> to vector<2x8x8xf32>
    %244 = vector.extract_strided_slice %181 {offsets = [0, 56], sizes = [16, 8], strides = [1, 1]} : vector<16x96xf32> to vector<16x8xf32>
    %245 = vector.shape_cast %244 : vector<16x8xf32> to vector<2x8x8xf32>
    %246 = vector.extract_strided_slice %181 {offsets = [0, 88], sizes = [16, 8], strides = [1, 1]} : vector<16x96xf32> to vector<16x8xf32>
    %247 = vector.shape_cast %246 : vector<16x8xf32> to vector<2x8x8xf32>
    "tpu.trace_start"() <{level = 10 : i32, message = "bsk,btk->bst"}> : () -> ()
    %cst_85 = arith.constant dense<0.000000e+00> : vector<2x8x8xf32>
    %248 = tpu.matmul %243, %245, %cst_85 {dimension_numbers = #tpu.dot_dimension_numbers<[2], [2], [1], [1], [0, 0, 0, 1, 1, 1], [0], [0]>} : vector<2x8x8xf32>, vector<2x8x8xf32>, vector<2x8x8xf32> -> vector<2x8x8xf32>
    "tpu.trace_stop"() : () -> ()
    %cst_86 = arith.constant 0.353553385 : f32
    %249 = vector.broadcast %cst_86 : f32 to vector<2x8x8xf32>
    %250 = arith.mulf %248, %249 : vector<2x8x8xf32>
    %cst_87 = arith.constant dense<0xFF800000> : vector<2x8xf32>
    %251 = vector.multi_reduction <maximumf>, %250, %cst_87 [2] : vector<2x8x8xf32> to vector<2x8xf32>
    %252 = vector.shape_cast %251 : vector<2x8xf32> to vector<2x8x1xf32>
    %253 = vector.broadcast %252 : vector<2x8x1xf32> to vector<2x8x8xf32>
    %254 = arith.subf %250, %253 : vector<2x8x8xf32>
    %255 = math.exp %254 : vector<2x8x8xf32>
    %cst_88 = arith.constant dense<0.000000e+00> : vector<2x8xf32>
    %256 = vector.multi_reduction <add>, %255, %cst_88 [2] : vector<2x8x8xf32> to vector<2x8xf32>
    %257 = vector.shape_cast %256 : vector<2x8xf32> to vector<2x8x1xf32>
    %258 = vector.broadcast %257 : vector<2x8x1xf32> to vector<2x8x8xf32>
    %259 = arith.divf %255, %258 : vector<2x8x8xf32>
    "tpu.trace_start"() <{level = 10 : i32, message = "bst,btk->bsk"}> : () -> ()
    %cst_89 = arith.constant dense<0.000000e+00> : vector<2x8x8xf32>
    %260 = tpu.matmul %259, %247, %cst_89 {dimension_numbers = #tpu.dot_dimension_numbers<[2], [1], [1], [2], [0, 0, 0, 1, 1, 2], [0], [0]>} : vector<2x8x8xf32>, vector<2x8x8xf32>, vector<2x8x8xf32> -> vector<2x8x8xf32>
    "tpu.trace_stop"() : () -> ()
    %261 = vector.shape_cast %260 : vector<2x8x8xf32> to vector<16x8xf32>
    %262 = tpu.concatenate %201, %221, %241, %261 in 1 : vector<16x8xf32>, vector<16x8xf32>, vector<16x8xf32>, vector<16x8xf32> -> vector<16x32xf32>
    %c1_90 = arith.constant 1 : index
    %c0_91 = arith.constant 0 : index
    %c0_92 = arith.constant 0 : index
    %263 = vector.load %arg5[%c1_90, %c0_91, %c0_92] : memref<2x32x32xf32, #tpu.memory_space<vmem>>, vector<1x32x32xf32>
    %264 = vector.shape_cast %263 : vector<1x32x32xf32> to vector<32x32xf32>
    %cst_93 = arith.constant dense<0.000000e+00> : vector<16x32xf32>
    %265 = tpu.matmul %262, %264, %cst_93 {dimension_numbers = #tpu.dot_dimension_numbers<[1], [0], [0], [1], [0, 0, 1, 1], [], []>} : vector<16x32xf32>, vector<32x32xf32>, vector<16x32xf32> -> vector<16x32xf32>
    %266 = vector.extract_strided_slice %174 {offsets = [0, 0, 0], sizes = [1, 1, 32], strides = [1, 1, 1]} : vector<6x1x32xf32> to vector<1x1x32xf32>
    %267 = vector.shape_cast %266 : vector<1x1x32xf32> to vector<1x32xf32>
    %268 = vector.broadcast %267 : vector<1x32xf32> to vector<16x32xf32>
    %269 = arith.addf %265, %268 : vector<16x32xf32>
    %270 = arith.addf %172, %269 : vector<16x32xf32>
    %271 = vector.extract_strided_slice %174 {offsets = [1, 0, 0], sizes = [1, 1, 32], strides = [1, 1, 1]} : vector<6x1x32xf32> to vector<1x1x32xf32>
    %272 = vector.shape_cast %271 : vector<1x1x32xf32> to vector<1x32xf32>
    %273 = vector.extract_strided_slice %174 {offsets = [2, 0, 0], sizes = [1, 1, 32], strides = [1, 1, 1]} : vector<6x1x32xf32> to vector<1x1x32xf32>
    %274 = vector.shape_cast %273 : vector<1x1x32xf32> to vector<1x32xf32>
    %cst_94 = arith.constant dense<0.000000e+00> : vector<16xf32>
    %275 = vector.multi_reduction <add>, %270, %cst_94 [1] : vector<16x32xf32> to vector<16xf32>
    %276 = vector.shape_cast %275 : vector<16xf32> to vector<16x1xf32>
    %cst_95 = arith.constant 3.200000e+01 : f32
    %277 = vector.broadcast %cst_95 : f32 to vector<16x1xf32>
    %278 = arith.divf %276, %277 : vector<16x1xf32>
    %279 = vector.broadcast %278 : vector<16x1xf32> to vector<16x32xf32>
    %280 = arith.subf %270, %279 : vector<16x32xf32>
    %281 = arith.mulf %280, %280 : vector<16x32xf32>
    %cst_96 = arith.constant dense<0.000000e+00> : vector<16xf32>
    %282 = vector.multi_reduction <add>, %281, %cst_96 [1] : vector<16x32xf32> to vector<16xf32>
    %283 = vector.shape_cast %282 : vector<16xf32> to vector<16x1xf32>
    %cst_97 = arith.constant 3.200000e+01 : f32
    %284 = vector.broadcast %cst_97 : f32 to vector<16x1xf32>
    %285 = arith.divf %283, %284 : vector<16x1xf32>
    %286 = vector.broadcast %278 : vector<16x1xf32> to vector<16x32xf32>
    %287 = arith.subf %270, %286 : vector<16x32xf32>
    %cst_98 = arith.constant 9.99999974E-6 : f32
    %288 = vector.broadcast %cst_98 : f32 to vector<16x1xf32>
    %289 = arith.addf %285, %288 : vector<16x1xf32>
    %290 = math.rsqrt %289 : vector<16x1xf32>
    %291 = vector.broadcast %290 : vector<16x1xf32> to vector<16x32xf32>
    %292 = arith.mulf %287, %291 : vector<16x32xf32>
    %293 = vector.broadcast %272 : vector<1x32xf32> to vector<16x32xf32>
    %294 = arith.mulf %292, %293 : vector<16x32xf32>
    %295 = vector.broadcast %274 : vector<1x32xf32> to vector<16x32xf32>
    %296 = arith.addf %294, %295 : vector<16x32xf32>
    %c1_99 = arith.constant 1 : index
    %c0_100 = arith.constant 0 : index
    %c0_101 = arith.constant 0 : index
    %297 = vector.load %arg6[%c1_99, %c0_100, %c0_101] : memref<2x32x64xf32, #tpu.memory_space<vmem>>, vector<1x32x64xf32>
    %298 = vector.shape_cast %297 : vector<1x32x64xf32> to vector<32x64xf32>
    %cst_102 = arith.constant dense<0.000000e+00> : vector<16x64xf32>
    %299 = tpu.matmul %296, %298, %cst_102 {dimension_numbers = #tpu.dot_dimension_numbers<[1], [0], [0], [1], [0, 0, 1, 1], [], []>} : vector<16x32xf32>, vector<32x64xf32>, vector<16x64xf32> -> vector<16x64xf32>
    %c1_103 = arith.constant 1 : index
    %c0_104 = arith.constant 0 : index
    %c0_105 = arith.constant 0 : index
    %300 = vector.load %arg7[%c1_103, %c0_104, %c0_105] : memref<2x1x64xf32, #tpu.memory_space<vmem>>, vector<1x1x64xf32>
    %301 = vector.shape_cast %300 : vector<1x1x64xf32> to vector<1x64xf32>
    %302 = vector.broadcast %301 : vector<1x64xf32> to vector<16x64xf32>
    %303 = arith.addf %299, %302 : vector<16x64xf32>
    %cst_106 = arith.constant 0.000000e+00 : f32
    %304 = vector.broadcast %cst_106 : f32 to vector<16x64xf32>
    %305 = arith.maximumf %303, %304 : vector<16x64xf32>
    %c1_107 = arith.constant 1 : index
    %c0_108 = arith.constant 0 : index
    %c0_109 = arith.constant 0 : index
    %306 = vector.load %arg8[%c1_107, %c0_108, %c0_109] : memref<2x64x32xf32, #tpu.memory_space<vmem>>, vector<1x64x32xf32>
    %307 = vector.shape_cast %306 : vector<1x64x32xf32> to vector<64x32xf32>
    %cst_110 = arith.constant dense<0.000000e+00> : vector<16x32xf32>
    %308 = tpu.matmul %305, %307, %cst_110 {dimension_numbers = #tpu.dot_dimension_numbers<[1], [0], [0], [1], [0, 0, 1, 1], [], []>} : vector<16x64xf32>, vector<64x32xf32>, vector<16x32xf32> -> vector<16x32xf32>
    %309 = vector.extract_strided_slice %174 {offsets = [3, 0, 0], sizes = [1, 1, 32], strides = [1, 1, 1]} : vector<6x1x32xf32> to vector<1x1x32xf32>
    %310 = vector.shape_cast %309 : vector<1x1x32xf32> to vector<1x32xf32>
    %311 = vector.broadcast %310 : vector<1x32xf32> to vector<16x32xf32>
    %312 = arith.addf %308, %311 : vector<16x32xf32>
    %313 = arith.addf %296, %312 : vector<16x32xf32>
    %314 = vector.extract_strided_slice %174 {offsets = [4, 0, 0], sizes = [1, 1, 32], strides = [1, 1, 1]} : vector<6x1x32xf32> to vector<1x1x32xf32>
    %315 = vector.shape_cast %314 : vector<1x1x32xf32> to vector<1x32xf32>
    %316 = vector.extract_strided_slice %174 {offsets = [5, 0, 0], sizes = [1, 1, 32], strides = [1, 1, 1]} : vector<6x1x32xf32> to vector<1x1x32xf32>
    %317 = vector.shape_cast %316 : vector<1x1x32xf32> to vector<1x32xf32>
    %cst_111 = arith.constant dense<0.000000e+00> : vector<16xf32>
    %318 = vector.multi_reduction <add>, %313, %cst_111 [1] : vector<16x32xf32> to vector<16xf32>
    %319 = vector.shape_cast %318 : vector<16xf32> to vector<16x1xf32>
    %cst_112 = arith.constant 3.200000e+01 : f32
    %320 = vector.broadcast %cst_112 : f32 to vector<16x1xf32>
    %321 = arith.divf %319, %320 : vector<16x1xf32>
    %322 = vector.broadcast %321 : vector<16x1xf32> to vector<16x32xf32>
    %323 = arith.subf %313, %322 : vector<16x32xf32>
    %324 = arith.mulf %323, %323 : vector<16x32xf32>
    %cst_113 = arith.constant dense<0.000000e+00> : vector<16xf32>
    %325 = vector.multi_reduction <add>, %324, %cst_113 [1] : vector<16x32xf32> to vector<16xf32>
    %326 = vector.shape_cast %325 : vector<16xf32> to vector<16x1xf32>
    %cst_114 = arith.constant 3.200000e+01 : f32
    %327 = vector.broadcast %cst_114 : f32 to vector<16x1xf32>
    %328 = arith.divf %326, %327 : vector<16x1xf32>
    %329 = vector.broadcast %321 : vector<16x1xf32> to vector<16x32xf32>
    %330 = arith.subf %313, %329 : vector<16x32xf32>
    %cst_115 = arith.constant 9.99999974E-6 : f32
    %331 = vector.broadcast %cst_115 : f32 to vector<16x1xf32>
    %332 = arith.addf %328, %331 : vector<16x1xf32>
    %333 = math.rsqrt %332 : vector<16x1xf32>
    %334 = vector.broadcast %333 : vector<16x1xf32> to vector<16x32xf32>
    %335 = arith.mulf %330, %334 : vector<16x32xf32>
    %336 = vector.broadcast %315 : vector<1x32xf32> to vector<16x32xf32>
    %337 = arith.mulf %335, %336 : vector<16x32xf32>
    %338 = vector.broadcast %317 : vector<1x32xf32> to vector<16x32xf32>
    %339 = arith.addf %337, %338 : vector<16x32xf32>
    %c0_116 = arith.constant 0 : index
    %c0_117 = arith.constant 0 : index
    %c0_118 = arith.constant 0 : index
    %340 = vector.load %arg11[%c0_116, %c0_117, %c0_118] : memref<2x1x128xf32, #tpu.memory_space<vmem>>, vector<2x1x128xf32>
    %341 = vector.shape_cast %339 : vector<16x32xf32> to vector<2x8x32xf32>
    %342 = vector.extract_strided_slice %341 {offsets = [0, 0, 0], sizes = [2, 1, 32], strides = [1, 1, 1]} : vector<2x8x32xf32> to vector<2x1x32xf32>
    %343 = vector.shape_cast %342 : vector<2x1x32xf32> to vector<2x32xf32>
    %344 = vector.extract_strided_slice %341 {offsets = [0, 1, 0], sizes = [2, 1, 32], strides = [1, 1, 1]} : vector<2x8x32xf32> to vector<2x1x32xf32>
    %345 = vector.shape_cast %344 : vector<2x1x32xf32> to vector<2x32xf32>
    %346 = vector.extract_strided_slice %341 {offsets = [0, 2, 0], sizes = [2, 1, 32], strides = [1, 1, 1]} : vector<2x8x32xf32> to vector<2x1x32xf32>
    %347 = vector.shape_cast %346 : vector<2x1x32xf32> to vector<2x32xf32>
    %348 = vector.extract_strided_slice %341 {offsets = [0, 3, 0], sizes = [2, 1, 32], strides = [1, 1, 1]} : vector<2x8x32xf32> to vector<2x1x32xf32>
    %349 = vector.shape_cast %348 : vector<2x1x32xf32> to vector<2x32xf32>
    %350 = vector.extract_strided_slice %341 {offsets = [0, 4, 0], sizes = [2, 1, 32], strides = [1, 1, 1]} : vector<2x8x32xf32> to vector<2x1x32xf32>
    %351 = vector.shape_cast %350 : vector<2x1x32xf32> to vector<2x32xf32>
    %352 = vector.extract_strided_slice %341 {offsets = [0, 5, 0], sizes = [2, 1, 32], strides = [1, 1, 1]} : vector<2x8x32xf32> to vector<2x1x32xf32>
    %353 = vector.shape_cast %352 : vector<2x1x32xf32> to vector<2x32xf32>
    %354 = vector.extract_strided_slice %341 {offsets = [0, 6, 0], sizes = [2, 1, 32], strides = [1, 1, 1]} : vector<2x8x32xf32> to vector<2x1x32xf32>
    %355 = vector.shape_cast %354 : vector<2x1x32xf32> to vector<2x32xf32>
    %356 = vector.extract_strided_slice %341 {offsets = [0, 7, 0], sizes = [2, 1, 32], strides = [1, 1, 1]} : vector<2x8x32xf32> to vector<2x1x32xf32>
    %357 = vector.shape_cast %356 : vector<2x1x32xf32> to vector<2x32xf32>
    %358 = tpu.concatenate %343, %345, %347, %349, %351, %353, %355, %357 in 1 : vector<2x32xf32>, vector<2x32xf32>, vector<2x32xf32>, vector<2x32xf32>, vector<2x32xf32>, vector<2x32xf32>, vector<2x32xf32>, vector<2x32xf32> -> vector<2x256xf32>
    %c0_119 = arith.constant 0 : index
    %c0_120 = arith.constant 0 : index
    %359 = vector.load %arg10[%c0_119, %c0_120] : memref<384x128xf32, #tpu.memory_space<vmem>>, vector<256x128xf32>
    %cst_121 = arith.constant dense<0.000000e+00> : vector<2x128xf32>
    %360 = tpu.matmul %358, %359, %cst_121 {dimension_numbers = #tpu.dot_dimension_numbers<[1], [0], [0], [1], [0, 0, 1, 1], [], []>} : vector<2x256xf32>, vector<256x128xf32>, vector<2x128xf32> -> vector<2x128xf32>
    %361 = vector.extract_strided_slice %340 {offsets = [0, 0, 0], sizes = [1, 1, 128], strides = [1, 1, 1]} : vector<2x1x128xf32> to vector<1x1x128xf32>
    %362 = vector.shape_cast %361 : vector<1x1x128xf32> to vector<1x128xf32>
    %363 = vector.broadcast %362 : vector<1x128xf32> to vector<2x128xf32>
    %364 = arith.addf %360, %363 : vector<2x128xf32>
    %c256 = arith.constant 256 : index
    %c0_122 = arith.constant 0 : index
    %365 = vector.load %arg10[%c256, %c0_122] : memref<384x128xf32, #tpu.memory_space<vmem>>, vector<128x128xf32>
    %cst_123 = arith.constant dense<0.000000e+00> : vector<2x128xf32>
    %366 = tpu.matmul %364, %365, %cst_123 {dimension_numbers = #tpu.dot_dimension_numbers<[1], [0], [0], [1], [0, 0, 1, 1], [], []>} : vector<2x128xf32>, vector<128x128xf32>, vector<2x128xf32> -> vector<2x128xf32>
    %367 = vector.extract_strided_slice %340 {offsets = [1, 0, 0], sizes = [1, 1, 128], strides = [1, 1, 1]} : vector<2x1x128xf32> to vector<1x1x128xf32>
    %368 = vector.shape_cast %367 : vector<1x1x128xf32> to vector<1x128xf32>
    %369 = vector.broadcast %368 : vector<1x128xf32> to vector<2x128xf32>
    %370 = arith.addf %366, %369 : vector<2x128xf32>
    %c0_124 = arith.constant 0 : index
    %c0_125 = arith.constant 0 : index
    %c0_126 = arith.constant 0 : index
    %371 = vector.load %arg12[%c0_124, %c0_125, %c0_126] : memref<1x2x128xf32, #tpu.memory_space<vmem>>, vector<1x2x128xf32>
    %372 = vector.shape_cast %371 : vector<1x2x128xf32> to vector<2x128xf32>
    %373 = vector.shape_cast %364 : vector<2x128xf32> to vector<1x2x128xf32>
    tpu.vector_store %arg12[%c0_124, %c0_125, %c0_126], %373 {strides = array<i32>} : memref<1x2x128xf32, #tpu.memory_space<vmem>>, vector<1x2x128xf32>,
    %c0_127 = arith.constant 0 : index
    %c0_128 = arith.constant 0 : index
    %c0_129 = arith.constant 0 : index
    %374 = vector.load %arg13[%c0_127, %c0_128, %c0_129] : memref<1x2x128xf32, #tpu.memory_space<vmem>>, vector<1x2x128xf32>
    %375 = vector.shape_cast %374 : vector<1x2x128xf32> to vector<2x128xf32>
    %376 = vector.shape_cast %370 : vector<2x128xf32> to vector<1x2x128xf32>
    tpu.vector_store %arg13[%c0_127, %c0_128, %c0_129], %376 {strides = array<i32>} : memref<1x2x128xf32, #tpu.memory_space<vmem>>, vector<1x2x128xf32>,
    return
  }
  func.func @transform_0(%arg0: i32) -> (i32, i32, i32) {
    %c0_i32 = arith.constant 0 : i32
    %c0_i32_0 = arith.constant 0 : i32
    %c0_i32_1 = arith.constant 0 : i32
    return %arg0, %c0_i32, %c0_i32_0 : i32, i32, i32
  }
  func.func @transform_1(%arg0: i32) -> (i32, i32) {
    %c0_i32 = arith.constant 0 : i32
    %c0_i32_0 = arith.constant 0 : i32
    %c0_i32_1 = arith.constant 0 : i32
    return %c0_i32, %c0_i32_0 : i32, i32
  }
  func.func @transform_2(%arg0: i32) -> (i32, i32, i32) {
    %c0_i32 = arith.constant 0 : i32
    %c0_i32_0 = arith.constant 0 : i32
    %c0_i32_1 = arith.constant 0 : i32
    %c0_i32_2 = arith.constant 0 : i32
    return %c0_i32, %c0_i32_0, %c0_i32_1 : i32, i32, i32
  }
  func.func @transform_3(%arg0: i32) -> (i32, i32, i32) {
    %c0_i32 = arith.constant 0 : i32
    %c0_i32_0 = arith.constant 0 : i32
    %c0_i32_1 = arith.constant 0 : i32
    %c0_i32_2 = arith.constant 0 : i32
    return %c0_i32, %c0_i32_0, %c0_i32_1 : i32, i32, i32
  }
  func.func @transform_4(%arg0: i32) -> (i32, i32, i32) {
    %c0_i32 = arith.constant 0 : i32
    %c0_i32_0 = arith.constant 0 : i32
    %c0_i32_1 = arith.constant 0 : i32
    %c0_i32_2 = arith.constant 0 : i32
    return %c0_i32, %c0_i32_0, %c0_i32_1 : i32, i32, i32
  }
  func.func @transform_5(%arg0: i32) -> (i32, i32, i32) {
    %c0_i32 = arith.constant 0 : i32
    %c0_i32_0 = arith.constant 0 : i32
    %c0_i32_1 = arith.constant 0 : i32
    %c0_i32_2 = arith.constant 0 : i32
    return %c0_i32, %c0_i32_0, %c0_i32_1 : i32, i32, i32
  }
  func.func @transform_6(%arg0: i32) -> (i32, i32, i32) {
    %c0_i32 = arith.constant 0 : i32
    %c0_i32_0 = arith.constant 0 : i32
    %c0_i32_1 = arith.constant 0 : i32
    %c0_i32_2 = arith.constant 0 : i32
    return %c0_i32, %c0_i32_0, %c0_i32_1 : i32, i32, i32
  }
  func.func @transform_7(%arg0: i32) -> (i32, i32, i32) {
    %c0_i32 = arith.constant 0 : i32
    %c0_i32_0 = arith.constant 0 : i32
    %c0_i32_1 = arith.constant 0 : i32
    %c0_i32_2 = arith.constant 0 : i32
    return %c0_i32, %c0_i32_0, %c0_i32_1 : i32, i32, i32
  }
  func.func @transform_8(%arg0: i32) -> (i32, i32, i32, i32) {
    %c0_i32 = arith.constant 0 : i32
    %c0_i32_0 = arith.constant 0 : i32
    %c0_i32_1 = arith.constant 0 : i32
    %c0_i32_2 = arith.constant 0 : i32
    %c0_i32_3 = arith.constant 0 : i32
    return %c0_i32, %c0_i32_0, %c0_i32_1, %c0_i32_2 : i32, i32, i32, i32
  }
  func.func @transform_9(%arg0: i32) -> (i32, i32) {
    %c0_i32 = arith.constant 0 : i32
    %c0_i32_0 = arith.constant 0 : i32
    %c0_i32_1 = arith.constant 0 : i32
    return %c0_i32, %c0_i32_0 : i32, i32
  }
  func.func @transform_10(%arg0: i32) -> (i32, i32, i32) {
    %c0_i32 = arith.constant 0 : i32
    %c0_i32_0 = arith.constant 0 : i32
    %c0_i32_1 = arith.constant 0 : i32
    %c0_i32_2 = arith.constant 0 : i32
    return %c0_i32, %c0_i32_0, %c0_i32_1 : i32, i32, i32
  }
  func.func @transform_11(%arg0: i32) -> (i32, i32, i32) {
    %c0_i32 = arith.constant 0 : i32
    %c0_i32_0 = arith.constant 0 : i32
    %c0_i32_1 = arith.constant 0 : i32
    return %arg0, %c0_i32, %c0_i32_0 : i32, i32, i32
  }
  func.func @transform_12(%arg0: i32) -> (i32, i32, i32) {
    %c0_i32 = arith.constant 0 : i32
    %c0_i32_0 = arith.constant 0 : i32
    %c0_i32_1 = arith.constant 0 : i32
    return %arg0, %c0_i32, %c0_i32_0 : i32, i32, i32
  }
}

</mosaic_0001>

<bundles_post_ra>
// kernel: tpu_custom_call.1
= control target key start
LH: loop header
LB: loop body
LE: loop exit
PB: predicated region body
PF: predicated region fallthrough
CT: control target
= control target key end

     0   :  { %s6586_s0 = inlined_call_operand.hbm [shape: f32[4,8,32], index: 0, kind: input, shape index: {}]   ;;  %s6587_s1 = inlined_call_operand.hbm [shape: f32[8,32], index: 1, kind: input, shape index: {}]   ;;  %s6588_s2 = inlined_call_operand.vmem [shape: f32[2,32,96], index: 2, kind: input, shape index: {}]   ;;  %s6589_s3 = inlined_call_operand.vmem [shape: f32[2,1,96], index: 3, kind: input, shape index: {}]   ;;  %s6590_s4 = inlined_call_operand.vmem [shape: f32[2,32,32], index: 4, kind: input, shape index: {}]   ;;  %s6591_s5 = inlined_call_operand.vmem [shape: f32[2,32,64], index: 5, kind: input, shape index: {}]   ;;  %s6592_s6 = inlined_call_operand.vmem [shape: f32[2,1,64], index: 6, kind: input, shape index: {}]   ;;  %s6593_s7 = inlined_call_operand.vmem [shape: f32[2,64,32], index: 7, kind: input, shape index: {}]   ;;  %s6594_s8 = inlined_call_operand.vmem [shape: f32[2,6,1,32], index: 8, kind: input, shape index: {}]   ;;  %s6595_s9 = inlined_call_operand.hbm [shape: f32[384,128], index: 9, kind: input, shape index: {}]   ;;  %s6596_s10 = inlined_call_operand.vmem [shape: f32[2,1,128], index: 10, kind: input, shape index: {}]   ;;  %s6597_s11 = inlined_call_operand.hbm [shape: f32[2,2,128], index: 11, kind: output, shape index: {0}]   ;;  %s6598_s12 = inlined_call_operand.hbm [shape: f32[2,2,128], index: 12, kind: output, shape index: {1}]  }
   0x1   :  { %6626 = sst [smem:[#allocation20_spill]] %s6587_s1 }
   0x2   :  { %6627 = sst [smem:[#allocation21_spill]] %s6596_s10 }
   0x3   :  { %6628 = sst [smem:[#allocation22_spill]] %s6597_s11 }
   0x4   :  { %6629 = sst [smem:[#allocation23_spill]] %s6598_s12 }
   0x5   :  { %18 = vsyncpa [#allocation3], 0 }
   0x6   :  { %20 = vsyncpa [#allocation3 + $0x1], 0 }
   0x7   :  { %21 = vsyncpa [#allocation6], 0 }
   0x8   :  { %22 = vsyncpa [#allocation4], 0 }
   0x9   :  { %24 = vsyncpa [#allocation4 + $0x1], 0 }
   0xa   :  { %25 = vsyncpa [#allocation10], 0 }
   0xb   :  { %27 = vsyncpa [#allocation10 + $0x1], 0  ;;  %s5747_s21 = smov 0   ;;  %s5749_s22 = smov 0  }
   0xc   :  { %s5751_s23 = smov 0   ;;  %s5753_s24 = smov 0  }
   0xd LB: > { %6630 = sst [smem:[#allocation15_spill]] %s5643_s21  ;;  %s5768_s25 = sadd.s32 4294967295, %s5655_s24   ;;  %s5655_s24 = sphi %s5753_s24, %s6664_s24   ;;  %s5651_s23 = sphi %s5751_s23, %s6666_s23   ;;  %s5647_s22 = sphi %s5749_s22, %s6668_s22   ;;  %s5643_s21 = sphi %s5747_s21, %s6667_s21  }
   0xe   : > { %6631 = sst [smem:[#allocation16_spill]] %s5651_s23  ;;  %s4542_s26 = sadd.s32 4294967294, %s5655_s24  }
   0xf   : > { %s5772_s27 = sadd.s32 1, %s5655_s24   ;;  %s40_s28 = sadd.s32 1, %s5651_s23 }
  0x10   : > { %6632 = sst [smem:[#allocation17_spill]] %s5772_s27  ;;  %s37_s29 = ssub.s32 %s5655_s24, %s5772_s27 }
  0x11   : > { %p47_p0 = scmp.ne.s32.totalorder %s5651_s23, %s5647_s22  ;;  %p38_p1 = scmp.eq.s32.totalorder %s37_s29, 0 }
  0x12   : > { %p48_p2 = scmp.eq.s32.totalorder %s5655_s24, 0  ;;  %p53_p3 = scmp.ne.s32.totalorder %s5647_s22, %s5643_s21 }
  0x13   : > { %p6599_p4 = scmp.eq.s32.totalorder %s5768_s25, 0  ;;  %p287_p7 = scmp.eq.s32.totalorder %s5768_s25, 1 }
  0x14   : > { %s5784_s30 = scalar_select %p38_p1, %s5651_s23, %s40_s28  }
  0x15   : > { %p5786_p5 = por %p48_p2, %p47_p0  ;;  %p5792_p6 = por %p6599_p4, %p53_p3 }
  0x16   : > { %6633 = sst [smem:[#allocation18_spill]] %s5784_s30  ;;  %p293_p8 = scmp.eq.s32.totalorder %s4542_s26, 1 }
  0x17   : > { %s6635_s14 = scalar_select %p5792_p6, 1, 0 }
  0x18   : > { %p4543_p9 = scmp.ge.s32.totalorder %s5655_s24, 1  ;;  %p326_p10 = scmp.lt.s32.totalorder %s5655_s24, 3 }
  0x19   : > { %p5799_p11 = por %p287_p7, %p47_p0  ;;  %p5803_p12 = por %p293_p8, %p53_p3 }
  0x1a   : > { %p5807_p13 = pnand %p4543_p9, %p326_p10  ;;  %s5657_s18 = smov [#allocation5]  }
  0x1b   : > { %s6636_s15 = scalar_select %p5799_p11, 1, 0 }
  0x1c   : > { %s6637_s16 = scalar_select %p5803_p12, 1, 0 }
  0x1d   : > { %s6639_s17 = scalar_select %p5807_p13, 1, 0 }
  0x1e   : > { %6638 = sst [smem:[#allocation19_spill]] %s6637_s16  ;;  %p5294_p2 = pneg %p5807_p13 }
  0x1f   : > { %s339_s19 = sshll.u32 %s5657_s18, 4  ;;  %p5314_p4 = scmp.lt.s32.totalorder %s5655_s24, 2  ;;  %s340_s19 = int_to_ptr.vmem [resolvable:$true] %s339_s19 }
  0x20   : > { %p6640_p0 = scmp.eq.s32.totalorder %s5768_s25, 0  ;;  %s5658_s28 = smov [#allocation7]  }
  0x21   : > { %p5823_p3 = pnand %p5314_p4, %p5786_p5  ;;  %s370_s29 = sshll.u32 %s5658_s28, 4  ;;  %s5827_s29 = int_to_ptr.vmem [resolvable:$true] %s370_s29 }
  0x22   : > { %p5817_p7 = pnand %p5294_p2, %p6640_p0  ;;  %s6643_s1 = sld [smem:[#allocation20_spill]] }
  0x23   : > { %s6642_s26 = scalar_select %p5823_p3, 1, 0 }
  0x24   : > { %p5469_p9 = pneg %p5817_p7 }
  0x28   : > { %s5467_s27 = scalar_lea.hbm %s6643_s1, 128 }
  0x29   : > { %p5468_p8 = scmp.ne.s32.totalorder %s6643_s1, %s5467_s27  ;;  %p5474_p10 = scmp.lt.u32.totalorder %s5467_s27, %s6643_s1 }
  0x2b   : > { %p5470_p4 = pnand %p5469_p9, %p5468_p8 }
  0x2d   : > { %p5471_p5 = pneg %p5470_p4 }
  0x2f   : > { %p5476_p2 = pnand %p5474_p10, %p5471_p5 }
  0x31   : > { %5479 = shalt.err (!%p5476_p2)
}
  0x32   : > { %s5480_s28 = scalar_lea.vmem %s340_s19, 128  ;;  %p5488_p11 = scmp.lt.s32.totalorder %s340_s19, %s340_s19 }
  0x33   : > { %p5481_p0 = scmp.ne.s32.totalorder %s340_s19, %s5480_s28  ;;  %p5489_p6 = scmp.lt.s32.totalorder %s5480_s28, %s5480_s28 }
  0x35   : > { %p5483_p1 = pnand %p5481_p0, %p5469_p9  ;;  %p5490_p13 = por %p5489_p6, %p5488_p11 }
  0x37   : > { %p5484_p12 = pneg %p5483_p1 }
  0x39   : > { %p5491_p3 = pnand %p5490_p13, %p5484_p12 }
  0x3b   : > { %5494 = shalt.err (!%p5491_p3)
}
  0x3c   : > { %5297 = dma.hbm_to_vmem [thread:$0]  (!%p5817_p7), %s6643_s1, 128, %s340_s19, [#allocation6]  }
  0x3d   : > { %s387_s12 = sand.u32 1, %s5651_s23   ;;  %s5495_s18 = scalar_lea.hbm %s6595_s9, 6144 }
  0x3e   : > { %p5496_p1 = scmp.ne.s32.totalorder %s6595_s9, %s5495_s18  ;;  %p5502_p12 = scmp.lt.u32.totalorder %s5495_s18, %s6595_s9 }
  0x40   : > { %p5498_p6 = pnand %p5496_p1, %p5469_p9 }
  0x42   : > { %p5499_p11 = pneg %p5498_p6 }
  0x44   : > { %p5504_p13 = pnand %p5502_p12, %p5499_p11 }
  0x46   : > { %5507 = shalt.err (!%p5504_p13)
}
  0x47   : > { %s5508_s19 = scalar_lea.vmem %s5827_s29, 6144  ;;  %p5516_p5 = scmp.lt.s32.totalorder %s5827_s29, %s5827_s29 }
  0x48   : > { %p5509_p3 = scmp.ne.s32.totalorder %s5827_s29, %s5508_s19  ;;  %p5517_p10 = scmp.lt.s32.totalorder %s5508_s19, %s5508_s19 }
  0x4a   : > { %p5511_p8 = pnand %p5509_p3, %p5469_p9  ;;  %p5518_p2 = por %p5517_p10, %p5516_p5 }
  0x4c   : > { %p5512_p4 = pneg %p5511_p8 }
  0x4e   : > { %p5519_p0 = pnand %p5518_p2, %p5512_p4 }
  0x50   : > { %5522 = shalt.err (!%p5519_p0)
}
  0x51   : > { %s5659_s10 = smov 128   ;;  %s5660_s11 = smov 8  }
  0x52   : > { %5300 = dma.hbm_to_vmem [thread:$0]  (!%p5817_p7), %s6595_s9, 6144, %s5827_s29, [#allocation6], %s5659_s10, %s5659_s10, %s5660_s11  }
  0x53   : > { %s4547_s27 = sshll.u32 %s387_s12, 4  ;;  %s4672_s16 = sshll.u32 %s5655_s24, 8 }
  0x54   : > { %s5884_s28 = scalar_lea.hbm %s6586_s0, %s4672_s16  ;;  %s391_s19 = scalar_lea.vmem [#allocation2], %s4547_s27 }
  0x55   : > { %s398_s20 = sshll.u32 %s391_s19, 4  ;;  %s5888_s1 = scalar_lea.sflag [#allocation3], %s387_s12  ;;  %s5886_s20 = int_to_ptr.vmem [resolvable:$true] %s398_s20 }
  0x56   : > { %s5523_s23 = scalar_lea.hbm %s5884_s28, 256  ;;  %p6644_p7 = scmp.ne.s32.totalorder %s6642_s26, 0 }
  0x57   : > { %p5524_p9 = scmp.ne.s32.totalorder %s5884_s28, %s5523_s23  ;;  %s5528_s30 = scalar_lea.hbm %s6586_s0, 512 }
  0x58   : > { %p5525_p1 = pneg %p6644_p7  ;;  %p5529_p12 = scmp.lt.u32.totalorder %s5884_s28, %s6586_s0 }
  0x59   : > { %p5530_p13 = scmp.lt.u32.totalorder %s5528_s30, %s5523_s23  ;;  %p5532_p8 = scmp.lt.u32.totalorder %s5523_s23, %s5884_s28 }
  0x5a   : > { %p5526_p6 = pnand %p5525_p1, %p5524_p9 }
  0x5b   : > { %p5531_p3 = por %p5530_p13, %p5529_p12 }
  0x5c   : > { %p5527_p11 = pneg %p5526_p6 }
  0x5d   : > { %p5533_p4 = por %p5532_p8, %p5531_p3 }
  0x5f   : > { %p5534_p5 = pnand %p5533_p4, %p5527_p11 }
  0x61   : > { %5537 = shalt.err (!%p5534_p5)
}
  0x62   : > { %s5538_s12 = scalar_lea.vmem %s5886_s20, 256  ;;  %s5661_s27 = smov [#allocation2]  }
  0x63   : > { %p5539_p10 = scmp.ne.s32.totalorder %s5886_s20, %s5538_s12  ;;  %s5543_s13 = sshll.u32 %s5661_s27, 4  ;;  %s5544_s13 = int_to_ptr.vmem [resolvable:$false] %s5543_s13 }
  0x64   : > { %s5545_s19 = scalar_lea.vmem %s5544_s13, 512  ;;  %p5546_p9 = scmp.lt.s32.totalorder %s5886_s20, %s5544_s13 }
  0x65   : > { %p5541_p2 = pnand %p5539_p10, %p5525_p1  ;;  %p5547_p6 = scmp.lt.s32.totalorder %s5545_s19, %s5538_s12 }
  0x67   : > { %p5542_p0 = pneg %p5541_p2  ;;  %p5548_p12 = por %p5547_p6, %p5546_p9 }
  0x69   : > { %p5549_p13 = pnand %p5548_p12, %p5542_p0 }
  0x6b   : > { %5552 = shalt.err (!%p5549_p13)
}
  0x6c   : > { %5304 = dma.hbm_to_vmem [thread:$0]  (!%p6644_p7), %s5884_s28, 256, %s5886_s20, %s5888_s1, %s5659_s10, %s5659_s10, %s5660_s11  }
  0x6d   : > { %p6645_p1 = scmp.ne.s32.totalorder %s6639_s17, 0 }
  0x6e   : > { %s5922_s23 = sand.u32 (!%p6645_p1), 1, %s5647_s22   ;;  %p6646_p11 = scmp.ne.s32.totalorder (!%p6645_p1), %s6635_s14, 0 }
  0x6f   : > { %410 = sbr.rel (%p6645_p1) target bundleno = 8849 (0x2291), region = 64  ;;  %s4551_s29 = sshll.u32 (!%p6645_p1), %s5922_s23, 4 }
  0x70   : > { %s413_s21 = scalar_lea.sflag (!%p6645_p1), [#allocation3], %s5922_s23  ;;  %s416_s30 = scalar_lea.vmem (!%p6645_p1), [#allocation2], %s4551_s29 }
  0x76   : > { %5626 = dma.done.wait (%p6646_p11), %s413_s21, 256  }
  0x77   : > { %5628 = vsyncadd (%p6646_p11), %s413_s21, 4294967040  ;;  %p6647_p3 = scmp.eq.s32.totalorder %s5768_s25, 0 }
  0x79   : > { %5630 = dma.done.wait (%p6647_p3), [#allocation6], 6272   ;;  %p6648_p7 = pmov %p6647_p3 }
  0x7a   : > { %v482_v0 = vld [vmem:[%s6588_s2] sm:$0xff]  ;;  %v483_v1 = vld [vmem:[%s6588_s2 + $0x8] sm:$0xff]  ;;  %v484_v2 = vld [vmem:[%s6588_s2 + $0x10] sm:$0xff]  ;;  %vm493_vm0 = vcmask 261120   ;;  %v5662_v11 = vmov 0.0   ;;  %vm5663_vm1 = vmmov 0  }
  0x7b   : > { %5632 = vsyncadd (%p6648_p7), [#allocation6], 4294961024  ;;  %v5144_v3 = vpack.c.bf16 %v483_v1, %v482_v0  ;;  %v485_v4 = vld [vmem:[%s6588_s2 + $0x18] sm:$0xff]  ;;  %v471_v5 = vld [vmem:[%s416_s30] sm:$0xff]  ;;  %4866 = vmatprep.subr.mxu0 %v5662_v11  ;;  %4868 = vmatprep.mubr.msk.f32.mxu0 %vm5663_vm1, %v5662_v11  ;;  %s5664_s12 = smov 96   ;;  %vm578_vm2 = vcmask 64512  }
  0x7c   : > { %v5148_v6 = vpack.c.bf16 %v485_v4, %v484_v2  ;;  %v473_v7 = vld [vmem:[#allocation5] sm:$0xff]  ;;  %v472_v9 = vld [vmem:[%s416_s30 + $0x8] sm:$0xff]  ;;  %s5665_s27 = smov 64   ;;  %s5666_s13 = smov 88   ;;  %vm1931_vm3 = vcmask 195584   ;;  %vm1928_vm4 = vcmask 130048  }
  0x7d   : > { %5145 = vmatprep.subr.bf16.mxu1 %v5144_v3  ;;  %v5946_v8 = vadd.f32 %v473_v7, %v471_v5  ;;  %v5950_v10 = vadd.f32 %v473_v7, %v472_v9  ;;  %v4556_v12 = vld [vmem:[%s6589_s3] ss:$0 sm:$0xff]  ;;  %s5667_s19 = smov 120   ;;  %s5668_s29 = smov 56   ;;  %vm2178_vm5 = vcmask 523264   ;;  %vm4138_vm6 = vcmask 1041409  }
  0x7e   : > { %5147 = vmatpush3.bf16.msra.mxu1 %v5144_v3  ;;  %s5669_s21 = smov 80   ;;  %s5670_s30 = smov 112   ;;  %vm4182_vm7 = vcmask 785408  }
  0x7f   : > { %5149 = vmatprep.subr.bf16.mxu1 %v5148_v6  ;;  %4853 = vmatprep.mubr.msk.f32.mxu1 %vm493_vm0, %v5946_v8  ;;  %s6624_s1 = smov 48   ;;  %s6622_s17 = smov 72  }
  0x80   : > { %s6618_s26 = smov 104   ;;  %s6616_s10 = smov 40  }
  0x81   : > { %s6614_s11 = smov 8   ;;  %s6612_s28 = smov 16  }
  0x82   : > { %5151 = vmatpush3.bf16.msra.mxu1 %v5148_v6  ;;  %s6620_s14 = smov 24   ;;  %s4668_s16 = sshll.u32 %s5768_s25, 5 }
  0x83   : > { %4856 = vmatprep.subr.mxu1 %v5662_v11  ;;  %p6658_p4 = scmp.ne.s32.totalorder %s6636_s15, 0 }
  0x85   : > { %4854 = vmatmul.mubr.msk.f32.vlgmr.msra.gmra.mrb[0].mxu1 %vm493_vm0, %v5950_v10 }
  0x86   : > { %4858 = vmatprep.mubr.msk.f32.mxu1 %vm5663_vm1, %v5662_v11 }
 0x158   : > { %v4855_v13 = vpop.f32.mrb[0].mxu1 }
 0x159   : > { %v566_v14 = vpop.f32.mrb[1].mxu1  ;;  %v5967_v16 = vadd.f32 %v4855_v13, %v4556_v12 }
 0x15a   : > { %v5963_v15 = vadd.f32 %v4556_v12, %v566_v14 }
 0x15c   : > { %576 = vrot.lane.b32.xlu0 %v5963_v15, %s5664_s12 }
 0x160   : > { %654 = vrot.lane.b32.xlu0 %v5967_v16, %s5664_s12 }
 0x1ce   : > { %v577_v17 = vpop.permute.xlu0 %576 }
 0x1cf   : > { %4857 = vmatpush3.xpose.msk.msra.mxu1 %vm578_vm2, %v577_v17 }
 0x1d0   : > { %4861 = vmatprep.subr.mxu1 %v5662_v11 }
 0x1d2   : > { %4859 = vmatmul.mubr.msk.f32.vlgmr.msra.gmra.mrb[2].mxu1 %vm578_vm2, %v5963_v15  ;;  %v655_v18 = vpop.permute.xlu0 %654 }
 0x1d3   : > { %4862 = vmatpush3.xpose.msk.msra.mxu1 %vm578_vm2, %v655_v18  ;;  %4863 = vmatprep.mubr.msk.f32.mxu1 %vm5663_vm1, %v5662_v11 }
 0x1d4   : > { %4871 = vmatprep.subr.mxu1 %v5662_v11 }
 0x1d6   : > { %4864 = vmatmul.mubr.msk.f32.vlgmr.msra.gmra.mrb[4].mxu1 %vm578_vm2, %v5967_v16 }
 0x1d7   : > { %4873 = vmatprep.mubr.msk.f32.mxu1 %vm5663_vm1, %v5662_v11 }
 0x2a5   : > { %v649_v19 = vpop.f32.mrb[2].mxu1 }
 0x2a6   : > { %v730_v20 = vmul.f32 0.35355338, %v649_v19  ;;  %v4860_v21 = vpop.f32.mrb[3].mxu1 }
 0x2a8   : > { %v732_v22 = vsel %vm578_vm2, %v730_v20, -inf }
 0x2a9   : > { %733 = vmax.xlane.f32.xlu1 %v732_v22  ;;  %v726_v23 = vpop.f32.mrb[4].mxu1 }
 0x2aa   : > { %v731_v24 = vmul.f32 0.35355338, %v726_v23  ;;  %v4865_v25 = vpop.f32.mrb[5].mxu1 }
 0x2ac   : > { %v735_v26 = vsel %vm578_vm2, %v731_v24, -inf }
 0x2ad   : > { %736 = vmax.xlane.f32.xlu1 %v735_v26 }
 0x2be   : > { %754 = vrot.lane.b32.xlu1 %v5963_v15, %s5665_s27 }
 0x2c2   : > { %830 = vrot.lane.b32.xlu1 %v5967_v16, %s5665_s27 }
 0x2c6   : > { %908 = vrot.lane.b32.xlu1 %v5963_v15, %s5666_s13 }
 0x2ca   : > { %986 = vrot.lane.b32.xlu1 %v5967_v16, %s5666_s13 }
 0x336   : > { %v734_v27 = vpop.xlane.xlu1 %733 }
 0x337   : > { %v738_v28 = vsub.f32 %v730_v20, %v734_v27 }
 0x339   : > { %v740_v29 = vmul.f32 1.442695, %v738_v28 }
 0x33a   : > { %v737_v30 = vpop.xlane.xlu1 %736 }
 0x33b   : > { %5387 = vpow2.f32 %v740_v29  ;;  %v739_v31 = vsub.f32 %v731_v24, %v737_v30 }
 0x33d   : > { %v742_v32 = vmul.f32 1.442695, %v739_v31 }
 0x33e   : > { %v755_v33 = vpop.permute.xlu1 %754 }
 0x33f   : > { %5389 = vpow2.f32 %v742_v32  ;;  %4867 = vmatpush3.msra.mxu0 %v755_v33 }
 0x340   : > { %4876 = vmatprep.subr.mxu0 %v5662_v11 }
 0x342   : > { %v831_v34 = vpop.permute.xlu1 %830 }
 0x343   : > { %4872 = vmatpush3.msra.mxu1 %v831_v34 }
 0x344   : > { %4881 = vmatprep.subr.mxu1 %v5662_v11 }
 0x345   : > { %v5388_v35 = vpop.eup %5387 }
 0x346   : > { %v744_v36 = vsel %vm578_vm2, %v5388_v35, 0.0  ;;  %v909_v39 = vpop.permute.xlu1 %908 }
 0x347   : > { %745 = vadd.xlane.f32.xlu0 %v744_v36 }
 0x349   : > { %v5390_v37 = vpop.eup %5389 }
 0x34a   : > { %v747_v38 = vsel %vm578_vm2, %v5390_v37, 0.0  ;;  %v987_v40 = vpop.permute.xlu1 %986 }
 0x34b   : > { %748 = vadd.xlane.f32.xlu1 %v747_v38 }
 0x35c   : > { %984 = vrot.lane.b32.xlu1 %v5967_v16, %s5667_s19 }
 0x35d   : > { %906 = vrot.lane.b32.xlu0 %v5963_v15, %s5667_s19 }
 0x3d4   : > { %v746_v41 = vpop.xlane.xlu0 %745 }
 0x3d5   : > { %5391 = vrcp.f32 %v746_v41 }
 0x3d8   : > { %v749_v42 = vpop.xlane.xlu1 %748  ;;  %v907_v47 = vpop.permute.xlu0 %906 }
 0x3d9   : > { %5393 = vrcp.f32 %v749_v42 }
 0x3dc   : > { %v985_v48 = vpop.permute.xlu1 %984 }
 0x3df   : > { %v5392_v43 = vpop.eup %5391 }
 0x3e0   : > { %v751_v44 = vmul.f32 %v5392_v43, %v5388_v35 }
 0x3e2   : > { %4869 = vmatmul.mubr.msk.f32.vlgmr.msra.gmra.mrb[0].mxu0 %vm578_vm2, %v751_v44 }
 0x3e3   : > { %v5394_v45 = vpop.eup %5393  ;;  %4877 = vmatpush3.xpose.msk.msra.mxu0 %vm578_vm2, %v909_v39  ;;  %4878 = vmatprep.mubr.msk.f32.mxu0 %vm5663_vm1, %v5662_v11 }
 0x3e4   : > { %v753_v46 = vmul.f32 %v5394_v45, %v5390_v37  ;;  %4886 = vmatprep.subr.mxu0 %v5662_v11 }
 0x3e6   : > { %4874 = vmatmul.mubr.msk.f32.vlgmr.msra.gmra.mrb[6].mxu1 %vm578_vm2, %v753_v46  ;;  %4879 = vmatmul.mubr.msk.f32.vlgmr.msra.gmra.mrb[2].mxu0 %vm578_vm2, %v907_v47 }
 0x3e7   : > { %4882 = vmatpush3.xpose.msk.msra.mxu1 %vm578_vm2, %v987_v40  ;;  %4883 = vmatprep.mubr.msk.f32.mxu1 %vm5663_vm1, %v5662_v11 }
 0x3e8   : > { %4891 = vmatprep.subr.mxu1 %v5662_v11  ;;  %4888 = vmatprep.mubr.msk.f32.mxu0 %vm5663_vm1, %v5662_v11 }
 0x3ea   : > { %4884 = vmatmul.mubr.msk.f32.vlgmr.msra.gmra.mrb[8].mxu1 %vm578_vm2, %v985_v48 }
 0x3eb   : > { %4893 = vmatprep.mubr.msk.f32.mxu1 %vm5663_vm1, %v5662_v11 }
 0x4b5   : > { %v6017_v49 = vpop.f32.mrb[0].mxu0 }
 0x4b6   : > { %v4870_v50 = vpop.f32.mrb[1].mxu0 }
 0x4b9   : > { %v6019_v51 = vpop.f32.mrb[6].mxu1  ;;  %v980_v52 = vpop.f32.mrb[2].mxu0 }
 0x4ba   : > { %v1062_v53 = vmul.f32 0.35355338, %v980_v52  ;;  %v4875_v54 = vpop.f32.mrb[7].mxu1  ;;  %v4880_v55 = vpop.f32.mrb[3].mxu0 }
 0x4bc   : > { %v1064_v56 = vsel %vm578_vm2, %v1062_v53, -inf }
 0x4bd   : > { %v1058_v57 = vpop.f32.mrb[8].mxu1  ;;  %1065 = vmax.xlane.f32.xlu1 %v1064_v56 }
 0x4be   : > { %v1063_v58 = vmul.f32 0.35355338, %v1058_v57  ;;  %v4885_v59 = vpop.f32.mrb[9].mxu1 }
 0x4c0   : > { %v1067_v60 = vsel %vm578_vm2, %v1063_v58, -inf }
 0x4c1   : > { %1068 = vmax.xlane.f32.xlu0 %v1067_v60 }
 0x4ce   : > { %1086 = vrot.lane.b32.xlu1 %v5963_v15, %s5668_s29 }
 0x4d2   : > { %1240 = vrot.lane.b32.xlu1 %v5963_v15, %s5669_s21 }
 0x4d6   : > { %1318 = vrot.lane.b32.xlu1 %v5967_v16, %s5669_s21 }
 0x4d7   : > { %1162 = vrot.lane.b32.xlu0 %v5967_v16, %s5668_s29 }
 0x4db   : > { %1238 = vrot.lane.b32.xlu0 %v5963_v15, %s5670_s30 }
 0x54a   : > { %v1066_v61 = vpop.xlane.xlu1 %1065 }
 0x54b   : > { %v1070_v62 = vsub.f32 %v1062_v53, %v1066_v61 }
 0x54d   : > { %v1072_v63 = vmul.f32 1.442695, %v1070_v62 }
 0x54e   : > { %v1087_v0 = vpop.permute.xlu1 %1086  ;;  %v1069_v1 = vpop.xlane.xlu0 %1068 }
 0x54f   : > { %5395 = vpow2.f32 %v1072_v63  ;;  %v1071_v2 = vsub.f32 %v1063_v58, %v1069_v1  ;;  %4887 = vmatpush3.msra.mxu0 %v1087_v0 }
 0x550   : > { %4896 = vmatprep.subr.mxu0 %v5662_v11 }
 0x551   : > { %v1074_v3 = vmul.f32 1.442695, %v1071_v2 }
 0x552   : > { %v1163_v4 = vpop.permute.xlu0 %1162  ;;  %v1241_v12 = vpop.permute.xlu1 %1240 }
 0x553   : > { %5397 = vpow2.f32 %v1074_v3  ;;  %4892 = vmatpush3.msra.mxu1 %v1163_v4 }
 0x554   : > { %4901 = vmatprep.subr.mxu1 %v5662_v11 }
 0x556   : > { %v1319_v13 = vpop.permute.xlu1 %1318  ;;  %v1239_v22 = vpop.permute.xlu0 %1238 }
 0x559   : > { %v5396_v5 = vpop.eup %5395 }
 0x55a   : > { %v1076_v6 = vsel %vm578_vm2, %v5396_v5, 0.0 }
 0x55b   : > { %1077 = vadd.xlane.f32.xlu1 %v1076_v6 }
 0x55d   : > { %v5398_v7 = vpop.eup %5397 }
 0x55e   : > { %v1079_v9 = vsel %vm578_vm2, %v5398_v7, 0.0 }
 0x55f   : > { %1080 = vadd.xlane.f32.xlu1 %v1079_v9 }
 0x570   : > { %1316 = vrot.lane.b32.xlu1 %v5967_v16, %s5670_s30 }
 0x5e8   : > { %v1078_v14 = vpop.xlane.xlu1 %1077 }
 0x5e9   : > { %5399 = vrcp.f32 %v1078_v14 }
 0x5ec   : > { %v1081_v17 = vpop.xlane.xlu1 %1080 }
 0x5ed   : > { %5401 = vrcp.f32 %v1081_v17 }
 0x5f0   : > { %v1317_v23 = vpop.permute.xlu1 %1316 }
 0x5f3   : > { %v5400_v18 = vpop.eup %5399 }
 0x5f4   : > { %v1083_v19 = vmul.f32 %v5400_v18, %v5396_v5 }
 0x5f6   : > { %4889 = vmatmul.mubr.msk.f32.vlgmr.msra.gmra.mrb[4].mxu0 %vm578_vm2, %v1083_v19 }
 0x5f7   : > { %v5402_v20 = vpop.eup %5401  ;;  %4897 = vmatpush3.xpose.msk.msra.mxu0 %vm578_vm2, %v1241_v12  ;;  %4898 = vmatprep.mubr.msk.f32.mxu0 %vm5663_vm1, %v5662_v11 }
 0x5f8   : > { %v1085_v21 = vmul.f32 %v5402_v20, %v5398_v7  ;;  %4906 = vmatprep.subr.mxu0 %v5662_v11 }
 0x5fa   : > { %4894 = vmatmul.mubr.msk.f32.vlgmr.msra.gmra.mrb[10].mxu1 %vm578_vm2, %v1085_v21  ;;  %4899 = vmatmul.mubr.msk.f32.vlgmr.msra.gmra.mrb[6].mxu0 %vm578_vm2, %v1239_v22 }
 0x5fb   : > { %4902 = vmatpush3.xpose.msk.msra.mxu1 %vm578_vm2, %v1319_v13  ;;  %4903 = vmatprep.mubr.msk.f32.mxu1 %vm5663_vm1, %v5662_v11 }
 0x5fc   : > { %4911 = vmatprep.subr.mxu1 %v5662_v11  ;;  %4908 = vmatprep.mubr.msk.f32.mxu0 %vm5663_vm1, %v5662_v11 }
 0x5fe   : > { %4904 = vmatmul.mubr.msk.f32.vlgmr.msra.gmra.mrb[12].mxu1 %vm578_vm2, %v1317_v23 }
 0x5ff   : > { %4913 = vmatprep.mubr.msk.f32.mxu1 %vm5663_vm1, %v5662_v11 }
 0x6c9   : > { %v6055_v24 = vpop.f32.mrb[4].mxu0 }
 0x6ca   : > { %v4890_v25 = vpop.f32.mrb[5].mxu0 }
 0x6cd   : > { %v6057_v26 = vpop.f32.mrb[10].mxu1  ;;  %v1312_v27 = vpop.f32.mrb[6].mxu0 }
 0x6ce   : > { %v1394_v28 = vmul.f32 0.35355338, %v1312_v27  ;;  %v4895_v29 = vpop.f32.mrb[11].mxu1  ;;  %v4900_v30 = vpop.f32.mrb[7].mxu0 }
 0x6cf   : > { %v1935_v30 = vld [vmem:[%s6590_s4 + $0x8] sm:$0xff] }
 0x6d0   : > { %v1396_v31 = vsel %vm578_vm2, %v1394_v28, -inf }
 0x6d1   : > { %v1390_v32 = vpop.f32.mrb[12].mxu1  ;;  %1397 = vmax.xlane.f32.xlu0 %v1396_v31 }
 0x6d2   : > { %v1395_v33 = vmul.f32 0.35355338, %v1390_v32  ;;  %v4905_v34 = vpop.f32.mrb[13].mxu1  ;;  %v1936_v32 = vld [vmem:[%s6590_s4 + $0x10] sm:$0xff] }
 0x6d4   : > { %v1399_v35 = vsel %vm578_vm2, %v1395_v33, -inf }
 0x6d5   : > { %1400 = vmax.xlane.f32.xlu1 %v1399_v35 }
 0x6e6   : > { %1418 = vrot.lane.b32.xlu1 %v5963_v15, %s6624_s1 }
 0x6e7   : > { %1494 = vrot.lane.b32.xlu0 %v5967_v16, %s6624_s1 }
 0x6ea   : > { %1572 = vrot.lane.b32.xlu1 %v5963_v15, %s6622_s17 }
 0x6ee   : > { %1650 = vrot.lane.b32.xlu1 %v5967_v16, %s6622_s17  ;;  %s6656_s17 = sld [smem:[#allocation21_spill]] }
 0x6f2   : > { %1648 = vrot.lane.b32.xlu1 %v5967_v16, %s6618_s26 }
 0x75e   : > { %v1398_v36 = vpop.xlane.xlu0 %1397 }
 0x75f   : > { %v1402_v37 = vsub.f32 %v1394_v28, %v1398_v36 }
 0x761   : > { %v1404_v38 = vmul.f32 1.442695, %v1402_v37 }
 0x762   : > { %v1401_v39 = vpop.xlane.xlu1 %1400  ;;  %v1495_v40 = vpop.permute.xlu0 %1494 }
 0x763   : > { %5403 = vpow2.f32 %v1404_v38  ;;  %v1403_v41 = vsub.f32 %v1395_v33, %v1401_v39  ;;  %4912 = vmatpush3.msra.mxu1 %v1495_v40  ;;  %v1937_v33 = vld [vmem:[%s6590_s4 + $0x18] sm:$0xff] }
 0x764   : > { %4921 = vmatprep.subr.mxu1 %v5662_v11  ;;  %v5156_v34 = vpack.c.bf16 %v1937_v33, %v1936_v32 }
 0x765   : > { %v1406_v42 = vmul.f32 1.442695, %v1403_v41 }
 0x766   : > { %v1419_v43 = vpop.permute.xlu1 %1418 }
 0x767   : > { %5405 = vpow2.f32 %v1406_v42  ;;  %4907 = vmatpush3.msra.mxu0 %v1419_v43 }
 0x768   : > { %4916 = vmatprep.subr.mxu0 %v5662_v11 }
 0x76a   : > { %v1573_v52 = vpop.permute.xlu1 %1572 }
 0x76d   : > { %v5404_v44 = vpop.eup %5403 }
 0x76e   : > { %v1408_v45 = vsel %vm578_vm2, %v5404_v44, 0.0  ;;  %v1651_v56 = vpop.permute.xlu1 %1650 }
 0x76f   : > { %1409 = vadd.xlane.f32.xlu0 %v1408_v45 }
 0x771   : > { %v5406_v46 = vpop.eup %5405 }
 0x772   : > { %v1411_v47 = vsel %vm578_vm2, %v5406_v46, 0.0  ;;  %v1649_v59 = vpop.permute.xlu1 %1648 }
 0x773   : > { %1412 = vadd.xlane.f32.xlu0 %v1411_v47 }
 0x789   : > { %1570 = vrot.lane.b32.xlu0 %v5963_v15, %s6618_s26  ;;  %s6655_s26 = smov 24  }
 0x7fc   : > { %v1410_v48 = vpop.xlane.xlu0 %1409 }
 0x7fd   : > { %5407 = vrcp.f32 %v1410_v48 }
 0x800   : > { %v1413_v50 = vpop.xlane.xlu0 %1412 }
 0x801   : > { %5409 = vrcp.f32 %v1413_v50 }
 0x804   : > { %v1571_v58 = vpop.permute.xlu0 %1570 }
 0x807   : > { %v5408_v53 = vpop.eup %5407 }
 0x808   : > { %v1415_v54 = vmul.f32 %v5408_v53, %v5404_v44 }
 0x80a   : > { %4909 = vmatmul.mubr.msk.f32.vlgmr.msra.gmra.mrb[8].mxu0 %vm578_vm2, %v1415_v54 }
 0x80b   : > { %v5410_v55 = vpop.eup %5409  ;;  %4917 = vmatpush3.xpose.msk.msra.mxu0 %vm578_vm2, %v1573_v52  ;;  %4918 = vmatprep.mubr.msk.f32.mxu0 %vm5663_vm1, %v5662_v11 }
 0x80c   : > { %v1417_v57 = vmul.f32 %v5410_v55, %v5406_v46  ;;  %4926 = vmatprep.subr.mxu0 %v5662_v11 }
 0x80e   : > { %4914 = vmatmul.mubr.msk.f32.vlgmr.msra.gmra.mrb[14].mxu1 %vm578_vm2, %v1417_v57  ;;  %4919 = vmatmul.mubr.msk.f32.vlgmr.msra.gmra.mrb[10].mxu0 %vm578_vm2, %v1571_v58 }
 0x80f   : > { %4922 = vmatpush3.xpose.msk.msra.mxu1 %vm578_vm2, %v1651_v56  ;;  %4923 = vmatprep.mubr.msk.f32.mxu1 %vm5663_vm1, %v5662_v11 }
 0x810   : > { %4931 = vmatprep.subr.mxu1 %v5662_v11  ;;  %4928 = vmatprep.mubr.msk.f32.mxu0 %vm5663_vm1, %v5662_v11 }
 0x812   : > { %4924 = vmatmul.mubr.msk.f32.vlgmr.msra.gmra.mrb[16].mxu1 %vm578_vm2, %v1649_v59 }
 0x813   : > { %4933 = vmatprep.mubr.msk.f32.mxu1 %vm5663_vm1, %v5662_v11 }
 0x8dd   : > { %v1490_v60 = vpop.f32.mrb[8].mxu0 }
 0x8de   : > { %v4910_v61 = vpop.f32.mrb[9].mxu0 }
 0x8e1   : > { %v1566_v62 = vpop.f32.mrb[14].mxu1  ;;  %v1644_v63 = vpop.f32.mrb[10].mxu0 }
 0x8e2   : > { %v1726_v0 = vmul.f32 0.35355338, %v1644_v63  ;;  %v4915_v1 = vpop.f32.mrb[15].mxu1  ;;  %v4920_v2 = vpop.f32.mrb[11].mxu0 }
 0x8e4   : > { %v1728_v3 = vsel %vm578_vm2, %v1726_v0, -inf }
 0x8e5   : > { %v1722_v4 = vpop.f32.mrb[16].mxu1  ;;  %1729 = vmax.xlane.f32.xlu0 %v1728_v3 }
 0x8e6   : > { %v1727_v5 = vmul.f32 0.35355338, %v1722_v4  ;;  %v4925_v6 = vpop.f32.mrb[17].mxu1 }
 0x8e8   : > { %v1731_v7 = vsel %vm578_vm2, %v1727_v5, -inf }
 0x8e9   : > { %1732 = vmax.xlane.f32.xlu1 %v1731_v7  ;;  %v2072_v7 = vld [vmem:[%s6591_s5 + $0x10] sm:$0xff] }
 0x8fa   : > { %1750 = vrot.lane.b32.xlu1 %v5963_v15, %s6616_s10 }
 0x8fe   : > { %1904 = vrot.lane.b32.xlu1 %v6055_v24, %s6614_s11 }
 0x902   : > { %1906 = vrot.lane.b32.xlu1 %v6057_v26, %s6614_s11 }
 0x906   : > { %1914 = vrot.lane.b32.xlu1 %v1566_v62, %s6612_s28 }
 0x972   : > { %v1730_v9 = vpop.xlane.xlu0 %1729 }
 0x973   : > { %v1734_v12 = vsub.f32 %v1726_v0, %v1730_v9  ;;  %v2073_v9 = vld [vmem:[%s6591_s5 + $0x18] sm:$0xff] }
 0x975   : > { %v1736_v13 = vmul.f32 1.442695, %v1734_v12  ;;  %v5164_v12 = vpack.c.bf16 %v2073_v9, %v2072_v7 }
 0x976   : > { %v1733_v14 = vpop.xlane.xlu1 %1732 }
 0x977   : > { %5411 = vpow2.f32 %v1736_v13  ;;  %v1735_v17 = vsub.f32 %v1727_v5, %v1733_v14  ;;  %v2071_v5 = vld [vmem:[%s6591_s5 + $0x8] sm:$0xff]  ;;  %v2164_v13 = vld [vmem:[%s6593_s7] sm:$0xff] }
 0x978   : > { %v2165_v14 = vld [vmem:[%s6593_s7 + $0x8] sm:$0xff] }
 0x979   : > { %v1738_v18 = vmul.f32 1.442695, %v1735_v17  ;;  %v2166_v17 = vld [vmem:[%s6593_s7 + $0x10] sm:$0xff] }
 0x97a   : > { %v1751_v19 = vpop.permute.xlu1 %1750 }
 0x97b   : > { %5413 = vpow2.f32 %v1738_v18  ;;  %4927 = vmatpush3.msra.mxu0 %v1751_v19  ;;  %v5168_v18 = vpack.c.bf16 %v2165_v14, %v2164_v13  ;;  %v2167_v19 = vld [vmem:[%s6593_s7 + $0x18] sm:$0xff] }
 0x97e   : > { %v1905_v39 = vpop.permute.xlu1 %1904 }
 0x97f   : > { %v1926_v42 = vsel %vm578_vm2, %v6017_v49, %v1905_v39  ;;  %v4583_v49 = vld [vmem:[%s6594_s8] ss:$0 sm:$0xff]  ;;  %v2171_v39 = vld [vmem:[%s6593_s7 + $0x38] sm:$0xff] }
 0x981   : > { %v5412_v15 = vpop.eup %5411 }
 0x982   : > { %v1740_v20 = vsel %vm578_vm2, %v5412_v15, 0.0  ;;  %v1907_v40 = vpop.permute.xlu1 %1906 }
 0x983   : > { %1741 = vadd.xlane.f32.xlu0 %v1740_v20  ;;  %v1927_v47 = vsel %vm578_vm2, %v6019_v51, %v1907_v40  ;;  %v2168_v20 = vld [vmem:[%s6593_s7 + $0x20] sm:$0xff] }
 0x985   : > { %v5414_v21 = vpop.eup %5413 }
 0x986   : > { %v1743_v22 = vsel %vm578_vm2, %v5414_v21, 0.0  ;;  %v1915_v43 = vpop.permute.xlu1 %1914 }
 0x987   : > { %1744 = vadd.xlane.f32.xlu0 %v1743_v22  ;;  %v1930_v48 = vsel %vm1928_vm4, %v1927_v47, %v1915_v43 }
 0x99d   : > { %1826 = vrot.lane.b32.xlu0 %v5967_v16, %s6616_s10  ;;  %v1934_v16 = vld [vmem:[%s6590_s4] sm:$0xff] }
 0x99e   : > { %v5152_v31 = vpack.c.bf16 %v1935_v30, %v1934_v16  ;;  %v4586_v16 = vld [vmem:[%s6594_s8 + $0x1] ss:$0 sm:$0xff] }
 0x9a0   : > { %5153 = vmatprep.subr.bf16.mxu0 %v5152_v31 }
 0x9a1   : > { %1912 = vrot.lane.b32.xlu0 %v1490_v60, %s6612_s28  ;;  %s5678_s28 = smov 32  }
 0xa10   : > { %v1742_v23 = vpop.xlane.xlu0 %1741 }
 0xa11   : > { %5415 = vrcp.f32 %v1742_v23 }
 0xa14   : > { %v1745_v24 = vpop.xlane.xlu0 %1744 }
 0xa15   : > { %5417 = vrcp.f32 %v1745_v24 }
 0xa18   : > { %v1827_v25 = vpop.permute.xlu0 %1826 }
 0xa19   : > { %4932 = vmatpush3.msra.mxu1 %v1827_v25 }
 0xa1b   : > { %v5416_v26 = vpop.eup %5415 }
 0xa1c   : > { %v1747_v27 = vmul.f32 %v5416_v26, %v5412_v15  ;;  %v1913_v41 = vpop.permute.xlu0 %1912  ;;  %v5172_v15 = vpack.c.bf16 %v2167_v19, %v2166_v17  ;;  %v4594_v19 = vld [vmem:[%s6594_s8 + $0x4] ss:$0 sm:$0xff] }
 0xa1d   : > { %v1929_v44 = vsel %vm1928_vm4, %v1926_v42, %v1913_v41  ;;  %v4588_v41 = vld [vmem:[%s6592_s6] ss:$0 sm:$0xff] }
 0xa1e   : > { %4929 = vmatmul.mubr.msk.f32.vlgmr.msra.gmra.mrb[12].mxu0 %vm578_vm2, %v1747_v27 }
 0xa1f   : > { %v5418_v28 = vpop.eup %5417  ;;  %5155 = vmatpush3.bf16.msra.mxu0 %v5152_v31  ;;  %v4587_v31 = vld [vmem:[%s6594_s8 + $0x2] ss:$0 sm:$0xff] }
 0xa20   : > { %v1749_v29 = vmul.f32 %v5418_v28, %v5414_v21  ;;  %5157 = vmatprep.subr.bf16.mxu0 %v5156_v34  ;;  %v2169_v21 = vld [vmem:[%s6593_s7 + $0x28] sm:$0xff] }
 0xa21   : > { %v5176_v22 = vpack.c.bf16 %v2169_v21, %v2168_v20 }
 0xa22   : > { %4934 = vmatmul.mubr.msk.f32.vlgmr.msra.gmra.mrb[18].mxu1 %vm578_vm2, %v1749_v29 }
 0xa23   : > { %5159 = vmatpush3.bf16.msra.mxu0 %v5156_v34 }
 0xa24   : > { %5169 = vmatprep.subr.bf16.mxu0 %v5168_v18 }
 0xaf1   : > { %v1822_v35 = vpop.f32.mrb[12].mxu0 }
 0xaf2   : > { %1920 = vrot.lane.b32.xlu0 %v1822_v35, %s6620_s14  ;;  %v4930_v36 = vpop.f32.mrb[13].mxu0 }
 0xaf5   : > { %v1898_v37 = vpop.f32.mrb[18].mxu1 }
 0xaf6   : > { %1922 = vrot.lane.b32.xlu1 %v1898_v37, %s6620_s14  ;;  %v4935_v38 = vpop.f32.mrb[19].mxu1  ;;  %s6654_s14 = smov 16  }
 0xaf7   : > { %v2170_v38 = vld [vmem:[%s6593_s7 + $0x30] sm:$0xff] }
 0xaf8   : > { %v5180_v40 = vpack.c.bf16 %v2171_v39, %v2170_v38 }
 0xb64   : > { %v1921_v45 = vpop.permute.xlu0 %1920 }
 0xb65   : > { %v1932_v46 = vsel %vm1931_vm3, %v1929_v44, %v1921_v45 }
 0xb66   : > { %4944 = vmatprep.mubr.msk.f32.mxu0 %vm493_vm0, %v1932_v46 }
 0xb68   : > { %v1923_v50 = vpop.permute.xlu1 %1922 }
 0xb69   : > { %v1933_v52 = vsel %vm1931_vm3, %v1930_v48, %v1923_v50  ;;  %v4591_v48 = vld [vmem:[%s6594_s8 + $0x3] ss:$0 sm:$0xff] }
 0xb6a   : > { %4945 = vmatmul.mubr.msk.f32.vlgmr.msra.gmra.mrb[14].mxu0 %vm493_vm0, %v1933_v52 }
 0xb6b   : > { %5171 = vmatpush3.bf16.msra.mxu0 %v5168_v18 }
 0xb6c   : > { %5173 = vmatprep.subr.bf16.mxu0 %v5172_v15 }
 0xb6f   : > { %5175 = vmatpush3.bf16.msra.mxu0 %v5172_v15 }
 0xb70   : > { %5177 = vmatprep.subr.bf16.mxu0 %v5176_v22 }
 0xb73   : > { %5179 = vmatpush3.bf16.msra.mxu0 %v5176_v22  ;;  %v4595_v22 = vld [vmem:[%s6594_s8 + $0x5] ss:$0 sm:$0xff] }
 0xb74   : > { %5181 = vmatprep.subr.bf16.mxu0 %v5180_v40 }
 0xb77   : > { %5183 = vmatpush3.bf16.msra.mxu0 %v5180_v40 }
 0xb78   : > { %4998 = vmatprep.subr.mxu0 %v5662_v11 }
 0xc3d   : > { %v4946_v53 = vpop.f32.mrb[14].mxu0 }
 0xc3e   : > { %v2022_v54 = vadd.f32 %v4946_v53, %v4583_v49  ;;  %v2016_v55 = vpop.f32.mrb[15].mxu0 }
 0xc3f   : > { %v2017_v56 = vadd.f32 %v4583_v49, %v2016_v55 }
 0xc40   : > { %v2026_v57 = vadd.f32 %v2022_v54, %v5950_v10 }
 0xc41   : > { %v2025_v58 = vadd.f32 %v2017_v56, %v5946_v8  ;;  %v2070_v8 = vld [vmem:[%s6591_s5] sm:$0xff] }
 0xc42   : > { %v2030_v51 = vsel %vm493_vm0, %v2026_v57, 0.0  ;;  %v5160_v6 = vpack.c.bf16 %v2071_v5, %v2070_v8  ;;  %v4604_v8 = vld [vmem:[%s6588_s2 + $0x30] sm:$0xff]  ;;  %v4605_v5 = vld [vmem:[%s6588_s2 + $0x38] sm:$0xff] }
 0xc43   : > { %2031 = vadd.xlane.f32.xlu1 %v2030_v51  ;;  %v2027_v59 = vsel %vm493_vm0, %v2025_v58, 0.0 }
 0xc44   : > { %2028 = vadd.xlane.f32.xlu0 %v2027_v59  ;;  %5161 = vmatprep.subr.bf16.mxu1 %v5160_v6 }
 0xc45   : > { %5163 = vmatpush3.bf16.msra.mxu1 %v5160_v6  ;;  %v5188_v6 = vpack.c.bf16 %v4605_v5, %v4604_v8 }
 0xc46   : > { %5165 = vmatprep.subr.bf16.mxu1 %v5164_v12 }
 0xc49   : > { %5167 = vmatpush3.bf16.msra.mxu1 %v5164_v12 }
 0xcd0   : > { %v2032_v60 = vpop.xlane.xlu1 %2031 }
 0xcd1   : > { %v2035_v61 = vmul.f32 0.03125, %v2032_v60  ;;  %v2029_v62 = vpop.xlane.xlu0 %2028 }
 0xcd2   : > { %v2034_v63 = vmul.f32 0.03125, %v2029_v62 }
 0xcd3   : > { %v2037_v0 = vsub.f32 %v2026_v57, %v2035_v61 }
 0xcd4   : > { %v2036_v1 = vsub.f32 %v2025_v58, %v2034_v63 }
 0xcd5   : > { %v2039_v4 = vmul.f32 %v2037_v0, %v2037_v0 }
 0xcd6   : > { %v2038_v2 = vmul.f32 %v2036_v1, %v2036_v1 }
 0xcd7   : > { %v2043_v10 = vsel %vm493_vm0, %v2039_v4, 0.0  ;;  %v4603_v4 = vld [vmem:[%s6588_s2 + $0x28] sm:$0xff] }
 0xcd8   : > { %v2040_v3 = vsel %vm493_vm0, %v2038_v2, 0.0 }
 0xcd9   : > { %2041 = vadd.xlane.f32.xlu0 %v2040_v3  ;;  %v4602_v3 = vld [vmem:[%s6588_s2 + $0x20] sm:$0xff] }
 0xcdd   : > { %2044 = vadd.xlane.f32.xlu0 %v2043_v10  ;;  %v5184_v10 = vpack.c.bf16 %v4603_v4, %v4602_v3 }
 0xcdf   : > { %5185 = vmatprep.subr.bf16.mxu1 %v5184_v10 }
 0xd66   : > { %v2042_v23 = vpop.xlane.xlu0 %2041 }
 0xd67   : > { %v2046_v24 = vmul.f32 0.03125, %v2042_v23 }
 0xd69   : > { %v2048_v25 = vadd.f32 1e-05, %v2046_v24 }
 0xd6a   : > { %v2045_v26 = vpop.xlane.xlu0 %2044 }
 0xd6b   : > { %5419 = vrsqrt.f32 %v2048_v25  ;;  %v2047_v27 = vmul.f32 0.03125, %v2045_v26 }
 0xd6d   : > { %v2049_v28 = vadd.f32 1e-05, %v2047_v27  ;;  %v4607_v27 = vld [vmem:[%s6589_s3 + $0x1] ss:$0 sm:$0xff] }
 0xd6f   : > { %5421 = vrsqrt.f32 %v2049_v28 }
 0xd75   : > { %v5420_v29 = vpop.eup %5419 }
 0xd76   : > { %v2052_v30 = vmul.f32 %v5420_v29, %v2036_v1 }
 0xd78   : > { %v2060_v32 = vmul.f32 %v4586_v16, %v2052_v30 }
 0xd79   : > { %v5422_v33 = vpop.eup %5421 }
 0xd7a   : > { %v2053_v34 = vmul.f32 %v5422_v33, %v2037_v0  ;;  %v2068_v35 = vadd.f32 %v4587_v31, %v2060_v32 }
 0xd7c   : > { %v2061_v36 = vmul.f32 %v4586_v16, %v2053_v34  ;;  %4955 = vmatprep.mubr.msk.f32.mxu1 %vm493_vm0, %v2068_v35 }
 0xd7e   : > { %v2069_v37 = vadd.f32 %v4587_v31, %v2061_v36 }
 0xd80   : > { %4956 = vmatmul.mubr.msk.f32.vlgmr.msra.gmra.mrb[20].mxu1 %vm493_vm0, %v2069_v37 }
 0xd81   : > { %5187 = vmatpush3.bf16.msra.mxu1 %v5184_v10 }
 0xd82   : > { %5189 = vmatprep.subr.bf16.mxu1 %v5188_v6 }
 0xd85   : > { %5191 = vmatpush3.bf16.msra.mxu1 %v5188_v6 }
 0xd86   : > { %4988 = vmatprep.subr.mxu1 %v5662_v11 }
 0xe53   : > { %v4957_v42 = vpop.f32.mrb[20].mxu1 }
 0xe54   : > { %v2159_v43 = vadd.f32 %v4957_v42, %v4588_v41  ;;  %v2153_v44 = vpop.f32.mrb[21].mxu1 }
 0xe55   : > { %v2154_v45 = vadd.f32 %v4588_v41, %v2153_v44 }
 0xe56   : > { %v2163_v47 = vmax.f32 %v2159_v43, 0.0 }
 0xe57   : > { %v2162_v46 = vmax.f32 %v2154_v45, 0.0 }
 0xe59   : > { %4974 = vmatprep.mubr.msk.f32.mxu0 %vm2178_vm5, %v2162_v46 }
 0xe5a   : > { %4975 = vmatmul.mubr.msk.f32.vlgmr.msra.gmra.mrb[16].mxu0 %vm2178_vm5, %v2163_v47 }
 0xe5b   : > { %5000 = vmatprep.mubr.msk.f32.mxu0 %vm5663_vm1, %v5662_v11 }
 0xf2d   : > { %v4976_v50 = vpop.f32.mrb[16].mxu0 }
 0xf2e   : > { %v2257_v52 = vadd.f32 %v4976_v50, %v4591_v48  ;;  %v2251_v49 = vpop.f32.mrb[17].mxu0 }
 0xf2f   : > { %v2252_v53 = vadd.f32 %v4591_v48, %v2251_v49 }
 0xf30   : > { %v2261_v54 = vadd.f32 %v2257_v52, %v2069_v37 }
 0xf31   : > { %v2260_v55 = vadd.f32 %v2252_v53, %v2068_v35 }
 0xf32   : > { %v2265_v56 = vsel %vm493_vm0, %v2261_v54, 0.0 }
 0xf33   : > { %2266 = vadd.xlane.f32.xlu0 %v2265_v56  ;;  %v2262_v57 = vsel %vm493_vm0, %v2260_v55, 0.0 }
 0xf34   : > { %2263 = vadd.xlane.f32.xlu1 %v2262_v57 }
 0xfc0   : > { %v2267_v58 = vpop.xlane.xlu0 %2266 }
 0xfc1   : > { %v2269_v51 = vmul.f32 0.03125, %v2267_v58  ;;  %v2264_v59 = vpop.xlane.xlu1 %2263 }
 0xfc2   : > { %v2268_v60 = vmul.f32 0.03125, %v2264_v59 }
 0xfc3   : > { %v2271_v61 = vsub.f32 %v2261_v54, %v2269_v51 }
 0xfc4   : > { %v2270_v62 = vsub.f32 %v2260_v55, %v2268_v60 }
 0xfc5   : > { %v2273_v63 = vmul.f32 %v2271_v61, %v2271_v61 }
 0xfc6   : > { %v2272_v0 = vmul.f32 %v2270_v62, %v2270_v62 }
 0xfc7   : > { %v2277_v1 = vsel %vm493_vm0, %v2273_v63, 0.0 }
 0xfc8   : > { %2278 = vadd.xlane.f32.xlu0 %v2277_v1  ;;  %v2274_v2 = vsel %vm493_vm0, %v2272_v0, 0.0 }
 0xfc9   : > { %2275 = vadd.xlane.f32.xlu1 %v2274_v2 }
0x1055   : > { %v2279_v7 = vpop.xlane.xlu0 %2278 }
0x1056   : > { %v2281_v9 = vmul.f32 0.03125, %v2279_v7  ;;  %v2276_v12 = vpop.xlane.xlu1 %2275 }
0x1057   : > { %v2280_v13 = vmul.f32 0.03125, %v2276_v12 }
0x1058   : > { %v2283_v14 = vadd.f32 1e-05, %v2281_v9 }
0x1059   : > { %v2282_v17 = vadd.f32 1e-05, %v2280_v13 }
0x105a   : > { %5423 = vrsqrt.f32 %v2283_v14 }
0x105b   : > { %5425 = vrsqrt.f32 %v2282_v17 }
0x1064   : > { %v5424_v18 = vpop.eup %5423 }
0x1065   : > { %v5426_v15 = vpop.eup %5425  ;;  %v2287_v20 = vmul.f32 %v5424_v18, %v2271_v61 }
0x1066   : > { %v2286_v21 = vmul.f32 %v5426_v15, %v2270_v62 }
0x1067   : > { %v2295_v23 = vmul.f32 %v4594_v19, %v2287_v20 }
0x1068   : > { %v2294_v24 = vmul.f32 %v4594_v19, %v2286_v21 }
0x1069   : > { %v6222_v26 = vadd.f32 %v4595_v22, %v2295_v23 }
0x106a   : > { %v6220_v25 = vadd.f32 %v4595_v22, %v2294_v24 }
0x106c   : > { %4985 = vmatprep.mubr.msk.f32.mxu1 %vm493_vm0, %v6220_v25 }
0x106d   : > { %4986 = vmatmul.mubr.msk.f32.vlgmr.msra.gmra.mrb[22].mxu1 %vm493_vm0, %v6222_v26 }
0x106e   : > { %4990 = vmatprep.mubr.msk.f32.mxu1 %vm5663_vm1, %v5662_v11 }
0x1140   : > { %v4987_v28 = vpop.f32.mrb[22].mxu1 }
0x1141   : > { %v6233_v29 = vadd.f32 %v4987_v28, %v4607_v27  ;;  %v2396_v16 = vpop.f32.mrb[23].mxu1 }
0x1142   : > { %v6235_v30 = vadd.f32 %v4607_v27, %v2396_v16 }
0x1143   : > { %2483 = vrot.lane.b32.xlu0 %v6233_v29, %s5664_s12 }
0x1144   : > { %2406 = vrot.lane.b32.xlu1 %v6235_v30, %s5664_s12 }
0x11b5   : > { %v2484_v32 = vpop.permute.xlu0 %2483 }
0x11b6   : > { %v2407_v31 = vpop.permute.xlu1 %2406 }
0x11b7   : > { %4989 = vmatpush3.xpose.msk.msra.mxu1 %vm578_vm2, %v2407_v31 }
0x11b8   : > { %4993 = vmatprep.subr.mxu1 %v5662_v11 }
0x11ba   : > { %4991 = vmatmul.mubr.msk.f32.vlgmr.msra.gmra.mrb[24].mxu1 %vm578_vm2, %v6235_v30 }
0x11bb   : > { %4994 = vmatpush3.xpose.msk.msra.mxu1 %vm578_vm2, %v2484_v32  ;;  %4995 = vmatprep.mubr.msk.f32.mxu1 %vm5663_vm1, %v5662_v11 }
0x11bc   : > { %5003 = vmatprep.subr.mxu1 %v5662_v11 }
0x11be   : > { %4996 = vmatmul.mubr.msk.f32.vlgmr.msra.gmra.mrb[26].mxu1 %vm578_vm2, %v6233_v29 }
0x11bf   : > { %5005 = vmatprep.mubr.msk.f32.mxu1 %vm5663_vm1, %v5662_v11 }
0x128d   : > { %v2478_v33 = vpop.f32.mrb[24].mxu1 }
0x128e   : > { %v2559_v34 = vmul.f32 0.35355338, %v2478_v33  ;;  %v4992_v35 = vpop.f32.mrb[25].mxu1 }
0x1290   : > { %v2561_v36 = vsel %vm578_vm2, %v2559_v34, -inf }
0x1291   : > { %2562 = vmax.xlane.f32.xlu1 %v2561_v36  ;;  %v2555_v37 = vpop.f32.mrb[26].mxu1 }
0x1292   : > { %v2560_v38 = vmul.f32 0.35355338, %v2555_v37  ;;  %v4997_v39 = vpop.f32.mrb[27].mxu1 }
0x1294   : > { %v2564_v40 = vsel %vm578_vm2, %v2560_v38, -inf }
0x1295   : > { %2565 = vmax.xlane.f32.xlu0 %v2564_v40 }
0x12a2   : > { %2583 = vrot.lane.b32.xlu1 %v6235_v30, %s5665_s27 }
0x12a6   : > { %2737 = vrot.lane.b32.xlu1 %v6235_v30, %s5666_s13 }
0x12aa   : > { %2815 = vrot.lane.b32.xlu1 %v6233_v29, %s5666_s13  ;;  %s6649_s13 = smov 48  }
0x12ab   : > { %2659 = vrot.lane.b32.xlu0 %v6233_v29, %s5665_s27 }
0x131e   : > { %v2563_v41 = vpop.xlane.xlu1 %2562 }
0x131f   : > { %v2567_v42 = vsub.f32 %v2559_v34, %v2563_v41 }
0x1321   : > { %v2569_v43 = vmul.f32 1.442695, %v2567_v42 }
0x1322   : > { %v2584_v44 = vpop.permute.xlu1 %2583  ;;  %v2566_v45 = vpop.xlane.xlu0 %2565 }
0x1323   : > { %5427 = vpow2.f32 %v2569_v43  ;;  %v2568_v46 = vsub.f32 %v2560_v38, %v2566_v45  ;;  %4999 = vmatpush3.msra.mxu0 %v2584_v44 }
0x1324   : > { %5008 = vmatprep.subr.mxu0 %v5662_v11 }
0x1325   : > { %v2571_v47 = vmul.f32 1.442695, %v2568_v46 }
0x1326   : > { %v2660_v48 = vpop.permute.xlu0 %2659  ;;  %v2738_v54 = vpop.permute.xlu1 %2737 }
0x1327   : > { %5429 = vpow2.f32 %v2571_v47  ;;  %5004 = vmatpush3.msra.mxu1 %v2660_v48 }
0x1328   : > { %5013 = vmatprep.subr.mxu1 %v5662_v11 }
0x132a   : > { %v2816_v55 = vpop.permute.xlu1 %2815 }
0x132d   : > { %v5428_v50 = vpop.eup %5427 }
0x132e   : > { %v2573_v52 = vsel %vm578_vm2, %v5428_v50, 0.0 }
0x132f   : > { %2574 = vadd.xlane.f32.xlu1 %v2573_v52 }
0x1331   : > { %v5430_v49 = vpop.eup %5429 }
0x1332   : > { %v2576_v53 = vsel %vm578_vm2, %v5430_v49, 0.0 }
0x1333   : > { %2577 = vadd.xlane.f32.xlu0 %v2576_v53 }
0x1340   : > { %2813 = vrot.lane.b32.xlu1 %v6233_v29, %s5667_s19 }
0x1349   : > { %2735 = vrot.lane.b32.xlu0 %v6235_v30, %s5667_s19  ;;  %s6650_s19 = smov 72  }
0x13bc   : > { %v2575_v56 = vpop.xlane.xlu1 %2574 }
0x13bd   : > { %5431 = vrcp.f32 %v2575_v56 }
0x13c0   : > { %v2578_v57 = vpop.xlane.xlu0 %2577  ;;  %v2814_v62 = vpop.permute.xlu1 %2813 }
0x13c1   : > { %5433 = vrcp.f32 %v2578_v57 }
0x13c4   : > { %v2736_v61 = vpop.permute.xlu0 %2735 }
0x13c7   : > { %v5432_v58 = vpop.eup %5431 }
0x13c8   : > { %v2580_v51 = vmul.f32 %v5432_v58, %v5428_v50 }
0x13ca   : > { %5001 = vmatmul.mubr.msk.f32.vlgmr.msra.gmra.mrb[18].mxu0 %vm578_vm2, %v2580_v51 }
0x13cb   : > { %v5434_v59 = vpop.eup %5433  ;;  %5009 = vmatpush3.xpose.msk.msra.mxu0 %vm578_vm2, %v2738_v54  ;;  %5010 = vmatprep.mubr.msk.f32.mxu0 %vm5663_vm1, %v5662_v11 }
0x13cc   : > { %v2582_v60 = vmul.f32 %v5434_v59, %v5430_v49  ;;  %5018 = vmatprep.subr.mxu0 %v5662_v11 }
0x13ce   : > { %5006 = vmatmul.mubr.msk.f32.vlgmr.msra.gmra.mrb[28].mxu1 %vm578_vm2, %v2582_v60  ;;  %5011 = vmatmul.mubr.msk.f32.vlgmr.msra.gmra.mrb[20].mxu0 %vm578_vm2, %v2736_v61 }
0x13cf   : > { %5014 = vmatpush3.xpose.msk.msra.mxu1 %vm578_vm2, %v2816_v55  ;;  %5015 = vmatprep.mubr.msk.f32.mxu1 %vm5663_vm1, %v5662_v11 }
0x13d0   : > { %5023 = vmatprep.subr.mxu1 %v5662_v11  ;;  %5020 = vmatprep.mubr.msk.f32.mxu0 %vm5663_vm1, %v5662_v11 }
0x13d2   : > { %5016 = vmatmul.mubr.msk.f32.vlgmr.msra.gmra.mrb[30].mxu1 %vm578_vm2, %v2814_v62 }
0x13d3   : > { %5025 = vmatprep.mubr.msk.f32.mxu1 %vm5663_vm1, %v5662_v11 }
0x149d   : > { %v6287_v63 = vpop.f32.mrb[18].mxu0 }
0x149e   : > { %v5002_v0 = vpop.f32.mrb[19].mxu0 }
0x14a1   : > { %v6289_v1 = vpop.f32.mrb[28].mxu1  ;;  %v2809_v2 = vpop.f32.mrb[20].mxu0 }
0x14a2   : > { %v2891_v3 = vmul.f32 0.35355338, %v2809_v2  ;;  %v5007_v4 = vpop.f32.mrb[29].mxu1  ;;  %v5012_v10 = vpop.f32.mrb[21].mxu0 }
0x14a4   : > { %v2893_v8 = vsel %vm578_vm2, %v2891_v3, -inf }
0x14a5   : > { %2894 = vmax.xlane.f32.xlu0 %v2893_v8  ;;  %v2887_v5 = vpop.f32.mrb[30].mxu1 }
0x14a6   : > { %v2892_v6 = vmul.f32 0.35355338, %v2887_v5  ;;  %v5017_v7 = vpop.f32.mrb[31].mxu1 }
0x14a8   : > { %v2896_v9 = vsel %vm578_vm2, %v2892_v6, -inf }
0x14a9   : > { %2897 = vmax.xlane.f32.xlu1 %v2896_v9 }
0x14ba   : > { %2915 = vrot.lane.b32.xlu1 %v6235_v30, %s5668_s29 }
0x14bb   : > { %2991 = vrot.lane.b32.xlu0 %v6233_v29, %s5668_s29  ;;  %s6651_s29 = smov 104  }
0x14be   : > { %3069 = vrot.lane.b32.xlu1 %v6235_v30, %s5669_s21 }
0x14c2   : > { %3147 = vrot.lane.b32.xlu1 %v6233_v29, %s5669_s21  ;;  %s6652_s21 = smov 40  }
0x14c6   : > { %3145 = vrot.lane.b32.xlu1 %v6233_v29, %s5670_s30 }
0x1532   : > { %v2895_v12 = vpop.xlane.xlu0 %2894 }
0x1533   : > { %v2899_v13 = vsub.f32 %v2891_v3, %v2895_v12 }
0x1535   : > { %v2901_v14 = vmul.f32 1.442695, %v2899_v13 }
0x1536   : > { %v2992_v17 = vpop.permute.xlu0 %2991  ;;  %v2898_v18 = vpop.xlane.xlu1 %2897 }
0x1537   : > { %5435 = vpow2.f32 %v2901_v14  ;;  %v2900_v19 = vsub.f32 %v2892_v6, %v2898_v18  ;;  %5024 = vmatpush3.msra.mxu1 %v2992_v17 }
0x1538   : > { %5033 = vmatprep.subr.mxu1 %v5662_v11 }
0x1539   : > { %v2903_v15 = vmul.f32 1.442695, %v2900_v19 }
0x153a   : > { %v2916_v20 = vpop.permute.xlu1 %2915 }
0x153b   : > { %5437 = vpow2.f32 %v2903_v15  ;;  %5019 = vmatpush3.msra.mxu0 %v2916_v20 }
0x153c   : > { %5028 = vmatprep.subr.mxu0 %v5662_v11 }
0x153e   : > { %v3070_v16 = vpop.permute.xlu1 %3069 }
0x1541   : > { %v5436_v21 = vpop.eup %5435 }
0x1542   : > { %v2905_v22 = vsel %vm578_vm2, %v5436_v21, 0.0  ;;  %v3148_v34 = vpop.permute.xlu1 %3147 }
0x1543   : > { %2906 = vadd.xlane.f32.xlu0 %v2905_v22 }
0x1545   : > { %v5438_v23 = vpop.eup %5437 }
0x1546   : > { %v2908_v24 = vsel %vm578_vm2, %v5438_v23, 0.0  ;;  %v3146_v37 = vpop.permute.xlu1 %3145 }
0x1547   : > { %2909 = vadd.xlane.f32.xlu0 %v2908_v24 }
0x155d   : > { %3067 = vrot.lane.b32.xlu0 %v6235_v30, %s5670_s30  ;;  %s6653_s30 = smov 8  }
0x15d0   : > { %v2907_v27 = vpop.xlane.xlu0 %2906 }
0x15d1   : > { %5439 = vrcp.f32 %v2907_v27 }
0x15d4   : > { %v2910_v28 = vpop.xlane.xlu0 %2909 }
0x15d5   : > { %5441 = vrcp.f32 %v2910_v28 }
0x15d8   : > { %v3068_v36 = vpop.permute.xlu0 %3067 }
0x15db   : > { %v5440_v31 = vpop.eup %5439 }
0x15dc   : > { %v2912_v32 = vmul.f32 %v5440_v31, %v5436_v21 }
0x15de   : > { %5021 = vmatmul.mubr.msk.f32.vlgmr.msra.gmra.mrb[22].mxu0 %vm578_vm2, %v2912_v32 }
0x15df   : > { %v5442_v33 = vpop.eup %5441  ;;  %5029 = vmatpush3.xpose.msk.msra.mxu0 %vm578_vm2, %v3070_v16  ;;  %5030 = vmatprep.mubr.msk.f32.mxu0 %vm5663_vm1, %v5662_v11 }
0x15e0   : > { %v2914_v35 = vmul.f32 %v5442_v33, %v5438_v23  ;;  %5038 = vmatprep.subr.mxu0 %v5662_v11 }
0x15e2   : > { %5026 = vmatmul.mubr.msk.f32.vlgmr.msra.gmra.mrb[32].mxu1 %vm578_vm2, %v2914_v35  ;;  %5031 = vmatmul.mubr.msk.f32.vlgmr.msra.gmra.mrb[24].mxu0 %vm578_vm2, %v3068_v36 }
0x15e3   : > { %5034 = vmatpush3.xpose.msk.msra.mxu1 %vm578_vm2, %v3148_v34  ;;  %5035 = vmatprep.mubr.msk.f32.mxu1 %vm5663_vm1, %v5662_v11 }
0x15e4   : > { %5043 = vmatprep.subr.mxu1 %v5662_v11  ;;  %5040 = vmatprep.mubr.msk.f32.mxu0 %vm5663_vm1, %v5662_v11 }
0x15e6   : > { %5036 = vmatmul.mubr.msk.f32.vlgmr.msra.gmra.mrb[34].mxu1 %vm578_vm2, %v3146_v37 }
0x15e7   : > { %5045 = vmatprep.mubr.msk.f32.mxu1 %vm5663_vm1, %v5662_v11 }
0x16b1   : > { %v6325_v38 = vpop.f32.mrb[22].mxu0 }
0x16b2   : > { %v5022_v39 = vpop.f32.mrb[23].mxu0 }
0x16b5   : > { %v6327_v40 = vpop.f32.mrb[32].mxu1  ;;  %v3141_v41 = vpop.f32.mrb[24].mxu0 }
0x16b6   : > { %v3223_v42 = vmul.f32 0.35355338, %v3141_v41  ;;  %v5027_v43 = vpop.f32.mrb[33].mxu1  ;;  %v5032_v44 = vpop.f32.mrb[25].mxu0 }
0x16b7   : > { %v4635_v44 = vld [vmem:[%s6590_s4 + $0x28] sm:$0xff] }
0x16b8   : > { %v3225_v45 = vsel %vm578_vm2, %v3223_v42, -inf }
0x16b9   : > { %3226 = vmax.xlane.f32.xlu0 %v3225_v45  ;;  %v3219_v46 = vpop.f32.mrb[34].mxu1 }
0x16ba   : > { %v3224_v47 = vmul.f32 0.35355338, %v3219_v46  ;;  %v5037_v48 = vpop.f32.mrb[35].mxu1  ;;  %v4636_v46 = vld [vmem:[%s6590_s4 + $0x30] sm:$0xff] }
0x16bc   : > { %v3228_v50 = vsel %vm578_vm2, %v3224_v47, -inf }
0x16bd   : > { %3229 = vmax.xlane.f32.xlu1 %v3228_v50 }
0x16ce   : > { %3247 = vrot.lane.b32.xlu1 %v6235_v30, %s6649_s13 }
0x16cf   : > { %3323 = vrot.lane.b32.xlu0 %v6233_v29, %s6649_s13  ;;  %s6657_s13 = sld [smem:[#allocation22_spill]] }
0x16d2   : > { %3401 = vrot.lane.b32.xlu1 %v6235_v30, %s6650_s19 }
0x16d6   : > { %3479 = vrot.lane.b32.xlu1 %v6233_v29, %s6650_s19  ;;  %s6512_s19 = scalar_lea.hbm %s6657_s13, %s4668_s16 }
0x16da   : > { %3477 = vrot.lane.b32.xlu1 %v6233_v29, %s6651_s29 }
0x1746   : > { %v3227_v52 = vpop.xlane.xlu0 %3226 }
0x1747   : > { %v3231_v49 = vsub.f32 %v3223_v42, %v3227_v52 }
0x1749   : > { %v3233_v53 = vmul.f32 1.442695, %v3231_v49 }
0x174a   : > { %v3324_v54 = vpop.permute.xlu0 %3323  ;;  %v3230_v55 = vpop.xlane.xlu1 %3229 }
0x174b   : > { %5443 = vpow2.f32 %v3233_v53  ;;  %v3232_v56 = vsub.f32 %v3224_v47, %v3230_v55  ;;  %5044 = vmatpush3.msra.mxu1 %v3324_v54  ;;  %v4637_v47 = vld [vmem:[%s6590_s4 + $0x38] sm:$0xff] }
0x174c   : > { %5053 = vmatprep.subr.mxu1 %v5662_v11  ;;  %v5196_v48 = vpack.c.bf16 %v4637_v47, %v4636_v46 }
0x174d   : > { %v3235_v57 = vmul.f32 1.442695, %v3232_v56 }
0x174e   : > { %v3248_v58 = vpop.permute.xlu1 %3247 }
0x174f   : > { %5445 = vpow2.f32 %v3235_v57  ;;  %5039 = vmatpush3.msra.mxu0 %v3248_v58 }
0x1750   : > { %5048 = vmatprep.subr.mxu0 %v5662_v11 }
0x1752   : > { %v3402_v2 = vpop.permute.xlu1 %3401 }
0x1755   : > { %v5444_v51 = vpop.eup %5443 }
0x1756   : > { %v3237_v59 = vsel %vm578_vm2, %v5444_v51, 0.0  ;;  %v3480_v8 = vpop.permute.xlu1 %3479 }
0x1757   : > { %3238 = vadd.xlane.f32.xlu0 %v3237_v59 }
0x1759   : > { %v5446_v60 = vpop.eup %5445 }
0x175a   : > { %v3240_v61 = vsel %vm578_vm2, %v5446_v60, 0.0  ;;  %v3478_v7 = vpop.permute.xlu1 %3477 }
0x175b   : > { %3241 = vadd.xlane.f32.xlu0 %v3240_v61 }
0x1771   : > { %3399 = vrot.lane.b32.xlu0 %v6235_v30, %s6651_s29 }
0x17e4   : > { %v3239_v62 = vpop.xlane.xlu0 %3238 }
0x17e5   : > { %5447 = vrcp.f32 %v3239_v62 }
0x17e8   : > { %v3242_v0 = vpop.xlane.xlu0 %3241 }
0x17e9   : > { %5449 = vrcp.f32 %v3242_v0 }
0x17ec   : > { %v3400_v6 = vpop.permute.xlu0 %3399 }
0x17ef   : > { %v5448_v3 = vpop.eup %5447 }
0x17f0   : > { %v3244_v4 = vmul.f32 %v5448_v3, %v5444_v51 }
0x17f2   : > { %5041 = vmatmul.mubr.msk.f32.vlgmr.msra.gmra.mrb[26].mxu0 %vm578_vm2, %v3244_v4 }
0x17f3   : > { %v5450_v10 = vpop.eup %5449  ;;  %5049 = vmatpush3.xpose.msk.msra.mxu0 %vm578_vm2, %v3402_v2  ;;  %5050 = vmatprep.mubr.msk.f32.mxu0 %vm5663_vm1, %v5662_v11 }
0x17f4   : > { %v3246_v5 = vmul.f32 %v5450_v10, %v5446_v60  ;;  %5058 = vmatprep.subr.mxu0 %v5662_v11 }
0x17f6   : > { %5046 = vmatmul.mubr.msk.f32.vlgmr.msra.gmra.mrb[36].mxu1 %vm578_vm2, %v3246_v5  ;;  %5051 = vmatmul.mubr.msk.f32.vlgmr.msra.gmra.mrb[28].mxu0 %vm578_vm2, %v3400_v6 }
0x17f7   : > { %5054 = vmatpush3.xpose.msk.msra.mxu1 %vm578_vm2, %v3480_v8  ;;  %5055 = vmatprep.mubr.msk.f32.mxu1 %vm5663_vm1, %v5662_v11 }
0x17f8   : > { %5063 = vmatprep.subr.mxu1 %v5662_v11  ;;  %5060 = vmatprep.mubr.msk.f32.mxu0 %vm5663_vm1, %v5662_v11 }
0x17fa   : > { %5056 = vmatmul.mubr.msk.f32.vlgmr.msra.gmra.mrb[38].mxu1 %vm578_vm2, %v3478_v7 }
0x17fb   : > { %5065 = vmatprep.mubr.msk.f32.mxu1 %vm5663_vm1, %v5662_v11 }
0x18c5   : > { %v3319_v9 = vpop.f32.mrb[26].mxu0 }
0x18c6   : > { %v5042_v12 = vpop.f32.mrb[27].mxu0 }
0x18c9   : > { %v3395_v13 = vpop.f32.mrb[36].mxu1  ;;  %v3473_v14 = vpop.f32.mrb[28].mxu0 }
0x18ca   : > { %v3555_v17 = vmul.f32 0.35355338, %v3473_v14  ;;  %v5047_v18 = vpop.f32.mrb[37].mxu1  ;;  %v5052_v19 = vpop.f32.mrb[29].mxu0 }
0x18cc   : > { %v3557_v15 = vsel %vm578_vm2, %v3555_v17, -inf }
0x18cd   : > { %3558 = vmax.xlane.f32.xlu0 %v3557_v15  ;;  %v3551_v20 = vpop.f32.mrb[38].mxu1 }
0x18ce   : > { %v3556_v21 = vmul.f32 0.35355338, %v3551_v20  ;;  %v5057_v22 = vpop.f32.mrb[39].mxu1 }
0x18d0   : > { %v3560_v23 = vsel %vm578_vm2, %v3556_v21, -inf }
0x18d1   : > { %3561 = vmax.xlane.f32.xlu1 %v3560_v23  ;;  %v4645_v23 = vld [vmem:[%s6591_s5 + $0x30] sm:$0xff] }
0x18e2   : > { %3579 = vrot.lane.b32.xlu1 %v6235_v30, %s6652_s21 }
0x18e6   : > { %3733 = vrot.lane.b32.xlu1 %v6325_v38, %s6653_s30 }
0x18ea   : > { %3735 = vrot.lane.b32.xlu1 %v6327_v40, %s6653_s30 }
0x18ee   : > { %3743 = vrot.lane.b32.xlu1 %v3395_v13, %s6654_s14 }
0x195a   : > { %v3559_v24 = vpop.xlane.xlu0 %3558 }
0x195b   : > { %v3563_v27 = vsub.f32 %v3555_v17, %v3559_v24  ;;  %v4646_v24 = vld [vmem:[%s6591_s5 + $0x38] sm:$0xff] }
0x195d   : > { %v3565_v28 = vmul.f32 1.442695, %v3563_v27  ;;  %v5204_v27 = vpack.c.bf16 %v4646_v24, %v4645_v23 }
0x195e   : > { %v3562_v16 = vpop.xlane.xlu1 %3561 }
0x195f   : > { %5451 = vpow2.f32 %v3565_v28  ;;  %v3564_v31 = vsub.f32 %v3556_v21, %v3562_v16  ;;  %v4644_v21 = vld [vmem:[%s6591_s5 + $0x28] sm:$0xff]  ;;  %v4651_v28 = vld [vmem:[%s6593_s7 + $0x40] sm:$0xff] }
0x1960   : > { %v4652_v16 = vld [vmem:[%s6593_s7 + $0x48] sm:$0xff] }
0x1961   : > { %v3567_v32 = vmul.f32 1.442695, %v3564_v31  ;;  %v4653_v31 = vld [vmem:[%s6593_s7 + $0x50] sm:$0xff] }
0x1962   : > { %v3580_v33 = vpop.permute.xlu1 %3579 }
0x1963   : > { %5453 = vpow2.f32 %v3567_v32  ;;  %5059 = vmatpush3.msra.mxu0 %v3580_v33  ;;  %v5208_v32 = vpack.c.bf16 %v4652_v16, %v4651_v28  ;;  %v4654_v33 = vld [vmem:[%s6593_s7 + $0x58] sm:$0xff]  ;;  %v4190_v28 = vld [vmem:[#allocation7 + $0x18] sm:$0xff]  ;;  %v4207_v16 = vld [vmem:[#allocation7 + $0xa0] sm:$0xff] }
0x1966   : > { %v3734_v54 = vpop.permute.xlu1 %3733 }
0x1967   : > { %v3755_v57 = vsel %vm578_vm2, %v6287_v63, %v3734_v54  ;;  %v4638_v63 = vld [vmem:[%s6594_s8 + $0x6] ss:$0 sm:$0xff]  ;;  %v4658_v54 = vld [vmem:[%s6593_s7 + $0x78] sm:$0xff] }
0x1969   : > { %v5452_v34 = vpop.eup %5451 }
0x196a   : > { %v3569_v30 = vsel %vm578_vm2, %v5452_v34, 0.0  ;;  %v3736_v55 = vpop.permute.xlu1 %3735 }
0x196b   : > { %3570 = vadd.xlane.f32.xlu0 %v3569_v30  ;;  %v3756_v61 = vsel %vm578_vm2, %v6289_v1, %v3736_v55  ;;  %v4655_v30 = vld [vmem:[%s6593_s7 + $0x60] sm:$0xff] }
0x196d   : > { %v5454_v35 = vpop.eup %5453 }
0x196e   : > { %v3572_v36 = vsel %vm578_vm2, %v5454_v35, 0.0  ;;  %v3744_v58 = vpop.permute.xlu1 %3743 }
0x196f   : > { %3573 = vadd.xlane.f32.xlu0 %v3572_v36  ;;  %v3758_v62 = vsel %vm1928_vm4, %v3756_v61, %v3744_v58 }
0x1985   : > { %3655 = vrot.lane.b32.xlu0 %v6233_v29, %s6652_s21  ;;  %v4634_v29 = vld [vmem:[%s6590_s4 + $0x20] sm:$0xff]  ;;  %s4390_s21 = scalar_lea.sflag [#allocation4], %s5922_s23 }
0x1986   : > { %v5192_v45 = vpack.c.bf16 %v4635_v44, %v4634_v29  ;;  %v4641_v29 = vld [vmem:[%s6594_s8 + $0x7] ss:$0 sm:$0xff] }
0x1988   : > { %5193 = vmatprep.subr.bf16.mxu0 %v5192_v45 }
0x1989   : > { %3741 = vrot.lane.b32.xlu0 %v3319_v9, %s6654_s14  ;;  %s5680_s14 = smov [#allocation8]  }
0x198a   : > { %s5557_s10 = sshll.u32 %s5680_s14, 4  ;;  %s5558_s10 = int_to_ptr.vmem [resolvable:$false] %s5557_s10 }
0x198b   : > { %s5559_s11 = scalar_lea.vmem %s5558_s10, 64 }
0x19f8   : > { %v3571_v37 = vpop.xlane.xlu0 %3570 }
0x19f9   : > { %5455 = vrcp.f32 %v3571_v37 }
0x19fc   : > { %v3574_v38 = vpop.xlane.xlu0 %3573 }
0x19fd   : > { %5457 = vrcp.f32 %v3574_v38 }
0x1a00   : > { %v3656_v39 = vpop.permute.xlu0 %3655 }
0x1a01   : > { %5064 = vmatpush3.msra.mxu1 %v3656_v39 }
0x1a03   : > { %v5456_v40 = vpop.eup %5455 }
0x1a04   : > { %v3576_v41 = vmul.f32 %v5456_v40, %v5452_v34  ;;  %v3742_v56 = vpop.permute.xlu0 %3741  ;;  %v5212_v34 = vpack.c.bf16 %v4654_v33, %v4653_v31  ;;  %v4208_v31 = vld [vmem:[#allocation7 + $0xa8] sm:$0xff] }
0x1a05   : > { %v3757_v51 = vsel %vm1928_vm4, %v3755_v57, %v3742_v56  ;;  %v4648_v56 = vld [vmem:[%s6592_s6 + $0x1] ss:$0 sm:$0xff]  ;;  %v5232_v33 = vpack.c.bf16 %v4208_v31, %v4207_v16 }
0x1a06   : > { %5061 = vmatmul.mubr.msk.f32.vlgmr.msra.gmra.mrb[30].mxu0 %vm578_vm2, %v3576_v41 }
0x1a07   : > { %v5458_v42 = vpop.eup %5457  ;;  %5195 = vmatpush3.bf16.msra.mxu0 %v5192_v45  ;;  %v4642_v45 = vld [vmem:[%s6594_s8 + $0x8] ss:$0 sm:$0xff] }
0x1a08   : > { %v3578_v43 = vmul.f32 %v5458_v42, %v5454_v35  ;;  %5197 = vmatprep.subr.bf16.mxu0 %v5196_v48  ;;  %v4656_v35 = vld [vmem:[%s6593_s7 + $0x68] sm:$0xff] }
0x1a09   : > { %v5216_v36 = vpack.c.bf16 %v4656_v35, %v4655_v30  ;;  %v4192_v30 = vld [vmem:[#allocation7 + $0x28] sm:$0xff]  ;;  %v4209_v35 = vld [vmem:[#allocation7 + $0xb0] sm:$0xff] }
0x1a0a   : > { %5066 = vmatmul.mubr.msk.f32.vlgmr.msra.gmra.mrb[40].mxu1 %vm578_vm2, %v3578_v43 }
0x1a0b   : > { %5199 = vmatpush3.bf16.msra.mxu0 %v5196_v48 }
0x1a0c   : > { %5209 = vmatprep.subr.bf16.mxu0 %v5208_v32 }
0x1ad9   : > { %v3651_v50 = vpop.f32.mrb[30].mxu0 }
0x1ada   : > { %3749 = vrot.lane.b32.xlu0 %v3651_v50, %s6655_s26  ;;  %v5062_v52 = vpop.f32.mrb[31].mxu0 }
0x1add   : > { %v3727_v49 = vpop.f32.mrb[40].mxu1 }
0x1ade   : > { %3751 = vrot.lane.b32.xlu1 %v3727_v49, %s6655_s26  ;;  %v5067_v53 = vpop.f32.mrb[41].mxu1 }
0x1adf   : > { %v4657_v53 = vld [vmem:[%s6593_s7 + $0x70] sm:$0xff] }
0x1ae0   : > { %v5220_v55 = vpack.c.bf16 %v4658_v54, %v4657_v53 }
0x1b4c   : > { %v3750_v59 = vpop.permute.xlu0 %3749 }
0x1b4d   : > { %v3759_v60 = vsel %vm1931_vm3, %v3757_v51, %v3750_v59 }
0x1b4e   : > { %5076 = vmatprep.mubr.msk.f32.mxu0 %vm493_vm0, %v3759_v60 }
0x1b50   : > { %v3752_v0 = vpop.permute.xlu1 %3751 }
0x1b51   : > { %v3760_v2 = vsel %vm1931_vm3, %v3758_v62, %v3752_v0  ;;  %v4659_v62 = vld [vmem:[%s6594_s8 + $0x9] ss:$0 sm:$0xff] }
0x1b52   : > { %5077 = vmatmul.mubr.msk.f32.vlgmr.msra.gmra.mrb[32].mxu0 %vm493_vm0, %v3760_v2 }
0x1b53   : > { %5211 = vmatpush3.bf16.msra.mxu0 %v5208_v32 }
0x1b54   : > { %5213 = vmatprep.subr.bf16.mxu0 %v5212_v34 }
0x1b57   : > { %5215 = vmatpush3.bf16.msra.mxu0 %v5212_v34  ;;  %v4191_v34 = vld [vmem:[#allocation7 + $0x20] sm:$0xff] }
0x1b58   : > { %5217 = vmatprep.subr.bf16.mxu0 %v5216_v36 }
0x1b5b   : > { %5219 = vmatpush3.bf16.msra.mxu0 %v5216_v36  ;;  %v4210_v36 = vld [vmem:[#allocation7 + $0xb8] sm:$0xff] }
0x1b5c   : > { %5221 = vmatprep.subr.bf16.mxu0 %v5220_v55 }
0x1b5f   : > { %5223 = vmatpush3.bf16.msra.mxu0 %v5220_v55 }
0x1c25   : > { %v5078_v3 = vpop.f32.mrb[32].mxu0 }
0x1c26   : > { %v3850_v4 = vadd.f32 %v5078_v3, %v4638_v63  ;;  %v3844_v10 = vpop.f32.mrb[33].mxu0 }
0x1c27   : > { %v3845_v8 = vadd.f32 %v4638_v63, %v3844_v10 }
0x1c28   : > { %v3854_v5 = vadd.f32 %v3850_v4, %v6222_v26 }
0x1c29   : > { %v3853_v6 = vadd.f32 %v3845_v8, %v6220_v25  ;;  %v4643_v25 = vld [vmem:[%s6591_s5 + $0x20] sm:$0xff] }
0x1c2a   : > { %v3858_v1 = vsel %vm493_vm0, %v3854_v5, 0.0  ;;  %v5200_v22 = vpack.c.bf16 %v4644_v21, %v4643_v25  ;;  %v4188_v25 = vld [vmem:[#allocation7 + $0x8] sm:$0xff]  ;;  %v4205_v21 = vld [vmem:[#allocation7 + $0x90] sm:$0xff] }
0x1c2b   : > { %3859 = vadd.xlane.f32.xlu1 %v3858_v1  ;;  %v3855_v7 = vsel %vm493_vm0, %v3853_v6, 0.0 }
0x1c2c   : > { %3856 = vadd.xlane.f32.xlu0 %v3855_v7  ;;  %5201 = vmatprep.subr.bf16.mxu1 %v5200_v22 }
0x1c2d   : > { %5203 = vmatpush3.bf16.msra.mxu1 %v5200_v22  ;;  %v4206_v22 = vld [vmem:[#allocation7 + $0x98] sm:$0xff] }
0x1c2e   : > { %5205 = vmatprep.subr.bf16.mxu1 %v5204_v27  ;;  %v5228_v24 = vpack.c.bf16 %v4206_v22, %v4205_v21 }
0x1c31   : > { %5207 = vmatpush3.bf16.msra.mxu1 %v5204_v27  ;;  %v4189_v27 = vld [vmem:[#allocation7 + $0x10] sm:$0xff] }
0x1c32   : > { %v5230_v32 = vpack.c.bf16 %v4190_v28, %v4189_v27 }
0x1cb8   : > { %v3860_v9 = vpop.xlane.xlu1 %3859 }
0x1cb9   : > { %v3862_v12 = vmul.f32 0.03125, %v3860_v9  ;;  %v3857_v13 = vpop.xlane.xlu0 %3856 }
0x1cba   : > { %v3861_v14 = vmul.f32 0.03125, %v3857_v13 }
0x1cbb   : > { %v3864_v17 = vsub.f32 %v3854_v5, %v3862_v12 }
0x1cbc   : > { %v3863_v18 = vsub.f32 %v3853_v6, %v3861_v14 }
0x1cbd   : > { %v3866_v20 = vmul.f32 %v3864_v17, %v3864_v17 }
0x1cbe   : > { %v3865_v19 = vmul.f32 %v3863_v18, %v3863_v18 }
0x1cbf   : > { %v3870_v26 = vsel %vm493_vm0, %v3866_v20, 0.0  ;;  %v4187_v20 = vld [vmem:[#allocation7] sm:$0xff] }
0x1cc0   : > { %v3867_v15 = vsel %vm493_vm0, %v3865_v19, 0.0  ;;  %v4203_v19 = vld [vmem:[#allocation7 + $0x80] sm:$0xff]  ;;  %v5226_v23 = vpack.c.bf16 %v4188_v25, %v4187_v20 }
0x1cc1   : > { %3868 = vadd.xlane.f32.xlu0 %v3867_v15  ;;  %v4204_v15 = vld [vmem:[#allocation7 + $0x88] sm:$0xff] }
0x1cc5   : > { %3871 = vadd.xlane.f32.xlu0 %v3870_v26  ;;  %v5224_v26 = vpack.c.bf16 %v4204_v15, %v4203_v19 }
0x1cc7   : > { %5225 = vmatprep.subr.bf16.mxu1 %v5224_v26 }
0x1d4e   : > { %v3869_v37 = vpop.xlane.xlu0 %3868 }
0x1d4f   : > { %v3873_v38 = vmul.f32 0.03125, %v3869_v37  ;;  %v5234_v37 = vpack.c.bf16 %v4192_v30, %v4191_v34  ;;  %v4295_v30 = vld [vmem:[#allocation7 + $0x100] sm:$0xff] }
0x1d51   : > { %v3875_v39 = vadd.f32 1e-05, %v3873_v38  ;;  %v5236_v38 = vpack.c.bf16 %v4210_v36, %v4209_v35  ;;  %v4296_v35 = vld [vmem:[#allocation7 + $0x108] sm:$0xff] }
0x1d52   : > { %v3872_v40 = vpop.xlane.xlu0 %3871 }
0x1d53   : > { %5459 = vrsqrt.f32 %v3875_v39  ;;  %v3874_v41 = vmul.f32 0.03125, %v3872_v40  ;;  %v4193_v39 = vld [vmem:[#allocation7 + $0x30] sm:$0xff]  ;;  %v4194_v40 = vld [vmem:[#allocation7 + $0x38] sm:$0xff] }
0x1d55   : > { %v3876_v42 = vadd.f32 1e-05, %v3874_v41  ;;  %v4211_v41 = vld [vmem:[#allocation7 + $0xc0] sm:$0xff] }
0x1d57   : > { %5461 = vrsqrt.f32 %v3876_v42  ;;  %v4212_v42 = vld [vmem:[#allocation7 + $0xc8] sm:$0xff] }
0x1d5d   : > { %v5460_v43 = vpop.eup %5459 }
0x1d5e   : > { %v3879_v44 = vmul.f32 %v5460_v43, %v3863_v18  ;;  %v5238_v43 = vpack.c.bf16 %v4194_v40, %v4193_v39 }
0x1d60   : > { %v3887_v46 = vmul.f32 %v4641_v29, %v3879_v44  ;;  %v4195_v44 = vld [vmem:[#allocation7 + $0x40] sm:$0xff] }
0x1d61   : > { %v5462_v47 = vpop.eup %5461 }
0x1d62   : > { %v3880_v48 = vmul.f32 %v5462_v47, %v3864_v17  ;;  %v3895_v50 = vadd.f32 %v4642_v45, %v3887_v46  ;;  %v4213_v46 = vld [vmem:[#allocation7 + $0xd0] sm:$0xff]  ;;  %v4214_v47 = vld [vmem:[#allocation7 + $0xd8] sm:$0xff] }
0x1d64   : > { %v3888_v52 = vmul.f32 %v4641_v29, %v3880_v48  ;;  %5087 = vmatprep.mubr.msk.f32.mxu1 %vm493_vm0, %v3895_v50  ;;  %v5240_v29 = vpack.c.bf16 %v4212_v42, %v4211_v41 }
0x1d66   : > { %v3896_v49 = vadd.f32 %v4642_v45, %v3888_v52  ;;  %v4196_v45 = vld [vmem:[#allocation7 + $0x48] sm:$0xff]  ;;  %v4197_v52 = vld [vmem:[#allocation7 + $0x50] sm:$0xff] }
0x1d67   : > { %v5242_v48 = vpack.c.bf16 %v4196_v45, %v4195_v44  ;;  %v5257_v44 = vpack.c.bf16 %v4296_v35, %v4295_v30 }
0x1d68   : > { %5088 = vmatmul.mubr.msk.f32.vlgmr.msra.gmra.mrb[42].mxu1 %vm493_vm0, %v3896_v49 }
0x1d69   : > { %5227 = vmatpush3.bf16.msra.mxu1 %v5226_v23 }
0x1d6a   : > { %5229 = vmatprep.subr.bf16.mxu1 %v5228_v24 }
0x1d6d   : > { %5231 = vmatpush3.bf16.msra.mxu1 %v5230_v32 }
0x1d6e   : > { %5233 = vmatprep.subr.bf16.mxu1 %v5232_v33 }
0x1d71   : > { %5235 = vmatpush3.bf16.msra.mxu1 %v5234_v37 }
0x1d72   : > { %5237 = vmatprep.subr.bf16.mxu1 %v5236_v38 }
0x1d75   : > { %5239 = vmatpush3.bf16.msra.mxu1 %v5238_v43  ;;  %v4297_v43 = vld [vmem:[#allocation7 + $0x110] sm:$0xff] }
0x1d76   : > { %5241 = vmatprep.subr.bf16.mxu1 %v5240_v29  ;;  %v4298_v29 = vld [vmem:[#allocation7 + $0x118] sm:$0xff] }
0x1d79   : > { %5243 = vmatpush3.bf16.msra.mxu1 %v5242_v48  ;;  %v5260_v48 = vpack.c.bf16 %v4298_v29, %v4297_v43 }
0x1e3b   : > { %v5089_v57 = vpop.f32.mrb[42].mxu1 }
0x1e3c   : > { %v3988_v58 = vadd.f32 %v5089_v57, %v4648_v56  ;;  %v3982_v51 = vpop.f32.mrb[43].mxu1 }
0x1e3d   : > { %v3983_v59 = vadd.f32 %v4648_v56, %v3982_v51 }
0x1e3e   : > { %v3992_v61 = vmax.f32 %v3988_v58, 0.0 }
0x1e3f   : > { %v3991_v60 = vmax.f32 %v3983_v59, 0.0 }
0x1e41   : > { %5106 = vmatprep.mubr.msk.f32.mxu0 %vm2178_vm5, %v3991_v60  ;;  %v4662_v60 = vld [vmem:[%s6594_s8 + $0xa] ss:$0 sm:$0xff] }
0x1e42   : > { %5107 = vmatmul.mubr.msk.f32.vlgmr.msra.gmra.mrb[34].mxu0 %vm2178_vm5, %v3992_v61  ;;  %v4215_v61 = vld [vmem:[#allocation7 + $0xe0] sm:$0xff] }
0x1e43   : > { %5141 = vmatprep.mubr.msk.f32.mxu0 %vm5663_vm1, %v5662_v11 }
0x1f15   : > { %v5108_v0 = vpop.f32.mrb[34].mxu0 }
0x1f16   : > { %v4086_v2 = vadd.f32 %v5108_v0, %v4659_v62  ;;  %v4080_v63 = vpop.f32.mrb[35].mxu0 }
0x1f17   : > { %v4081_v3 = vadd.f32 %v4659_v62, %v4080_v63  ;;  %v4216_v62 = vld [vmem:[#allocation7 + $0xe8] sm:$0xff] }
0x1f18   : > { %v4090_v4 = vadd.f32 %v4086_v2, %v3896_v49  ;;  %v4198_v49 = vld [vmem:[#allocation7 + $0x58] sm:$0xff]  ;;  %v5248_v63 = vpack.c.bf16 %v4216_v62, %v4215_v61  ;;  %v4307_v61 = vld [vmem:[#allocation7 + $0x160] sm:$0xff]  ;;  %v4308_v62 = vld [vmem:[#allocation7 + $0x168] sm:$0xff] }
0x1f19   : > { %v4089_v10 = vadd.f32 %v4081_v3, %v3895_v50  ;;  %v5244_v50 = vpack.c.bf16 %v4214_v47, %v4213_v46  ;;  %v5246_v53 = vpack.c.bf16 %v4198_v49, %v4197_v52  ;;  %v4199_v3 = vld [vmem:[#allocation7 + $0x60] sm:$0xff]  ;;  %v5679_v46 = vmov 0.0|0.0   ;;  %v4300_v52 = vld [vmem:[#allocation7 + $0x128] sm:$0xff] }
0x1f1a   : > { %v4094_v8 = vsel %vm493_vm0, %v4090_v4, 0.0  ;;  %5256 = vmatprep.subr.bf16.mxu0 %v5679_v46 }
0x1f1b   : > { %4095 = vadd.xlane.f32.xlu0 %v4094_v8  ;;  %v4091_v5 = vsel %vm493_vm0, %v4089_v10, 0.0  ;;  %5245 = vmatprep.subr.bf16.mxu1 %v5244_v50  ;;  %v4299_v50 = vld [vmem:[#allocation7 + $0x120] sm:$0xff] }
0x1f1c   : > { %4092 = vadd.xlane.f32.xlu1 %v4091_v5  ;;  %5247 = vmatpush3.bf16.msra.mxu1 %v5246_v53  ;;  %v5263_v49 = vpack.c.bf16 %v4300_v52, %v4299_v50  ;;  %v4301_v53 = vld [vmem:[#allocation7 + $0x130] sm:$0xff] }
0x1f1d   : > { %5249 = vmatprep.subr.bf16.mxu1 %v5248_v63  ;;  %5258 = vmatpush3.bf16.msra.mxu0 %v5257_v44 }
0x1f1e   : > { %5259 = vmatprep.subr.bf16.mxu0 %v5679_v46 }
0x1f21   : > { %5261 = vmatpush3.bf16.msra.mxu0 %v5260_v48 }
0x1f22   : > { %5262 = vmatprep.subr.bf16.mxu0 %v5679_v46 }
0x1f25   : > { %5264 = vmatpush3.bf16.msra.mxu0 %v5263_v49 }
0x1f26   : > { %5265 = vmatprep.subr.bf16.mxu0 %v5679_v46 }
0x1fa8   : > { %v4096_v6 = vpop.xlane.xlu0 %4095 }
0x1fa9   : > { %v4098_v1 = vmul.f32 0.03125, %v4096_v6  ;;  %v4093_v7 = vpop.xlane.xlu1 %4092 }
0x1faa   : > { %v4097_v11 = vmul.f32 0.03125, %v4093_v7  ;;  %v4217_v7 = vld [vmem:[#allocation7 + $0xf0] sm:$0xff] }
0x1fab   : > { %v6468_v9 = vsub.f32 %v4090_v4, %v4098_v1  ;;  %v4200_v4 = vld [vmem:[#allocation7 + $0x68] sm:$0xff] }
0x1fac   : > { %v6470_v12 = vsub.f32 %v4089_v10, %v4097_v11  ;;  %v4663_v10 = vld [vmem:[%s6594_s8 + $0xb] ss:$0 sm:$0xff]  ;;  %v5250_v5 = vpack.c.bf16 %v4200_v4, %v4199_v3  ;;  %v4218_v11 = vld [vmem:[#allocation7 + $0xf8] sm:$0xff] }
0x1fad   : > { %v4102_v13 = vmul.f32 %v6468_v9, %v6468_v9 }
0x1fae   : > { %v4101_v14 = vmul.f32 %v6470_v12, %v6470_v12  ;;  %5251 = vmatpush3.bf16.msra.mxu1 %v5250_v5 }
0x1faf   : > { %v4106_v17 = vsel %vm493_vm0, %v4102_v13, 0.0  ;;  %v4201_v13 = vld [vmem:[#allocation7 + $0x70] sm:$0xff] }
0x1fb0   : > { %4107 = vadd.xlane.f32.xlu0 %v4106_v17  ;;  %v4103_v18 = vsel %vm493_vm0, %v4101_v14, 0.0  ;;  %v5252_v17 = vpack.c.bf16 %v4218_v11, %v4217_v7 }
0x1fb1   : > { %4104 = vadd.xlane.f32.xlu1 %v4103_v18 }
0x1fb2   : > { %5253 = vmatprep.subr.bf16.mxu1 %v5252_v17 }
0x203d   : > { %v4108_v54 = vpop.xlane.xlu0 %4107 }
0x203e   : > { %v4110_v55 = vmul.f32 0.03125, %v4108_v54  ;;  %v4105_v56 = vpop.xlane.xlu1 %4104  ;;  %v4302_v54 = vld [vmem:[#allocation7 + $0x138] sm:$0xff] }
0x203f   : > { %v4109_v57 = vmul.f32 0.03125, %v4105_v56  ;;  %v4303_v56 = vld [vmem:[#allocation7 + $0x140] sm:$0xff] }
0x2040   : > { %v4112_v58 = vadd.f32 1e-05, %v4110_v55  ;;  %v5266_v55 = vpack.c.bf16 %v4302_v54, %v4301_v53 }
0x2041   : > { %v4111_v51 = vadd.f32 1e-05, %v4109_v57  ;;  %v4304_v57 = vld [vmem:[#allocation7 + $0x148] sm:$0xff] }
0x2042   : > { %5463 = vrsqrt.f32 %v4112_v58  ;;  %5267 = vmatpush3.bf16.msra.mxu0 %v5266_v55  ;;  %v5269_v58 = vpack.c.bf16 %v4304_v57, %v4303_v56 }
0x2043   : > { %5465 = vrsqrt.f32 %v4111_v51  ;;  %5268 = vmatprep.subr.bf16.mxu0 %v5679_v46  ;;  %v4305_v51 = vld [vmem:[#allocation7 + $0x150] sm:$0xff] }
0x2046   : > { %5270 = vmatpush3.bf16.msra.mxu0 %v5269_v58 }
0x2047   : > { %5271 = vmatprep.subr.bf16.mxu0 %v5679_v46 }
0x204c   : > { %v5464_v59 = vpop.eup %5463 }
0x204d   : > { %v5466_v0 = vpop.eup %5465  ;;  %v4116_v2 = vmul.f32 %v5464_v59, %v6468_v9  ;;  %v4202_v9 = vld [vmem:[#allocation7 + $0x78] sm:$0xff] }
0x204e   : > { %v4115_v8 = vmul.f32 %v5466_v0, %v6470_v12  ;;  %v5254_v19 = vpack.c.bf16 %v4202_v9, %v4201_v13  ;;  %v4306_v59 = vld [vmem:[#allocation7 + $0x158] sm:$0xff]  ;;  %v5275_v0 = vpack.c.bf16 %v4308_v62, %v4307_v61 }
0x204f   : > { %v4124_v6 = vmul.f32 %v4662_v60, %v4116_v2 }
0x2050   : > { %v4123_v1 = vmul.f32 %v4662_v60, %v4115_v8  ;;  %5255 = vmatpush3.bf16.msra.mxu1 %v5254_v19  ;;  %v5272_v60 = vpack.c.bf16 %v4306_v59, %v4305_v51  ;;  %v4310_v19 = vld [vmem:[#allocation7 + $0x178] sm:$0xff] }
0x2051   : > { %v4132_v14 = vadd.f32 %v4663_v10, %v4124_v6 }
0x2052   : > { %v4131_v18 = vadd.f32 %v4663_v10, %v4123_v1  ;;  %5273 = vmatpush3.bf16.msra.mxu0 %v5272_v60 }
0x2053   : > { %v4147_v15 = vrot.slane %v4132_v14, 1  ;;  %v4169_v20 = vrot.slane %v4132_v14, 5  ;;  %v4163_v26 = vrot.slane %v4132_v14, 4  ;;  %v4153_v25 = vrot.slane %v4132_v14, 2  ;;  %5274 = vmatprep.subr.bf16.mxu0 %v5679_v46 }
0x2054   : > { %v4146_v12 = vrot.slane %v4131_v18, 2  ;;  %v4168_v21 = vrot.slane %v4131_v18, 6  ;;  %v4141_v22 = vrot.slane %v4131_v18, 1  ;;  %v4162_v23 = vrot.slane %v4131_v18, 5 }
0x2055   : > { %v4152_v24 = vrot.slane %v4131_v18, 3  ;;  %v4174_v27 = vrot.slane %v4131_v18, 7  ;;  %v4175_v28 = vrot.slane %v4132_v14, 6  ;;  %v4137_v16 = vrot.slane %v4132_v14, 7 }
0x2056   : > { %v4148_v31 = vsel %vm4138_vm6, %v4147_v15, %v4146_v12  ;;  %v4170_v32 = vsel %vm4138_vm6, %v4169_v20, %v4168_v21  ;;  %v4142_v33 = vsel %vm4138_vm6, %v4132_v14, %v4141_v22  ;;  %v4164_v34 = vsel %vm4138_vm6, %v4163_v26, %v4162_v23  ;;  %5276 = vmatpush3.bf16.msra.mxu0 %v5275_v0  ;;  %v4664_v26 = vld [vmem:[%s6656_s17] ss:$0 sm:$0xff] }
0x2057   : > { %v5377_v36 = vpack.i.bf16 %v4148_v31, %v4170_v32  ;;  %v5372_v37 = vpack.i.bf16 %v4142_v33, %v4164_v34  ;;  %v4154_v38 = vsel %vm4138_vm6, %v4153_v25, %v4152_v24  ;;  %v4176_v39 = vsel %vm4138_vm6, %v4175_v28, %v4174_v27  ;;  %5277 = vmatprep.subr.bf16.mxu0 %v5679_v46 }
0x2058   : > { %v4139_v40 = vsel %vm4138_vm6, %v4137_v16, %v4131_v18  ;;  %v4158_v41 = vrot.slane %v4131_v18, 4  ;;  %v4159_v42 = vrot.slane %v4132_v14, 3  ;;  %v5382_v47 = vpack.i.bf16 %v4154_v38, %v4176_v39  ;;  %v4309_v18 = vld [vmem:[#allocation7 + $0x170] sm:$0xff] }
0x2059   : > { %5378 = vrot.lane.b32.xlu0 %v5377_v36, %s5665_s27  ;;  %5373 = vrot.lane.b32.xlu1 %v5372_v37, %s5678_s28  ;;  %v5278_v15 = vpack.c.bf16 %v4310_v19, %v4309_v18 }
0x205a   : > { %v4160_v45 = vsel %vm4138_vm6, %v4159_v42, %v4158_v41 }
0x205b   : > { %5279 = vmatpush3.bf16.msra.mxu0 %v5278_v15 }
0x205d   : > { %5383 = vrot.lane.b32.xlu1 %v5382_v47, %s5664_s12  ;;  %s4554_s12 = sshll.u32 %s5922_s23, 1 }
0x205e   : > { %s462_s20 = scalar_lea.vmem [#allocation8], %s4554_s12 }
0x205f   : > { %s4408_s29 = sshll.u32 %s462_s20, 4  ;;  %s4409_s29 = int_to_ptr.vmem [resolvable:$true] %s4408_s29 }
0x2060   : > { %s5553_s30 = scalar_lea.vmem %s4409_s29, 32  ;;  %p5560_p2 = scmp.lt.s32.totalorder %s4409_s29, %s5558_s10 }
0x2061   : > { %p5554_p8 = scmp.ne.s32.totalorder %s4409_s29, %s5553_s30  ;;  %p5561_p0 = scmp.lt.s32.totalorder %s5559_s11, %s5553_s30 }
0x2063   : > { %p5555_p5 = pnand %p5554_p8, %p6658_p4  ;;  %p5562_p9 = por %p5561_p0, %p5560_p2 }
0x2065   : > { %p5556_p10 = pneg %p5555_p5 }
0x2067   : > { %p5563_p6 = pnand %p5562_p9, %p5556_p10 }
0x20cb   : > { %v5379_v2 = vpop.permute.xlu0 %5378  ;;  %v5374_v63 = vpop.permute.xlu1 %5373 }
0x20cc   : > { %v5376_v3 = vunpack.i.h.bf16 %v5374_v63  ;;  %v5375_v4 = vunpack.i.l.bf16 %v5374_v63  ;;  %v5381_v10 = vunpack.i.h.bf16 %v5379_v2  ;;  %v5380_v8 = vunpack.i.l.bf16 %v5379_v2 }
0x20ce   : > { %v4180_v5 = vsel %vm493_vm0, %v4139_v40, %v5376_v3  ;;  %v4184_v6 = vsel %vm493_vm0, %v4160_v45, %v5375_v4 }
0x20cf   : > { %v5384_v1 = vpop.permute.xlu1 %5383  ;;  %v4185_v13 = vsel %vm2178_vm5, %v4184_v6, %v5380_v8  ;;  %v4181_v14 = vsel %vm2178_vm5, %v4180_v5, %v5381_v10 }
0x20d0   : > { %v5386_v7 = vunpack.i.h.bf16 %v5384_v1  ;;  %v5385_v11 = vunpack.i.l.bf16 %v5384_v1 }
0x20d2   : > { %v4186_v17 = vsel %vm4182_vm7, %v4185_v13, %v5385_v11  ;;  %v4183_v9 = vsel %vm4182_vm7, %v4181_v14, %v5386_v7 }
0x20d3   : > { %4289 = vmatprep.mubr.f32.mxu1 %v4186_v17 }
0x20d4   : > { %4290 = vmatmul.mubr.f32.vlgmr.msra.gmra.mrb[44].mxu1 %v4183_v9 }
0x21a7   : > { %v4825_v20 = vpop.f32.mrb[44].mxu1 }
0x21a8   : > { %v4826_v25 = vpop.f32.mrb[45].mxu1 }
0x21a9   : > { %v4827_v12 = vadd.f32 %v4826_v25, %v4825_v20 }
0x21ab   : > { %v4292_v21 = vadd.f32 %v4827_v12, %v4664_v26 }
0x21ad   : > { %5142 = vmatmul.mubr.f32.vlgmr.msra.gmra.mrb[36].mxu0 %v4292_v21  ;;  %4387 = vst [vmem:[%s462_s20] sm:$0x3] %v4292_v21 }
0x21ae   : > { %5566 = shalt.err (!%p5563_p6)
}
0x21af   : > { %s5567_s28 = scalar_lea.hbm %s6512_s19, 32  ;;  %s5571_s20 = scalar_lea.hbm %s6657_s13, 64 }
0x21b0   : > { %p5568_p12 = scmp.ne.s32.totalorder %s6512_s19, %s5567_s28  ;;  %p5572_p11 = scmp.lt.u32.totalorder %s6512_s19, %s6657_s13 }
0x21b1   : > { %p5573_p3 = scmp.lt.u32.totalorder %s5571_s20, %s5567_s28  ;;  %p5575_p8 = scmp.lt.u32.totalorder %s5567_s28, %s6512_s19 }
0x21b2   : > { %p5569_p13 = pnand %p5568_p12, %p6658_p4 }
0x21b3   : > { %p5574_p7 = por %p5573_p3, %p5572_p11 }
0x21b4   : > { %p5570_p1 = pneg %p5569_p13 }
0x21b5   : > { %p5576_p5 = por %p5575_p8, %p5574_p7 }
0x21b7   : > { %p5577_p10 = pnand %p5576_p5, %p5570_p1 }
0x21b9   : > { %5580 = shalt.err (!%p5577_p10)
}
0x21ba   : > { %5290 = dma.vmem_to_hbm [thread:$0]  (%p6658_p4), %s4409_s29, 32, %s6512_s19, %s4390_s21   ;;  %v4665_v22 = vld [vmem:[%s6656_s17 + $0x1] ss:$0 sm:$0xff] }
0x21bb   : > { %s469_s10 = scalar_lea.vmem [#allocation9], %s4554_s12  ;;  %s6659_s1 = sld [smem:[#allocation23_spill]] }
0x21bc   : > { %s4421_s11 = sshll.u32 %s469_s10, 4  ;;  %s4395_s19 = scalar_lea.sflag [#allocation10], %s5922_s23  ;;  %s6544_s11 = int_to_ptr.vmem [resolvable:$true] %s4421_s11 }
0x21bd   : > { %s5581_s29 = scalar_lea.vmem %s6544_s11, 32  ;;  %s5681_s12 = smov [#allocation9]  }
0x21be   : > { %p5582_p2 = scmp.ne.s32.totalorder %s6544_s11, %s5581_s29  ;;  %s5585_s21 = sshll.u32 %s5681_s12, 4  ;;  %s5586_s21 = int_to_ptr.vmem [resolvable:$false] %s5585_s21 }
0x21bf   : > { %s5587_s25 = scalar_lea.vmem %s5586_s21, 64  ;;  %p5588_p6 = scmp.lt.s32.totalorder %s6544_s11, %s5586_s21 }
0x21c0   : > { %p5583_p0 = pnand %p5582_p2, %p6658_p4  ;;  %p5589_p12 = scmp.lt.s32.totalorder %s5587_s25, %s5581_s29 }
0x21c1   : > { %s6542_s20 = scalar_lea.hbm %s6659_s1, %s4668_s16 }
0x21c2   : > { %p5584_p9 = pneg %p5583_p0  ;;  %p5590_p13 = por %p5589_p12, %p5588_p6 }
0x21c4   : > { %p5591_p1 = pnand %p5590_p13, %p5584_p9 }
0x2280   : > { %v4383_v23 = vpop.f32.mrb[36].mxu0 }
0x2281   : > { %v4384_v24 = vadd.f32 %v4665_v22, %v4383_v23  ;;  %v5143_v27 = vpop.f32.mrb[37].mxu0 }
0x2283   : > { %4388 = vst [vmem:[%s469_s10] sm:$0x3] %v4384_v24 }
0x2284   : > { %5594 = shalt.err (!%p5591_p1)
}
0x2285   : > { %s5595_s23 = scalar_lea.hbm %s6542_s20, 32  ;;  %s5599_s26 = scalar_lea.hbm %s6659_s1, 64 }
0x2286   : > { %p5596_p11 = scmp.ne.s32.totalorder %s6542_s20, %s5595_s23  ;;  %p5600_p8 = scmp.lt.u32.totalorder %s6542_s20, %s6659_s1 }
0x2287   : > { %p5601_p5 = scmp.lt.u32.totalorder %s5599_s26, %s5595_s23  ;;  %p5603_p2 = scmp.lt.u32.totalorder %s5595_s23, %s6542_s20 }
0x2288   : > { %p5597_p3 = pnand %p5596_p11, %p6658_p4 }
0x2289   : > { %p5602_p10 = por %p5601_p5, %p5600_p8 }
0x228a   : > { %p5598_p7 = pneg %p5597_p3 }
0x228b   : > { %p5604_p0 = por %p5603_p2, %p5602_p10 }
0x228d   : > { %p5605_p9 = pnand %p5604_p0, %p5598_p7 }
0x228f   : > { %5608 = shalt.err (!%p5605_p9)
}
0x2290   : > { %5291 = dma.vmem_to_hbm [thread:$0]  (%p6658_p4), %s6544_s11, 32, %s6542_s20, %s4395_s19  }
0x2291 PF: > { %s6660_s10 = sld [smem:[#allocation15_spill]]  ;;  %s6661_s28 = sld [smem:[#allocation19_spill]] }
0x2292   : > { %p6663_p12 = scmp.ge.s32.totalorder %s5655_s24, 2 }
0x2297   : > { %s4433_s27 = sand.u32 1, %s6660_s10   ;;  %p6662_p6 = scmp.ne.s32.totalorder %s6661_s28, 0 }
0x2298   : > { %s4434_s29 = scalar_lea.sflag [#allocation4], %s4433_s27 }
0x2299   : > { %p5306_p13 = pnand %p6663_p12, %p6662_p6 }
0x229b   : > { %5634 = dma.done.wait (!%p5306_p13), %s4434_s29, 32  }
0x229c   : > { %5636 = vsyncadd (!%p5306_p13), %s4434_s29, 4294967264  ;;  %s4443_s12 = scalar_lea.sflag [#allocation10], %s4433_s27 }
0x229d   : > { %5638 = dma.done.wait (!%p5306_p13), %s4443_s12, 32  }
0x229e   : > { %5640 = vsyncadd (!%p5306_p13), %s4443_s12, 4294967264  ;;  %s6664_s24 = sld [smem:[#allocation17_spill]]  ;;  %s6665_s15 = sld [smem:[#allocation16_spill]] }
0x229f   : > { %s6666_s23 = sld [smem:[#allocation18_spill]]  ;;  %s6667_s21 = smov %s5647_s22 }
0x22a4   : > { %p30_p4 = scmp.ge.s32.totalorder %s6664_s24, 4   ;;  %s6668_s22 = smov %s6665_s15 }
0x22a6   :  { %32 = sbr.rel (!%p30_p4) target bundleno = 13 (0xd), region = 141 }
0x22ad   :  { %4448 = vsyncpa [#allocation3], 1 }
0x22ae   :  { %4450 = vsyncpa [#allocation3 + $0x1], 1 }
0x22af   :  { %4451 = vsyncpa [#allocation6], 1 }
0x22b0   :  { %4452 = vsyncpa [#allocation4], 1 }
0x22b1   :  { %4454 = vsyncpa [#allocation4 + $0x1], 1 }
0x22b2   :  { %4455 = vsyncpa [#allocation10], 1 }
0x22b3   :  { %4457 = vsyncpa [#allocation10 + $0x1], 1 }

</bundles_post_ra>
